<compile_context>
chip_gen: v5e
topology: v5e:2x2
jax: 0.10.0
libtpu: 0.0.40
codegen_flags: <defaults>
</compile_context>

<pallas_src>
import jax
import jax.numpy as jnp
import numpy as np
from jax import lax
from jax.experimental import pallas as pl
from jax.experimental.pallas import tpu as pltpu


def _rotation_matrix(theta, phi, psi):
    # TODO(synk): the repo's rotation_tensor() is not shown; a standard
    # R = Rz @ Ry @ Rx Euler composition is assumed (used consistently by both
    # the kernel wrapper and the reference below).
    ct, st = jnp.cos(theta), jnp.sin(theta)
    cp, sp = jnp.cos(phi), jnp.sin(phi)
    cs, ss = jnp.cos(psi), jnp.sin(psi)
    one = jnp.float32(1.0)
    zero = jnp.float32(0.0)
    rx = jnp.stack([jnp.stack([one, zero, zero]),
                    jnp.stack([zero, ct, st]),
                    jnp.stack([zero, -st, ct])])
    ry = jnp.stack([jnp.stack([cp, zero, -sp]),
                    jnp.stack([zero, one, zero]),
                    jnp.stack([sp, zero, cp])])
    rz = jnp.stack([jnp.stack([cs, ss, zero]),
                    jnp.stack([-ss, cs, zero]),
                    jnp.stack([zero, zero, one])])
    return rz @ ry @ rx


def _default_weight_dtype():
    """bf16 weight build only where the VPU is natively bf16-capable."""
    try:
        kind = jax.devices()[0].device_kind.lower()
    except Exception:
        return jnp.float32
    if "v6" in kind or "v7" in kind:
        return jnp.bfloat16
    return jnp.float32


def _pick_td(D, HW, target_k=1024):
    """Largest divisor of D such that the V-chunk (TD*HW) stays near target_k."""
    best = 1
    for td in range(1, D + 1):
        if D % td == 0 and td * HW <= max(target_k, HW):
            best = td
    return best


def _make_kernel(TD, H_pad, W_pad, TP, weight_dtype):
    HW = H_pad * W_pad
    VCHUNK = TD * HW

    def kernel(kr_ref, coords_ref, vol_ref, out_ref, acc_ref, whw_ref):
        # kr_ref    : (2*P,) int32 SMEM — per point-tile [k_lo, k_hi] slab range
        # coords_ref: (3, TP) f32      — rows = un-normalized (x->W, y->H, z->D)
        # vol_ref   : (C_pad, VCHUNK) bf16 — one D-slab of the flattened volume
        # out_ref   : (C_pad, TP) f32
        # acc_ref   : (C_pad, TP) f32 VMEM accumulator
        # whw_ref   : (HW, TP) weight_dtype VMEM — hoisted wh (x) ww per tile
        p = pl.program_id(0)
        k = pl.program_id(1)

        @pl.when(k == 0)
        def _():
            acc_ref[...] = jnp.zeros_like(acc_ref)
            xc = coords_ref[0:1, :]                                     # (1, TP)
            yc = coords_ref[1:2, :]                                     # (1, TP)
            h_idx = lax.broadcasted_iota(jnp.int32, (H_pad, 1), 0).astype(jnp.float32)
            w_idx = lax.broadcasted_iota(jnp.int32, (W_pad, 1), 0).astype(jnp.float32)
            wh = jnp.maximum(0.0, 1.0 - jnp.abs(h_idx - yc)).astype(weight_dtype)
            ww = jnp.maximum(0.0, 1.0 - jnp.abs(w_idx - xc)).astype(weight_dtype)
            whw_ref[...] = (wh[:, None, :] * ww[None, :, :]).reshape(HW, TP)

        klo = kr_ref[2 * p]
        khi = kr_ref[2 * p + 1]
        # actual D-slab index this step fetched (matches the volume index_map)
        chunk = jnp.minimum(klo + k, khi)

        @pl.when(klo + k <= khi)
        def _():
            zc = coords_ref[2:3, :]                                     # (1, TP)
            d_idx = (lax.broadcasted_iota(jnp.int32, (TD, 1), 0)
                     + chunk * TD).astype(jnp.float32)                  # (TD, 1)
            wd = jnp.maximum(0.0, 1.0 - jnp.abs(d_idx - zc)).astype(weight_dtype)

            # separable weight: wd (x) whw -> (TD, HW, TP) -> (VCHUNK, TP),
            # already in (K, N) orientation for the MXU (transpose-free).
            wt = (wd[:, None, :] * whw_ref[...][None, :, :]).reshape(VCHUNK, TP)

            acc_ref[...] += lax.dot_general(
                vol_ref[...], wt.astype(vol_ref.dtype),
                dimension_numbers=(((1,), (0,)), ((), ())),
                preferred_element_type=jnp.float32)                     # (C_pad, TP)

        @pl.when(k == pl.num_programs(1) - 1)
        def _():
            out_ref[...] = acc_ref[...].astype(out_ref.dtype)

    return kernel


class SliceExtractorPallas:
    """JAX/Pallas port of SliceExtractor. `grid` is already normalized to [-1, 1]."""

    def __init__(self, input_volume_shape, grid, coordinate_system, num_slices,
                 allow_global_shift_xy=False, allow_global_shift_z=False,
                 allow_slice_shift=False, allow_rotations=False,
                 tile_points=512, target_chunk_k=1024, weight_dtype=None,
                 sort_points_by_z=True):
        self.vol_shape = input_volume_shape
        self.allow_shifts = allow_global_shift_xy or allow_global_shift_z
        self.allow_global_shift_xy = allow_global_shift_xy
        self.allow_global_shift_z = allow_global_shift_z
        self.allow_slice_shifts = allow_slice_shift
        self.allow_rotations = allow_rotations
        self.initial_alignment_rotation = jnp.zeros(3, jnp.float32)
        self.num_slices = num_slices
        self.grid = jnp.asarray(grid, jnp.float32)                       # (N, 3)
        self.coordinate_system = jnp.asarray(coordinate_system, jnp.float32)  # (S, 3, 3)
        self.tile_points = tile_points
        self.target_chunk_k = target_chunk_k
        self.weight_dtype = (_default_weight_dtype() if weight_dtype is None
                             else weight_dtype)
        self.sort_points_by_z = sort_points_by_z

    def _transform_params(self, global_offsets, per_slice_offsets, global_rotations):
        r_weight = 1.0 if self.allow_rotations else 0.0
        ang = global_rotations[0, 0] * r_weight + self.initial_alignment_rotation
        R = _rotation_matrix(ang[0], ang[1], ang[2])                     # (3, 3)
        rotated_coords = jnp.einsum("sij,jk->sik", self.coordinate_system, R)

        if self.allow_shifts:
            mask = jnp.array([1.0 if self.allow_global_shift_z else 0.0,
                              1.0 if self.allow_global_shift_xy else 0.0,
                              1.0 if self.allow_global_shift_xy else 0.0],
                             jnp.float32)
            goff = global_offsets[0, 0] * mask
        else:
            goff = jnp.zeros(3, jnp.float32)

        if self.allow_slice_shifts:
            soff = jnp.einsum("si,sij->sj", per_slice_offsets[0], rotated_coords)
        else:
            soff = jnp.zeros((self.num_slices, 3), jnp.float32)
        return R, goff, soff

    def __call__(self, args):
        vol, global_offsets, per_slice_offsets, global_rotations = args
        B, C, D, H, W = vol.shape
        assert B == 1, "forward() semantics (per-slice shift path) assume batch == 1"
        S = self.num_slices
        sz0, sz1 = self.vol_shape[0], self.vol_shape[1]
        N = self.grid.shape[0]
        TP = self.tile_points
        wdt = self.weight_dtype

        # --- tiny XLA-side prework: transformed, un-normalized coordinates ----
        R, goff, soff = self._transform_params(global_offsets, per_slice_offsets,
                                               global_rotations)
        g = self.grid @ R + goff[None]                                   # (N, 3)
        pts_per_slice = N // S
        g = (g.reshape(S, pts_per_slice, 3) + soff[:, None, :]).reshape(N, 3)

        # un-normalize (align_corners=True): x indexes W, y indexes H, z indexes D
        xc = (g[:, 0] + 1.0) * 0.5 * (W - 1)
        yc = (g[:, 1] + 1.0) * 0.5 * (H - 1)
        zc = (g[:, 2] + 1.0) * 0.5 * (D - 1)

        # z-sort the points so each TP tile has a tight active-slab range
        if self.sort_points_by_z:
            perm = jnp.argsort(zc)
            inv_perm = jnp.argsort(perm)
            xc, yc, zc = xc[perm], yc[perm], zc[perm]
        else:
            inv_perm = None

        coords = jnp.stack([xc, yc, zc], axis=0).astype(jnp.float32)     # (3, N)

        # pad point axis to a multiple of TP (repeat last point: no z-span growth)
        P = (N + TP - 1) // TP
        N_pad = P * TP
        if N_pad != N:
            coords = jnp.concatenate(
                [coords, jnp.broadcast_to(coords[:, -1:], (3, N_pad - N))], axis=1)

        # pad volume H/W so in-kernel (TD, HW, TP)->(VCHUNK, TP) reshapes are
        # layout no-ops: W multiple of the sublane tile, H*W multiple of 128.
        w_mult = 8 if wdt == jnp.float32 else 16
        W_pad = ((W + w_mult - 1) // w_mult) * w_mult
        H_pad = H
        while (H_pad * W_pad) % 128 != 0:
            H_pad += 1
        HW = H_pad * W_pad

        # D-slab chunking of the contraction dimension
        TD = _pick_td(D, HW, self.target_chunk_k)
        K = D // TD
        VCHUNK = TD * HW

        # per point-tile active D-slab range: tent(d - z) is nonzero only for
        # d in {floor(z), ceil(z)}, so slabs covering floor(z_min)..ceil(z_max).
        zt = coords[2].reshape(P, TP)
        z_min = jnp.min(zt, axis=1)
        z_max = jnp.max(zt, axis=1)
        d_lo = jnp.clip(jnp.floor(z_min), 0, D - 1).astype(jnp.int32)
        d_hi = jnp.clip(jnp.ceil(z_max), 0, D - 1).astype(jnp.int32)
        k_lo = d_lo // TD
        k_hi = d_hi // TD
        kranges = jnp.stack([k_lo, k_hi], axis=1).reshape(-1)            # (2*P,) int32

        # shrink the static K extent to the worst-case active-slab count when
        # shapes are concrete (eager call); fall back to full depth under jit.
        try:
            K_grid = int(jnp.max(k_hi - k_lo)) + 1
            K_grid = max(1, min(K_grid, K))
        except Exception:
            K_grid = K

        # pad channels to a multiple of 16 (aligned bf16 sublane tile for the
        # MXU LHS; extra rows at this size are essentially free), bf16 volume.
        C_pad = ((C + 15) // 16) * 16
        vol_c = vol[0]                                                   # (C, D, H, W)
        if (H_pad, W_pad) != (H, W):
            vol_c = jnp.pad(vol_c, ((0, 0), (0, 0), (0, H_pad - H), (0, W_pad - W)))
        vol_flat = vol_c.reshape(C, D * HW)
        if C_pad != C:
            vol_flat = jnp.concatenate(
                [vol_flat, jnp.zeros((C_pad - C, D * HW), vol_flat.dtype)], axis=0)
        vol_flat = vol_flat.astype(jnp.bfloat16)

        kernel = _make_kernel(TD, H_pad, W_pad, TP, wdt)

        def coords_map(p, k, kr):
            return (0, p)

        def vol_map(p, k, kr):
            # only DMA D-slabs inside this tile's active z range; clamping to
            # k_hi makes trailing steps reuse the already-resident slab (no DMA).
            return (0, jnp.minimum(kr[2 * p] + k, kr[2 * p + 1]))

        def out_map(p, k, kr):
            return (0, p)

        grid_spec = pltpu.PrefetchScalarGridSpec(
            num_scalar_prefetch=1,
            grid=(P, K_grid),                               # reduction axis last
            in_specs=[
                pl.BlockSpec((3, TP), coords_map),          # lane-dense coordinates
                pl.BlockSpec((C_pad, VCHUNK), vol_map),     # bf16 volume slab
            ],
            out_specs=pl.BlockSpec((C_pad, TP), out_map),
            scratch_shapes=[pltpu.VMEM((C_pad, TP), jnp.float32),
                            pltpu.VMEM((HW, TP), wdt)],
        )

        out_flat = pl.pallas_call(
            kernel,
            out_shape=jax.ShapeDtypeStruct((C_pad, N_pad), jnp.float32),
            grid_spec=grid_spec,
            compiler_params=pltpu.CompilerParams(
                dimension_semantics=("parallel", "arbitrary")),
        )(kranges, coords, vol_flat)

        # (C_pad, N_pad) -> undo z-sort -> (C, S, sz0, sz1) -> (1, C, sz0, sz1, S)
        out_cols = out_flat[:C, :N]
        if self.sort_points_by_z:
            out_cols = jnp.take(out_cols, inv_perm, axis=1)
        out = out_cols.reshape(C, S, sz0, sz1)
        out = jnp.transpose(out, (0, 2, 3, 1))[None]
        return out


# ---------------- pure-JAX reference (gather-based grid_sample) ----------------

def _trilinear_ref(vol_cdhw, coords_xyz):
    C, D, H, W = vol_cdhw.shape
    x = (coords_xyz[:, 0] + 1.0) * 0.5 * (W - 1)
    y = (coords_xyz[:, 1] + 1.0) * 0.5 * (H - 1)
    z = (coords_xyz[:, 2] + 1.0) * 0.5 * (D - 1)
    x0, y0, z0 = jnp.floor(x), jnp.floor(y), jnp.floor(z)
    out = jnp.zeros((C, coords_xyz.shape[0]), jnp.float32)
    for dz in (0.0, 1.0):
        for dy in (0.0, 1.0):
            for dx in (0.0, 1.0):
                xi, yi, zi = x0 + dx, y0 + dy, z0 + dz
                w = (jnp.maximum(0.0, 1.0 - jnp.abs(x - xi))
                     * jnp.maximum(0.0, 1.0 - jnp.abs(y - yi))
                     * jnp.maximum(0.0, 1.0 - jnp.abs(z - zi)))
                valid = ((xi >= 0) & (xi <= W - 1) & (yi >= 0) & (yi <= H - 1)
                         & (zi >= 0) & (zi <= D - 1)).astype(jnp.float32)
                xc = jnp.clip(xi, 0, W - 1).astype(jnp.int32)
                yc = jnp.clip(yi, 0, H - 1).astype(jnp.int32)
                zc = jnp.clip(zi, 0, D - 1).astype(jnp.int32)
                vals = vol_cdhw[:, zc, yc, xc]                     # (C, N)
                out = out + (w * valid)[None, :] * vals
    return out


def reference_forward(extractor, args):
    vol, global_offsets, per_slice_offsets, global_rotations = args
    _, C, D, H, W = vol.shape
    R, goff, soff = extractor._transform_params(global_offsets, per_slice_offsets,
                                                global_rotations)
    g = extractor.grid @ R + goff[None]                            # (N, 3)
    S = extractor.num_slices
    g = (g.reshape(S, -1, 3) + soff[:, None, :]).reshape(-1, 3)
    sampled = _trilinear_ref(vol[0], g)                            # (C, N)
    sz0, sz1 = extractor.vol_shape[0], extractor.vol_shape[1]
    return jnp.transpose(sampled.reshape(C, S, sz0, sz1), (0, 2, 3, 1))[None]


if __name__ == "__main__":
    key = jax.random.PRNGKey(0)
    B, C = 1, 4
    D = H = W = 16
    vol_shape = (D, H, W)
    S = 3                                   # num_slices
    sz0, sz1 = vol_shape[0], vol_shape[1]

    k1, k2, k3, k4 = jax.random.split(key, 4)
    vol = jax.random.normal(k1, (B, C, D, H, W), jnp.float32)

    # synthetic normalized slice grid in [-1, 1] (stands in for DICOM XYZs)
    xs = jnp.linspace(-0.85, 0.85, sz1)
    ys = jnp.linspace(-0.85, 0.85, sz0)
    slices = []
    for s in range(S):
        yy, xx = jnp.meshgrid(ys, xs, indexing="ij")
        zz = jnp.full_like(xx, -0.5 + 0.5 * s)
        slices.append(jnp.stack([xx.ravel(), yy.ravel(), zz.ravel()], axis=-1))
    grid_pts = jnp.concatenate(slices, axis=0).astype(jnp.float32)   # (N, 3)
    coord_sys = jnp.tile(jnp.eye(3, dtype=jnp.float32)[None], (S, 1, 1))

    global_offsets = 0.05 * jax.random.normal(k2, (B, 1, 3), jnp.float32)
    per_slice_offsets = 0.05 * jax.random.normal(k3, (B, S, 3), jnp.float32)
    global_rotations = 0.10 * jax.random.normal(k4, (B, 1, 3), jnp.float32)

    extractor = SliceExtractorPallas(
        vol_shape, grid_pts, coord_sys, num_slices=S,
        allow_global_shift_xy=True, allow_global_shift_z=True,
        allow_slice_shift=True, allow_rotations=True)

    args = (vol, global_offsets, per_slice_offsets, global_rotations)
    out = jax.block_until_ready(extractor(args))
    assert out.shape == (B, C, sz0, sz1, S), out.shape

    ref = jax.block_until_ready(reference_forward(extractor, args))
    np.testing.assert_allclose(np.asarray(out), np.asarray(ref), atol=5e-2, rtol=5e-2)

    print("KERNEL_OK")
</pallas_src>

<mosaic_0001>
module attributes {stable_mosaic.version = 11 : i64} {
  func.func @kernel(%arg0: i32, %arg1: i32, %arg2: memref<4xi32, #tpu.memory_space<smem>>, %arg3: memref<3x512xf32, #tpu.memory_space<vmem>>, %arg4: memref<16x1024xbf16, #tpu.memory_space<vmem>>, %arg5: memref<16x512xf32, #tpu.memory_space<vmem>>, %arg6: memref<16x512xf32, #tpu.memory_space<vmem>>, %arg7: memref<256x512xf32, #tpu.memory_space<vmem>>) attributes {dimension_semantics = [#tpu.dimension_semantics<parallel>, #tpu.dimension_semantics<arbitrary>], iteration_bounds = array<i64: 2, 3>, scalar_prefetch = 1 : i64, scratch_operands = 2 : i64, tpu.core_type = #tpu.core_type<tc>, window_params = [{transform_indices = @transform_0, window_bounds = array<i64: 3, 512>}, {transform_indices = @transform_1, window_bounds = array<i64: 16, 1024>}, {transform_indices = @transform_2, window_bounds = array<i64: 16, 512>}]} {
    %c0_i32 = arith.constant 0 : i32
    %0 = arith.cmpi eq, %arg1, %c0_i32 : i32
    %1 = arith.extui %0 : i1 to i32
    %c0_i32_0 = arith.constant 0 : i32
    %2 = arith.cmpi ne, %1, %c0_i32_0 : i32
    scf.if %2 {
      %cst = arith.constant 0.000000e+00 : f32
      %19 = vector.broadcast %cst : f32 to vector<16x512xf32>
      %c0 = arith.constant 0 : index
      %c0_5 = arith.constant 0 : index
      %20 = vector.load %arg6[%c0, %c0_5] : memref<16x512xf32, #tpu.memory_space<vmem>>, vector<16x512xf32>
      tpu.vector_store %arg6[%c0, %c0_5], %19 {strides = array<i32>} : memref<16x512xf32, #tpu.memory_space<vmem>>, vector<16x512xf32>,
      %c0_6 = arith.constant 0 : index
      %c0_7 = arith.constant 0 : index
      %21 = vector.load %arg3[%c0_6, %c0_7] : memref<3x512xf32, #tpu.memory_space<vmem>>, vector<1x512xf32>
      %c1 = arith.constant 1 : index
      %c0_8 = arith.constant 0 : index
      %22 = vector.load %arg3[%c1, %c0_8] : memref<3x512xf32, #tpu.memory_space<vmem>>, vector<1x512xf32>
      %23 = tpu.iota {dimensions = array<i32: 0>} : vector<16x1xi32>
      %24 = arith.sitofp %23 : vector<16x1xi32> to vector<16x1xf32>
      %25 = tpu.iota {dimensions = array<i32: 0>} : vector<16x1xi32>
      %26 = arith.sitofp %25 : vector<16x1xi32> to vector<16x1xf32>
      %27 = vector.broadcast %24 : vector<16x1xf32> to vector<16x512xf32>
      %28 = vector.broadcast %22 : vector<1x512xf32> to vector<16x512xf32>
      %29 = arith.subf %27, %28 : vector<16x512xf32>
      %30 = math.absf %29 : vector<16x512xf32>
      %cst_9 = arith.constant 1.000000e+00 : f32
      %31 = vector.broadcast %cst_9 : f32 to vector<16x512xf32>
      %32 = arith.subf %31, %30 : vector<16x512xf32>
      %cst_10 = arith.constant 0.000000e+00 : f32
      %33 = vector.broadcast %cst_10 : f32 to vector<16x512xf32>
      %34 = arith.maximumf %33, %32 : vector<16x512xf32>
      %35 = vector.broadcast %26 : vector<16x1xf32> to vector<16x512xf32>
      %36 = vector.broadcast %21 : vector<1x512xf32> to vector<16x512xf32>
      %37 = arith.subf %35, %36 : vector<16x512xf32>
      %38 = math.absf %37 : vector<16x512xf32>
      %cst_11 = arith.constant 1.000000e+00 : f32
      %39 = vector.broadcast %cst_11 : f32 to vector<16x512xf32>
      %40 = arith.subf %39, %38 : vector<16x512xf32>
      %cst_12 = arith.constant 0.000000e+00 : f32
      %41 = vector.broadcast %cst_12 : f32 to vector<16x512xf32>
      %42 = arith.maximumf %41, %40 : vector<16x512xf32>
      %43 = vector.shape_cast %34 : vector<16x512xf32> to vector<16x1x512xf32>
      %44 = vector.shape_cast %42 : vector<16x512xf32> to vector<1x16x512xf32>
      %45 = vector.broadcast %43 : vector<16x1x512xf32> to vector<16x16x512xf32>
      %46 = vector.broadcast %44 : vector<1x16x512xf32> to vector<16x16x512xf32>
      %47 = arith.mulf %45, %46 : vector<16x16x512xf32>
      %48 = vector.shape_cast %47 : vector<16x16x512xf32> to vector<256x512xf32>
      %c0_13 = arith.constant 0 : index
      %c0_14 = arith.constant 0 : index
      %49 = vector.load %arg7[%c0_13, %c0_14] : memref<256x512xf32, #tpu.memory_space<vmem>>, vector<256x512xf32>
      tpu.vector_store %arg7[%c0_13, %c0_14], %48 {strides = array<i32>} : memref<256x512xf32, #tpu.memory_space<vmem>>, vector<256x512xf32>,
    } else {
    }
    %c2_i32 = arith.constant 2 : i32
    %3 = arith.muli %c2_i32, %arg0 : i32
    %4 = arith.index_cast %3 : i32 to index
    %5 = memref.load %arg2[%4] : memref<4xi32, #tpu.memory_space<smem>>
    %c2_i32_1 = arith.constant 2 : i32
    %6 = arith.muli %c2_i32_1, %arg0 : i32
    %c1_i32 = arith.constant 1 : i32
    %7 = arith.addi %6, %c1_i32 : i32
    %8 = arith.index_cast %7 : i32 to index
    %9 = memref.load %arg2[%8] : memref<4xi32, #tpu.memory_space<smem>>
    %10 = arith.addi %5, %arg1 : i32
    %11 = arith.minsi %10, %9 : i32
    %12 = arith.addi %5, %arg1 : i32
    %13 = arith.cmpi sle, %12, %9 : i32
    %14 = arith.extui %13 : i1 to i32
    %c0_i32_2 = arith.constant 0 : i32
    %15 = arith.cmpi ne, %14, %c0_i32_2 : i32
    scf.if %15 {
      %c2 = arith.constant 2 : index
      %c0 = arith.constant 0 : index
      %19 = vector.load %arg3[%c2, %c0] : memref<3x512xf32, #tpu.memory_space<vmem>>, vector<1x512xf32>
      %20 = tpu.iota {dimensions = array<i32: 0>} : vector<4x1xi32>
      %c4_i32 = arith.constant 4 : i32
      %21 = arith.muli %11, %c4_i32 : i32
      %22 = vector.broadcast %21 : i32 to vector<4x1xi32>
      %23 = arith.addi %20, %22 : vector<4x1xi32>
      %24 = arith.sitofp %23 : vector<4x1xi32> to vector<4x1xf32>
      %25 = vector.broadcast %24 : vector<4x1xf32> to vector<4x512xf32>
      %26 = vector.broadcast %19 : vector<1x512xf32> to vector<4x512xf32>
      %27 = arith.subf %25, %26 : vector<4x512xf32>
      %28 = math.absf %27 : vector<4x512xf32>
      %cst = arith.constant 1.000000e+00 : f32
      %29 = vector.broadcast %cst : f32 to vector<4x512xf32>
      %30 = arith.subf %29, %28 : vector<4x512xf32>
      %cst_5 = arith.constant 0.000000e+00 : f32
      %31 = vector.broadcast %cst_5 : f32 to vector<4x512xf32>
      %32 = arith.maximumf %31, %30 : vector<4x512xf32>
      %33 = vector.shape_cast %32 : vector<4x512xf32> to vector<4x1x512xf32>
      %c0_6 = arith.constant 0 : index
      %c0_7 = arith.constant 0 : index
      %34 = vector.load %arg7[%c0_6, %c0_7] : memref<256x512xf32, #tpu.memory_space<vmem>>, vector<256x512xf32>
      %35 = vector.shape_cast %34 : vector<256x512xf32> to vector<1x256x512xf32>
      %36 = vector.broadcast %33 : vector<4x1x512xf32> to vector<4x256x512xf32>
      %37 = vector.broadcast %35 : vector<1x256x512xf32> to vector<4x256x512xf32>
      %38 = arith.mulf %36, %37 : vector<4x256x512xf32>
      %39 = vector.shape_cast %38 : vector<4x256x512xf32> to vector<1024x512xf32>
      %c0_8 = arith.constant 0 : index
      %c0_9 = arith.constant 0 : index
      %40 = vector.load %arg6[%c0_8, %c0_9] : memref<16x512xf32, #tpu.memory_space<vmem>>, vector<16x512xf32>
      %c0_10 = arith.constant 0 : index
      %c0_11 = arith.constant 0 : index
      %41 = vector.load %arg4[%c0_10, %c0_11] : memref<16x1024xbf16, #tpu.memory_space<vmem>>, vector<16x1024xbf16>
      %42 = arith.truncf %39 : vector<1024x512xf32> to vector<1024x512xbf16>
      %cst_12 = arith.constant dense<0.000000e+00> : vector<16x512xf32>
      %43 = tpu.matmul %41, %42, %cst_12 {dimension_numbers = #tpu.dot_dimension_numbers<[1], [0], [0], [1], [0, 0, 1, 1], [], []>} : vector<16x1024xbf16>, vector<1024x512xbf16>, vector<16x512xf32> -> vector<16x512xf32>
      %44 = arith.addf %40, %43 : vector<16x512xf32>
      %c0_13 = arith.constant 0 : index
      %c0_14 = arith.constant 0 : index
      %45 = vector.load %arg6[%c0_13, %c0_14] : memref<16x512xf32, #tpu.memory_space<vmem>>, vector<16x512xf32>
      tpu.vector_store %arg6[%c0_13, %c0_14], %44 {strides = array<i32>} : memref<16x512xf32, #tpu.memory_space<vmem>>, vector<16x512xf32>,
    } else {
    }
    %c2_i32_3 = arith.constant 2 : i32
    %16 = arith.cmpi eq, %arg1, %c2_i32_3 : i32
    %17 = arith.extui %16 : i1 to i32
    %c0_i32_4 = arith.constant 0 : i32
    %18 = arith.cmpi ne, %17, %c0_i32_4 : i32
    scf.if %18 {
      %c0 = arith.constant 0 : index
      %c0_5 = arith.constant 0 : index
      %19 = vector.load %arg6[%c0, %c0_5] : memref<16x512xf32, #tpu.memory_space<vmem>>, vector<16x512xf32>
      %c0_6 = arith.constant 0 : index
      %c0_7 = arith.constant 0 : index
      %20 = vector.load %arg5[%c0_6, %c0_7] : memref<16x512xf32, #tpu.memory_space<vmem>>, vector<16x512xf32>
      tpu.vector_store %arg5[%c0_6, %c0_7], %19 {strides = array<i32>} : memref<16x512xf32, #tpu.memory_space<vmem>>, vector<16x512xf32>,
    } else {
    }
    return
  }
  func.func @transform_0(%arg0: i32, %arg1: i32, %arg2: memref<4xi32, #tpu.memory_space<smem>>) -> (i32, i32) {
    %c0_i32 = arith.constant 0 : i32
    %c0_i32_0 = arith.constant 0 : i32
    return %c0_i32, %arg0 : i32, i32
  }
  func.func @transform_1(%arg0: i32, %arg1: i32, %arg2: memref<4xi32, #tpu.memory_space<smem>>) -> (i32, i32) {
    %c2_i32 = arith.constant 2 : i32
    %0 = arith.muli %c2_i32, %arg0 : i32
    %1 = arith.index_cast %0 : i32 to index
    %2 = memref.load %arg2[%1] : memref<4xi32, #tpu.memory_space<smem>>
    %3 = arith.addi %2, %arg1 : i32
    %c2_i32_0 = arith.constant 2 : i32
    %4 = arith.muli %c2_i32_0, %arg0 : i32
    %c1_i32 = arith.constant 1 : i32
    %5 = arith.addi %4, %c1_i32 : i32
    %6 = arith.index_cast %5 : i32 to index
    %7 = memref.load %arg2[%6] : memref<4xi32, #tpu.memory_space<smem>>
    %8 = arith.minsi %3, %7 : i32
    %c0_i32 = arith.constant 0 : i32
    %c0_i32_1 = arith.constant 0 : i32
    return %c0_i32, %8 : i32, i32
  }
  func.func @transform_2(%arg0: i32, %arg1: i32, %arg2: memref<4xi32, #tpu.memory_space<smem>>) -> (i32, i32) {
    %c0_i32 = arith.constant 0 : i32
    %c0_i32_0 = arith.constant 0 : i32
    return %c0_i32, %arg0 : i32, i32
  }
}

</mosaic_0001>

<bundles_post_ra>
// kernel: tpu_custom_call.1
= control target key start
LH: loop header
LB: loop body
LE: loop exit
PB: predicated region body
PF: predicated region fallthrough
CT: control target
= control target key end

     0   :  { %s2898_s15 = smov [#allocation5]   ;;  %s5109_s0 = inlined_call_operand.hbm [shape: s32[4], index: 0, kind: input, shape index: {}]   ;;  %s5110_s1 = inlined_call_operand.hbm [shape: f32[3,1024], index: 1, kind: input, shape index: {}]   ;;  %s5111_s2 = inlined_call_operand.hbm [shape: bf16[16,4096], index: 2, kind: input, shape index: {}]   ;;  %s5112_s3 = inlined_call_operand.hbm [shape: f32[16,1024], index: 3, kind: output, shape index: {}]  }
   0x1   :  { %5182 = sst [smem:[#allocation45_spill]] %s5110_s1  ;;  %s9_s14 = sshll.u32 %s5109_s0, 4  ;;  %s10_s14 = int_to_ptr.hbm [resolvable:$true] %s9_s14 }
   0x2   :  { %12 = dma.hbm_to_smem %s10_s14, 16, %s2898_s15, [#allocation4] }
   0x3   :  { %2840 = dma.done.wait [#allocation4], 16 }
   0x4   :  { %2841 = vsyncadd [#allocation4], 4294967280 }
   0x5   :  { %15 = sfence }
   0x6   :  { %16 = vsyncpa [#allocation7], 0 }
   0x7   :  { %18 = vsyncpa [#allocation7 + $0x1], 0 }
   0x8   :  { %19 = vsyncpa [#allocation10], 0 }
   0x9   :  { %21 = vsyncpa [#allocation10 + $0x1], 0 }
   0xa   :  { %22 = vsyncpa [#allocation8], 0 }
   0xb   :  { %24 = vsyncpa [#allocation8 + $0x1], 0  ;;  %s2929_s16 = smov 0   ;;  %s2931_s17 = smov 0  }
   0xc   :  { %s2933_s18 = smov 0   ;;  %s2935_s19 = smov 0  }
   0xd   :  { %s2937_s0 = smov 0   ;;  %s2939_s20 = smov 0  }
   0xe   :  { %s2941_s21 = smov 0   ;;  %s2943_s22 = smov 0  }
   0xf   :  { %s2945_s23 = smov 0   ;;  %s2947_s24 = smov 0  }
  0x10   :  { %s2949_s25 = smov 0  }
  0x11 LB: > { %5183 = sst [smem:[#allocation20_spill]] %s2868_s19  ;;  %s5113_s26 = sadd.s32 4294967295, %s2896_s25   ;;  %s2896_s25 = sphi %s2949_s25, %s30_s25   ;;  %s2892_s24 = sphi %s2947_s24, %s5285_s24   ;;  %s2888_s23 = sphi %s2945_s23, %s5292_s23   ;;  %s2884_s22 = sphi %s2943_s22, %s5283_s22   ;;  %s2880_s21 = sphi %s2941_s21, %s5291_s21   ;;  %s2876_s20 = sphi %s2939_s20, %s5282_s20   ;;  %s2872_s0 = sphi %s2937_s0, %s5290_s0   ;;  %s2868_s19 = sphi %s2935_s19, %s5289_s19   ;;  %s2864_s18 = sphi %s2933_s18, %s5288_s18   ;;  %s2860_s17 = sphi %s2931_s17, %s5287_s17   ;;  %s2856_s16 = sphi %s2929_s16, %s5286_s16  }
  0x12   : > { %5184 = sst [smem:[#allocation21_spill]] %s2876_s20  ;;  %s39_s28 = sadd.s32 1, %s2888_s23 }
  0x13   : > { %5185 = sst [smem:[#allocation22_spill]] %s2892_s24  ;;  %s42_s29 = sadd.s32 1, %s2892_s24 }
  0x14   : > { %p40_p0 = scmp.ge.s32.totalorder %s39_s28, 3  ;;  %s49_s30 = sadd.s32 1, %s2876_s20 }
  0x15   : > { %p56_p1 = scmp.ne.s32.totalorder %s2876_s20, %s2872_s0  ;;  %p57_p2 = scmp.eq.s32.totalorder %s2896_s25, 0 }
  0x16   : > { %s5294_s28 = smov (%p40_p0, %s39_s28), 0  ;;  %s5296_s29 = smov (!%p40_p0, %s42_s29), %s2892_s24 }
  0x17   : > { %5186 = sst [smem:[#allocation23_spill]] %s5294_s28  ;;  %p3000_p3 = por %p57_p2, %p56_p1 }
  0x18   : > { %p62_p4 = scmp.ne.s32.totalorder %s2872_s0, %s2868_s19  ;;  %p44_p5 = scmp.ge.s32.totalorder %s5296_s29, 2 }
  0x19   : > { %p3008_p6 = scmp.eq.s32.totalorder %s5113_s26, 0  ;;  %s3013_s6 = sshll.u32 %s2892_s24, 1 }
  0x1a   : > { %s5298_s29 = smov (%p44_p5, %s5296_s29), 0  ;;  %s73_s9 = sld [smem:[#allocation5 + %s3013_s6]] }
  0x1b   : > { %5189 = sst [smem:[#allocation24_spill]] %s5298_s29  ;;  %p3023_p7 = por %p3008_p6, %p62_p4 }
  0x1c   : > { %s46_s10 = ssub.s32 %s2892_s24, %s5298_s29  ;;  %s5114_s11 = sadd.s32 1, %s3013_s6 }
  0x1d   : > { %p47_p8 = scmp.eq.s32.totalorder %s46_s10, 0  ;;  %s76_s12 = sld [smem:[#allocation5 + %s5114_s11]] }
  0x1e   : > { %s2504_s13 = sshll.u32 %s5298_s29, 1  ;;  %p96_p9 = scmp.ne.s32.totalorder %s2864_s18, %s2860_s17 }
  0x1f   : > { %s3037_s14 = scalar_select %p47_p8, %s2876_s20, %s49_s30  }
  0x20   : > { %s80_s15 = sld [smem:[#allocation5 + %s2504_s13]]  ;;  %s82_s7 = sadd.s32 1, %s2504_s13 }
  0x21   : > { %5191 = sst [smem:[#allocation25_spill]] %s3037_s14  ;;  %s74_s27 = sadd.s32 %s2888_s23, %s73_s9 }
  0x22   : > { %s83_s26 = sld [smem:[#allocation5 + %s82_s7]]  ;;  %p3042_p10 = por %p96_p9, %p57_p2 }
  0x23   : > { %p102_p11 = scmp.ne.s32.totalorder %s2860_s17, %s2856_s16  ;;  %p77_p12 = scmp.lt.s32.totalorder %s74_s27, %s76_s12 }
  0x24   : > { %s5193_s11 = sadd.s32 4294967295, %s2896_s25   ;;  %s5195_s13 = sadd.s32 4294967294, %s2896_s25  }
  0x25   : > { %p126_p13 = scmp.eq.s32.totalorder %s5193_s11, 5  ;;  %p3052_p0 = por %p102_p11, %p3008_p6 }
  0x26   : > { %p132_p5 = scmp.eq.s32.totalorder %s5195_s13, 5  ;;  %s5300_s27 = smov (!%p77_p12, %s74_s27), %s76_s12 }
  0x27   : > { %s81_s7 = sadd.s32 %s80_s15, %s5294_s28  ;;  %p3062_p2 = por %p126_p13, %p56_p1 }
  0x28   : > { %p84_p8 = scmp.lt.s32.totalorder %s81_s7, %s83_s26  ;;  %p3069_p9 = por %p132_p5, %p62_p4 }
  0x29   : > { %p2598_p6 = scmp.lt.s32.totalorder %s2896_s25, 6  ;;  %s152_s5 = sand.u32 1, %s2876_s20  }
  0x2a   : > { %s5197_s16 = scalar_select %p3069_p9, 1, 0 }
  0x2b   : > { %s5302_s7 = smov (!%p84_p8, %s81_s7), %s83_s26  ;;  %s2562_s11 = sshll.u32 %s2892_s24, 4 }
  0x2c   : > { %5198 = sst [smem:[#allocation26_spill]] %s5197_s16  ;;  %s86_s12 = ssub.s32 %s5300_s27, %s5302_s7 }
  0x2d   : > { %p87_p1 = scmp.eq.s32.totalorder %s86_s12, 0  ;;  %s2507_s15 = sshll.u32 %s152_s5, 4 }
  0x2e   : > { %s5199_s1 = sld [smem:[#allocation45_spill]]  ;;  %s5200_s14 = sadd.s32 1, %s2864_s18 }
  0x2f   : > { %s3082_s16 = scalar_select %p87_p1, %s2864_s18, %s5200_s14  }
  0x30   : > { %s156_s26 = scalar_lea.vmem [#allocation6], %s2507_s15  ;;  %p2584_p4 = pnand %p2598_p6, %p3000_p3 }
  0x31   : > { %5201 = sst [smem:[#allocation27_spill]] %s3082_s16  ;;  %s165_s27 = sshll.u32 %s156_s26, 4  ;;  %s166_s27 = int_to_ptr.vmem [resolvable:$true] %s165_s27 }
  0x32   : > { %p2514_p11 = scmp.ge.s32.totalorder %s2896_s25, 1  ;;  %p199_p12 = scmp.lt.s32.totalorder %s2896_s25, 7 }
  0x33   : > { %s2575_s29 = scalar_select %p3042_p10, %s3013_s6, 0 }
  0x34   : > { %s161_s28 = scalar_lea.hbm %s5199_s1, %s2562_s11  ;;  %s153_s14 = scalar_lea.sflag [#allocation7], %s152_s5 }
  0x35   : > { %s163_s19 = sshll.u32 %s161_s28, 4  ;;  %s5304_s29 = smov (!%p2598_p6, %s2575_s29), 0  ;;  %s164_s19 = int_to_ptr.hbm [resolvable:$true] %s163_s19 }
  0x36   : > { %2586 = dma.hbm_to_vmem [thread:$0]  (!%p2584_p4), %s164_s19, 256, %s166_s27, %s153_s14  }
  0x37   : > { %s5202_s28 = sadd.s32 1, %s3013_s6  ;;  %p3099_p13 = pnand %p2514_p11, %p199_p12 }
  0x38   : > { %s5306_s28 = smov (!%p3042_p10, %s5202_s28), 0  ;;  %s172_s11 = sand.u32 1, %s2864_s18  }
  0x39   : > { %s2576_s4 = scalar_select %p3042_p10, [#allocation5], [#allocation13] }
  0x3a   : > { %s5308_s28 = smov (!%p2598_p6, %s5306_s28), 0  ;;  %p3112_p3 = pnand %p2598_p6, %p3042_p10 }
  0x3b   : > { %s2574_s19 = scalar_select %p3042_p10, [#allocation5], [#allocation12] }
  0x3c   : > { %s5310_s4 = smov (!%p2598_p6, %s2576_s4), [#allocation15]  ;;  %s2510_s15 = sshll.u32 %s172_s11, 6 }
  0x3d   : > { %s5312_s19 = smov (!%p2598_p6, %s2574_s19), [#allocation14]  ;;  %s181_s6 = sld [smem:[%s5310_s4 + %s5308_s28]] }
  0x3e   : > { %s178_s5 = sld [smem:[%s5312_s19 + %s5304_s29]]  ;;  %s176_s26 = scalar_lea.vmem [#allocation9], %s2510_s15 }
  0x3f   : > { %s3123_s27 = sshll.u32 %s176_s26, 4  ;;  %s173_s16 = scalar_lea.sflag [#allocation10], %s172_s11  ;;  %s192_s27 = int_to_ptr.vmem [resolvable:$true] %s3123_s27 }
  0x40   : > { %p2742_p8 = pneg %p3112_p3 }
  0x44   : > { %s179_s13 = sadd.s32 %s2888_s23, %s178_s5 }
  0x45   : > { %p182_p5 = scmp.lt.s32.totalorder %s179_s13, %s181_s6 }
  0x47   : > { %s5314_s13 = smov (!%p182_p5, %s179_s13), %s181_s6  ;;  %s2745_s6 = scalar_lea.hbm %s5111_s2, 256 }
  0x48   : > { %s2563_s14 = sshll.u32 %s5314_s13, 5 }
  0x49   : > { %s188_s24 = scalar_lea.hbm %s5111_s2, %s2563_s14 }
  0x4a   : > { %s189_s20 = sshll.u32 %s188_s24, 4  ;;  %s190_s20 = int_to_ptr.hbm [resolvable:$true] %s189_s20 }
  0x4b   : > { %s2738_s28 = sshra.s32 %s190_s20, 4  ;;  %s2739_s28 = int_to_ptr.hbm [resolvable:$true] %s2738_s28 }
  0x4c   : > { %s2740_s29 = scalar_lea.hbm %s2739_s28, 64  ;;  %p2746_p4 = scmp.lt.s32.totalorder %s2739_s28, %s5111_s2 }
  0x4d   : > { %p2741_p10 = scmp.ne.s32.totalorder %s2739_s28, %s2740_s29  ;;  %p2747_p11 = scmp.lt.s32.totalorder %s2745_s6, %s2740_s29 }
  0x4f   : > { %p2743_p6 = pnand %p2742_p8, %p2741_p10  ;;  %p2748_p12 = por %p2747_p11, %p2746_p4 }
  0x51   : > { %p2744_p1 = pneg %p2743_p6 }
  0x53   : > { %p2749_p5 = pnand %p2748_p12, %p2744_p1 }
  0x55   : > { %2752 = shalt.err (!%p2749_p5)
}
  0x56   : > { %s2899_s1 = smov 2048   ;;  %s2900_s24 = smov 512  }
  0x57   : > { %s2901_s11 = smov 32   ;;  %203 = sbr.rel (%p3099_p13) target bundleno = 737 (0x2e1), region = 28 }
  0x58   : > { %2593 = dma.hbm_to_vmem [thread:$0]  (!%p3112_p3), %s190_s20, 1024, %s192_s27, %s173_s16, %s2899_s1, %s2900_s24, %s2901_s11  }
  0x59   : > { %s3142_s13 = sand.u32 (!%p3099_p13), 1, %s2872_s0  }
  0x5a   : > { %s2515_s26 = sshll.u32 (!%p3099_p13), %s3142_s13, 4  ;;  %s206_s14 = scalar_lea.sflag (!%p3099_p13), [#allocation7], %s3142_s13 }
  0x5b   : > { %s3146_s10 = scalar_lea.vmem (!%p3099_p13), [#allocation6], %s2515_s26 }
  0x5c   : > { %2843 = dma.done.wait (%p3023_p7), %s206_s14, 256  }
  0x5d   : > { %2845 = vsyncadd (%p3023_p7), %s206_s14, 4294967040  ;;  %s215_s20 = sand.u32 1, %s2860_s17  }
  0x5e   : > { %s2516_s16 = sshll.u32 %s215_s20, 6  ;;  %s216_s7 = scalar_lea.sflag [#allocation10], %s215_s20 }
  0x5f   : > { %s3153_s12 = scalar_lea.vmem [#allocation9], %s2516_s16 }
  0x60   : > { %2847 = dma.done.wait (%p3052_p0), %s216_s7, 1024  }
  0x61   : > { %2849 = vsyncadd (%p3052_p0), %s216_s7, 4294966272  ;;  %s2517_s27 = sshll.u32 %s3142_s13, 6  ;;  %p2518_p13 = scmp.ne.s32.totalorder %s2880_s21, 0 }
  0x62   : > { %s3160_s28 = scalar_lea.vmem [#allocation11], %s2517_s27 }
  0x63   : > { %259 = sbr.rel (%p2518_p13) target bundleno = 256 (0x100), region = 40 }
  0x68   : > { %v268_v0 = vld [vmem:[%s3146_s10] ss:$4 sm:$0xf]  ;;  %v271_v1 = vlaneseq  ;;  %v2902_v2 = vmov 0.0   ;;  %vm372_vm0 = vcmask 1040384   ;;  %vm374_vm1 = vcmask 1042434  }
  0x69   : > { %260 = vst [vmem:[#allocation2 + $0x30] sm:$0xff] %v2902_v2  ;;  %v3165_v3 = vld [vmem:[%s3146_s10 + $0x1] ss:$4 sm:$0xf]  ;;  %v318_v9 = vperm.slane %v268_v0, 0  ;;  %v319_v10 = vperm.slane %v268_v0, 1 }
  0x6a   : > { %261 = vst [vmem:[#allocation2] sm:$0xff] %v2902_v2  ;;  %v272_v4 = vshrl.u32 %v271_v1, 7  ;;  %v277_v5 = vperm.slane %v3165_v3, 0  ;;  %v278_v6 = vperm.slane %v3165_v3, 1  ;;  %v279_v7 = vperm.slane %v3165_v3, 2 }
  0x6b   : > { %262 = vst [vmem:[#allocation2 + $0x18] sm:$0xff] %v2902_v2  ;;  %v280_v8 = vperm.slane %v3165_v3, 3  ;;  %v320_v11 = vperm.slane %v268_v0, 2  ;;  %v321_v14 = vperm.slane %v268_v0, 3  ;;  %vm376_vm2 = vcmask 1041408  }
  0x6c   : > { %263 = vst [vmem:[#allocation2 + $0x10] sm:$0xff] %v2902_v2  ;;  %v273_v12 = vadd.s32 8, %v272_v4  ;;  %v274_v13 = vcvt.s32.f32 %v272_v4  ;;  %vm378_vm3 = vcmask 1041409   ;;  %vm380_vm4 = vcmask 1043459  }
  0x6d   : > { %264 = vst [vmem:[#allocation2 + $0x8] sm:$0xff] %v2902_v2  ;;  %vm382_vm5 = vcmask 1042433   ;;  %vm386_vm6 = vcmask 1044484   ;;  %vm388_vm7 = vcmask 1043458   ;;  %vm392_vm8 = vcmask 1045509  }
  0x6e   : > { %265 = vst [vmem:[#allocation2 + $0x20] sm:$0xff] %v2902_v2  ;;  %v3171_v15 = vcvt.s32.f32 %v273_v12  ;;  %v285_v16 = vsub.f32 %v274_v13, %v277_v5  ;;  %v286_v17 = vsub.f32 %v274_v13, %v278_v6  ;;  %v287_v18 = vsub.f32 %v274_v13, %v279_v7 }
  0x6f   : > { %266 = vst [vmem:[#allocation2 + $0x28] sm:$0xff] %v2902_v2  ;;  %v288_v19 = vsub.f32 %v274_v13, %v280_v8  ;;  %v326_v20 = vsub.f32 %v274_v13, %v318_v9  ;;  %v327_v21 = vsub.f32 %v274_v13, %v319_v10  ;;  %v328_v22 = vsub.f32 %v274_v13, %v320_v11 }
  0x70   : > { %267 = vst [vmem:[#allocation2 + $0x38] sm:$0xff] %v2902_v2  ;;  %v293_v23 = vand.u32 2147483647, %v285_v16  ;;  %v294_v24 = vand.u32 2147483647, %v286_v17  ;;  %v329_v25 = vsub.f32 %v274_v13, %v321_v14  ;;  %v330_v28 = vsub.f32 %v3171_v15, %v318_v9 }
  0x71   : > { %v295_v26 = vand.u32 2147483647, %v287_v18  ;;  %v296_v27 = vand.u32 2147483647, %v288_v19  ;;  %v331_v29 = vsub.f32 %v3171_v15, %v319_v10  ;;  %v332_v31 = vsub.f32 %v3171_v15, %v320_v11 }
  0x72   : > { %v302_v30 = vsub.f32 1.0, %v294_v24  ;;  %v333_v32 = vsub.f32 %v3171_v15, %v321_v14  ;;  %v334_v33 = vand.u32 2147483647, %v326_v20  ;;  %v335_v36 = vand.u32 2147483647, %v327_v21 }
  0x73   : > { %v303_v34 = vsub.f32 1.0, %v295_v26  ;;  %v304_v35 = vsub.f32 1.0, %v296_v27  ;;  %v336_v37 = vand.u32 2147483647, %v328_v22  ;;  %v301_v38 = vsub.f32 1.0, %v293_v23 }
  0x74   : > { %v337_v39 = vand.u32 2147483647, %v329_v25  ;;  %v338_v40 = vand.u32 2147483647, %v330_v28  ;;  %v339_v41 = vand.u32 2147483647, %v331_v29 }
  0x75   : > { %v310_v42 = vmax.f32 %v302_v30, 0.0  ;;  %v311_v43 = vmax.f32 %v303_v34, 0.0  ;;  %v312_v44 = vmax.f32 %v304_v35, 0.0  ;;  %v340_v45 = vand.u32 2147483647, %v332_v31 }
  0x76   : > { %v341_v46 = vand.u32 2147483647, %v333_v32  ;;  %v342_v47 = vsub.f32 1.0, %v334_v33  ;;  %v343_v48 = vsub.f32 1.0, %v335_v36  ;;  %v344_v49 = vsub.f32 1.0, %v336_v37 }
  0x77   : > { %v3185_v50 = vmax.f32 %v301_v38, 0.0  ;;  %v345_v51 = vsub.f32 1.0, %v337_v39  ;;  %v346_v52 = vsub.f32 1.0, %v338_v40  ;;  %v347_v53 = vsub.f32 1.0, %v339_v41 }
  0x78   : > { %v348_v54 = vsub.f32 1.0, %v340_v45  ;;  %v3187_v55 = vrot.slane %v310_v42, 7  ;;  %v3189_v56 = vrot.slane %v311_v43, 6  ;;  %v3191_v57 = vrot.slane %v312_v44, 5 }
  0x79   : > { %v349_v58 = vsub.f32 1.0, %v341_v46  ;;  %v3193_v59 = vmax.f32 %v342_v47, 0.0  ;;  %v3195_v60 = vmax.f32 %v343_v48, 0.0  ;;  %v3197_v61 = vmax.f32 %v344_v49, 0.0 }
  0x7a   : > { %v373_v62 = vsel %vm372_vm0, %v3185_v50, %v3187_v55  ;;  %v375_v63 = vsel %vm374_vm1, %v3189_v56, %v3191_v57  ;;  %v379_v0 = vsel %vm378_vm3, %v3185_v50, %v3187_v55  ;;  %v381_v1 = vsel %vm380_vm4, %v3189_v56, %v3191_v57 }
  0x7b   : > { %v3211_v2 = vmax.f32 %v345_v51, 0.0  ;;  %v3213_v4 = vmax.f32 %v346_v52, 0.0  ;;  %v377_v9 = vsel %vm376_vm2, %v373_v62, %v375_v63  ;;  %v383_v10 = vsel %vm382_vm5, %v379_v0, %v381_v1 }
  0x7c   : > { %v450_v11 = vperm.slane %v377_v9, 0  ;;  %v451_v12 = vperm.slane %v377_v9, 1  ;;  %v452_v13 = vperm.slane %v377_v9, 2  ;;  %v453_v14 = vperm.slane %v377_v9, 3 }
  0x7d   : > { %v3217_v16 = vmax.f32 %v347_v53, 0.0  ;;  %v3219_v17 = vmax.f32 %v348_v54, 0.0  ;;  %v384_v18 = vrot.slane %v383_v10, 1  ;;  %v385_v19 = vsel %vm374_vm1, %v3185_v50, %v3187_v55 }
  0x7e   : > { %v578_v20 = vmul.f32 %v450_v11, %v3193_v59  ;;  %v579_v21 = vmul.f32 %v451_v12, %v3195_v60  ;;  %v580_v22 = vmul.f32 %v452_v13, %v3197_v61  ;;  %v387_v23 = vsel %vm386_vm6, %v3189_v56, %v3191_v57 }
  0x7f   : > { %v3230_v24 = vmax.f32 %v349_v58, 0.0  ;;  %v581_v25 = vmul.f32 %v453_v14, %v3211_v2  ;;  %v582_v26 = vmul.f32 %v450_v11, %v3213_v4  ;;  %v454_v27 = vperm.slane %v384_v18, 0 }
  0x80   : > { %706 = vst [vmem:[#allocation3 + $0x300] sm:$0xff] %v578_v20  ;;  %v583_v28 = vmul.f32 %v451_v12, %v3217_v16  ;;  %v455_v29 = vperm.slane %v384_v18, 1  ;;  %v389_v30 = vsel %vm388_vm7, %v385_v19, %v387_v23  ;;  %v584_v31 = vmul.f32 %v452_v13, %v3219_v17 }
  0x81   : > { %707 = vst [vmem:[#allocation3 + $0x18] sm:$0xff] %v579_v21  ;;  %v456_v32 = vperm.slane %v384_v18, 2  ;;  %v585_v33 = vmul.f32 %v453_v14, %v3230_v24  ;;  %v457_v34 = vperm.slane %v384_v18, 3  ;;  %v586_v35 = vmul.f32 %v454_v27, %v3193_v59 }
  0x82   : > { %708 = vst [vmem:[#allocation3 + $0x350] sm:$0xff] %v580_v22  ;;  %v390_v36 = vrot.slane %v389_v30, 2  ;;  %v587_v37 = vmul.f32 %v455_v29, %v3195_v60  ;;  %v391_v39 = vsel %vm380_vm4, %v3185_v50, %v3187_v55  ;;  %v393_v40 = vsel %vm392_vm8, %v3189_v56, %v3191_v57 }
  0x83   : > { %709 = vst [vmem:[#allocation3 + $0xe0] sm:$0xff] %v581_v25  ;;  %v588_v38 = vmul.f32 %v456_v32, %v3197_v61  ;;  %vm394_vm9 = vcmask 1044483   ;;  %v589_v41 = vmul.f32 %v457_v34, %v3211_v2  ;;  %v590_v42 = vmul.f32 %v454_v27, %v3213_v4 }
  0x84   : > { %710 = vst [vmem:[#allocation3 + $0xe8] sm:$0xff] %v582_v26  ;;  %v458_v43 = vperm.slane %v390_v36, 0  ;;  %v591_v44 = vmul.f32 %v455_v29, %v3217_v16  ;;  %v459_v45 = vperm.slane %v390_v36, 1  ;;  %v395_v46 = vsel %vm394_vm9, %v391_v39, %v393_v40 }
  0x85   : > { %711 = vst [vmem:[#allocation3 + $0x68] sm:$0xff] %v583_v28  ;;  %v592_v47 = vmul.f32 %v456_v32, %v3219_v17  ;;  %v460_v48 = vperm.slane %v390_v36, 2  ;;  %vm398_vm10 = vcmask 1046534   ;;  %v593_v49 = vmul.f32 %v457_v34, %v3230_v24 }
  0x86   : > { %712 = vst [vmem:[#allocation3 + $0x2f0] sm:$0xff] %v584_v31  ;;  %v461_v51 = vperm.slane %v390_v36, 3  ;;  %v594_v52 = vmul.f32 %v458_v43, %v3193_v59  ;;  %v396_v53 = vrot.slane %v395_v46, 3  ;;  %v595_v54 = vmul.f32 %v459_v45, %v3195_v60 }
  0x87   : > { %713 = vst [vmem:[#allocation3 + $0x120] sm:$0xff] %v585_v33  ;;  %v397_v58 = vsel %vm386_vm6, %v3185_v50, %v3187_v55  ;;  %v399_v62 = vsel %vm398_vm10, %v3189_v56, %v3191_v57  ;;  %vm400_vm11 = vcmask 1045508   ;;  %v596_v63 = vmul.f32 %v460_v48, %v3197_v61 }
  0x88   : > { %714 = vst [vmem:[#allocation3 + $0xd8] sm:$0xff] %v586_v35  ;;  %v597_v0 = vmul.f32 %v461_v51, %v3211_v2  ;;  %v598_v1 = vmul.f32 %v458_v43, %v3213_v4  ;;  %v462_v9 = vperm.slane %v396_v53, 0  ;;  %v401_v10 = vsel %vm400_vm11, %v397_v58, %v399_v62 }
  0x89   : > { %715 = vst [vmem:[#allocation3 + $0x30] sm:$0xff] %v587_v37  ;;  %v599_v11 = vmul.f32 %v459_v45, %v3217_v16  ;;  %v463_v12 = vperm.slane %v396_v53, 1  ;;  %v600_v13 = vmul.f32 %v460_v48, %v3219_v17  ;;  %v464_v14 = vperm.slane %v396_v53, 2 }
  0x8a   : > { %716 = vst [vmem:[#allocation3 + $0x2b0] sm:$0xff] %v588_v38  ;;  %v601_v18 = vmul.f32 %v461_v51, %v3230_v24  ;;  %v465_v19 = vperm.slane %v396_v53, 3  ;;  %v3268_v20 = vrot.slane %v401_v10, 4  ;;  %vm404_vm12 = vcmask 1046528  }
  0x8b   : > { %717 = vst [vmem:[#allocation3 + $0x358] sm:$0xff] %v589_v41  ;;  %v602_v21 = vmul.f32 %v462_v9, %v3193_v59  ;;  %v289_v22 = vsub.f32 %v3171_v15, %v277_v5  ;;  %v290_v23 = vsub.f32 %v3171_v15, %v278_v6  ;;  %v603_v25 = vmul.f32 %v463_v12, %v3195_v60 }
  0x8c   : > { %718 = vst [vmem:[#allocation3 + $0x308] sm:$0xff] %v590_v42  ;;  %v291_v26 = vsub.f32 %v3171_v15, %v279_v7  ;;  %v604_v27 = vmul.f32 %v464_v14, %v3197_v61  ;;  %v403_v28 = vsel %vm392_vm8, %v3185_v50, %v3187_v55  ;;  %v405_v5 = vsel %vm404_vm12, %v3191_v57, %v3189_v56 }
  0x8d   : > { %719 = vst [vmem:[#allocation3 + $0x310] sm:$0xff] %v591_v44  ;;  %vm406_vm13 = vcmask 1046533   ;;  %v605_v6 = vmul.f32 %v465_v19, %v3211_v2  ;;  %v606_v29 = vmul.f32 %v462_v9, %v3213_v4  ;;  %v607_v30 = vmul.f32 %v463_v12, %v3217_v16 }
  0x8e   : > { %720 = vst [vmem:[#allocation3 + $0x3f8] sm:$0xff] %v592_v47  ;;  %v466_v7 = vperm.slane %v3268_v20, 0  ;;  %v608_v31 = vmul.f32 %v464_v14, %v3219_v17  ;;  %v292_v32 = vsub.f32 %v3171_v15, %v280_v8  ;;  %v297_v33 = vand.u32 2147483647, %v289_v22 }
  0x8f   : > { %721 = vst [vmem:[#allocation3 + $0x2b8] sm:$0xff] %v593_v49  ;;  %v298_v34 = vand.u32 2147483647, %v290_v23  ;;  %v467_v35 = vperm.slane %v3268_v20, 1  ;;  %v468_v36 = vperm.slane %v3268_v20, 2  ;;  %v407_v37 = vsel %vm406_vm13, %v403_v28, %v405_v5 }
  0x90   : > { %722 = vst [vmem:[#allocation3 + $0x180] sm:$0xff] %v594_v52  ;;  %v299_v38 = vand.u32 2147483647, %v291_v26  ;;  %v469_v39 = vperm.slane %v3268_v20, 3  ;;  %v300_v40 = vand.u32 2147483647, %v292_v32  ;;  %v609_v3 = vmul.f32 %v465_v19, %v3230_v24 }
  0x91   : > { %723 = vst [vmem:[#allocation3 + $0x190] sm:$0xff] %v595_v54  ;;  %v305_v41 = vsub.f32 1.0, %v297_v33  ;;  %v306_v42 = vsub.f32 1.0, %v298_v34  ;;  %v610_v8 = vmul.f32 %v466_v7, %v3193_v59  ;;  %v409_v15 = vsel %vm398_vm10, %v3185_v50, %v3187_v55 }
  0x92   : > { %724 = vst [vmem:[#allocation3 + $0x140] sm:$0xff] %v596_v63  ;;  %v3305_v43 = vrot.slane %v407_v37, 5  ;;  %v307_v44 = vsub.f32 1.0, %v299_v38  ;;  %v308_v45 = vsub.f32 1.0, %v300_v40  ;;  %v611_v47 = vmul.f32 %v467_v35, %v3195_v60 }
  0x93   : > { %725 = vst [vmem:[#allocation3 + $0x3c0] sm:$0xff] %v597_v0  ;;  %v314_v46 = vmax.f32 %v306_v42, 0.0  ;;  %v410_v48 = vsel %vm372_vm0, %v3189_v56, %v3191_v57  ;;  %vm411_vm14 = vcmask 1045504   ;;  %v3311_v49 = vmax.f32 %v305_v41, 0.0 }
  0x94   : > { %726 = vst [vmem:[#allocation3 + $0x2d0] sm:$0xff] %v598_v1  ;;  %v612_v51 = vmul.f32 %v468_v36, %v3197_v61  ;;  %v613_v52 = vmul.f32 %v469_v39, %v3211_v2  ;;  %v614_v53 = vmul.f32 %v466_v7, %v3213_v4  ;;  %v315_v54 = vmax.f32 %v307_v44, 0.0 }
  0x95   : > { %727 = vst [vmem:[#allocation3 + $0x268] sm:$0xff] %v599_v11  ;;  %v316_v58 = vmax.f32 %v308_v45, 0.0  ;;  %v3316_v62 = vrot.slane %v314_v46, 7  ;;  %v615_v63 = vmul.f32 %v467_v35, %v3217_v16  ;;  %v470_v0 = vperm.slane %v3305_v43, 0 }
  0x96   : > { %728 = vst [vmem:[#allocation3 + $0x340] sm:$0xff] %v600_v13  ;;  %v471_v1 = vperm.slane %v3305_v43, 1  ;;  %v412_v9 = vsel %vm411_vm14, %v410_v48, %v409_v15  ;;  %v3322_v10 = vrot.slane %v315_v54, 6  ;;  %v616_v14 = vmul.f32 %v468_v36, %v3219_v17 }
  0x97   : > { %729 = vst [vmem:[#allocation3 + $0x110] sm:$0xff] %v601_v18  ;;  %v3324_v11 = vrot.slane %v316_v58, 5  ;;  %v419_v12 = vsel %vm372_vm0, %v3311_v49, %v3316_v62  ;;  %v422_v13 = vsel %vm378_vm3, %v3311_v49, %v3316_v62  ;;  %v472_v18 = vperm.slane %v3305_v43, 2 }
  0x98   : > { %730 = vst [vmem:[#allocation3 + $0x98] sm:$0xff] %v602_v21  ;;  %v617_v19 = vmul.f32 %v469_v39, %v3230_v24  ;;  %v473_v20 = vperm.slane %v3305_v43, 3  ;;  %v618_v23 = vmul.f32 %v470_v0, %v3193_v59  ;;  %v619_v28 = vmul.f32 %v471_v1, %v3195_v60 }
  0x99   : > { %731 = vst [vmem:[#allocation3 + $0x198] sm:$0xff] %v603_v25  ;;  %v420_v21 = vsel %vm374_vm1, %v3322_v10, %v3324_v11  ;;  %v423_v22 = vsel %vm380_vm4, %v3322_v10, %v3324_v11  ;;  %v413_v25 = vrot.slane %v412_v9, 6  ;;  %v620_v5 = vmul.f32 %v472_v18, %v3197_v61 }
  0x9a   : > { %732 = vst [vmem:[#allocation3 + $0x258] sm:$0xff] %v604_v27  ;;  %v3344_v26 = vsel %vm376_vm2, %v419_v12, %v420_v21  ;;  %v3347_v27 = vsel %vm382_vm5, %v422_v13, %v423_v22  ;;  %vm416_vm15 = vcmask 1046529   ;;  %v622_v7 = vmul.f32 %v470_v0, %v3213_v4 }
  0x9b   : > { %733 = vst [vmem:[#allocation3 + $0x40] sm:$0xff] %v605_v6  ;;  %v414_v6 = vsel %vm404_vm12, %v3187_v55, %v3185_v50  ;;  %v623_v32 = vmul.f32 %v471_v1, %v3217_v16  ;;  %v475_v33 = vperm.slane %v413_v25, 1  ;;  %v624_v50 = vmul.f32 %v472_v18, %v3219_v17 }
  0x9c   : > { %734 = vst [vmem:[#allocation3 + $0x398] sm:$0xff] %v606_v29  ;;  %v415_v29 = vsel %vm378_vm3, %v3189_v56, %v3191_v57  ;;  %v476_v55 = vperm.slane %v413_v25, 2  ;;  %v426_v56 = vsel %vm374_vm1, %v3311_v49, %v3316_v62  ;;  %v427_v57 = vsel %vm386_vm6, %v3322_v10, %v3324_v11 }
  0x9d   : > { %735 = vst [vmem:[#allocation3 + $0x130] sm:$0xff] %v607_v30  ;;  %v621_v30 = vmul.f32 %v473_v20, %v3211_v2  ;;  %v417_v34 = vsel %vm416_vm15, %v415_v29, %v414_v6  ;;  %v625_v35 = vmul.f32 %v473_v20, %v3230_v24  ;;  %v477_v36 = vperm.slane %v413_v25, 3 }
  0x9e   : > { %736 = vst [vmem:[#allocation3 + $0x3b8] sm:$0xff] %v608_v31  ;;  %v474_v31 = vperm.slane %v413_v25, 0  ;;  %v418_v38 = vrot.slane %v417_v34, 7  ;;  %v627_v39 = vmul.f32 %v475_v33, %v3195_v60  ;;  %v3372_v40 = vsel %vm388_vm7, %v426_v56, %v427_v57 }
  0x9f   : > { %737 = vst [vmem:[#allocation3 + $0x1f0] sm:$0xff] %v609_v3  ;;  %v628_v41 = vmul.f32 %v476_v55, %v3197_v61  ;;  %v629_v42 = vmul.f32 %v477_v36, %v3211_v2  ;;  %v430_v3 = vsel %vm380_vm4, %v3311_v49, %v3316_v62  ;;  %v631_v44 = vmul.f32 %v475_v33, %v3217_v16 }
  0xa0   : > { %738 = vst [vmem:[#allocation3 + $0x3d0] sm:$0xff] %v610_v8  ;;  %v626_v37 = vmul.f32 %v474_v31, %v3193_v59  ;;  %v431_v8 = vsel %vm392_vm8, %v3322_v10, %v3324_v11  ;;  %v630_v15 = vmul.f32 %v474_v31, %v3213_v4  ;;  %v478_v43 = vperm.slane %v418_v38, 0 }
  0xa1   : > { %739 = vst [vmem:[#allocation3 + $0x388] sm:$0xff] %v611_v47  ;;  %v479_v45 = vperm.slane %v418_v38, 1  ;;  %v3385_v46 = vsel %vm394_vm9, %v430_v3, %v431_v8  ;;  %v632_v47 = vmul.f32 %v476_v55, %v3219_v17  ;;  %v480_v48 = vperm.slane %v418_v38, 2 }
  0xa2   : > { %740 = vst [vmem:[#allocation3 + $0x100] sm:$0xff] %v612_v51  ;;  %v633_v51 = vmul.f32 %v477_v36, %v3230_v24  ;;  %v434_v0 = vsel %vm386_vm6, %v3311_v49, %v3316_v62  ;;  %v638_v1 = vmul.f32 %v478_v43, %v3213_v4  ;;  %v482_v9 = vperm.slane %v3344_v26, 0 }
  0xa3   : > { %741 = vst [vmem:[#allocation3 + $0x278] sm:$0xff] %v613_v52  ;;  %v481_v52 = vperm.slane %v418_v38, 3  ;;  %v635_v54 = vmul.f32 %v479_v45, %v3195_v60  ;;  %v636_v58 = vmul.f32 %v480_v48, %v3197_v61  ;;  %v435_v12 = vsel %vm398_vm10, %v3322_v10, %v3324_v11 }
  0xa4   : > { %742 = vst [vmem:[#allocation3 + $0x3c8] sm:$0xff] %v614_v53  ;;  %v634_v53 = vmul.f32 %v478_v43, %v3193_v59  ;;  %v639_v13 = vmul.f32 %v479_v45, %v3217_v16  ;;  %v3404_v18 = vsel %vm400_vm11, %v434_v0, %v435_v12  ;;  %v484_v20 = vperm.slane %v3344_v26, 2 }
  0xa5   : > { %743 = vst [vmem:[#allocation3 + $0x78] sm:$0xff] %v615_v63  ;;  %v637_v63 = vmul.f32 %v481_v52, %v3211_v2  ;;  %v641_v21 = vmul.f32 %v481_v52, %v3230_v24  ;;  %v485_v22 = vperm.slane %v3344_v26, 3  ;;  %v425_v25 = vrot.slane %v3347_v27, 1 }
  0xa6   : > { %744 = vst [vmem:[#allocation3 + $0x298] sm:$0xff] %v616_v14  ;;  %v483_v14 = vperm.slane %v3344_v26, 1  ;;  %v438_v29 = vsel %vm392_vm8, %v3311_v49, %v3316_v62  ;;  %v439_v26 = vsel %vm404_vm12, %v3324_v11, %v3322_v10  ;;  %v646_v27 = vmul.f32 %v482_v9, %v3213_v4 }
  0xa7   : > { %745 = vst [vmem:[#allocation3 + $0x88] sm:$0xff] %v617_v19  ;;  %v640_v19 = vmul.f32 %v480_v48, %v3219_v17  ;;  %v645_v6 = vmul.f32 %v485_v22, %v3211_v2  ;;  %v648_v33 = vmul.f32 %v484_v20, %v3219_v17  ;;  %v488_v34 = vperm.slane %v425_v25, 2 }
  0xa8   : > { %746 = vst [vmem:[#allocation3 + $0x1b8] sm:$0xff] %v618_v23  ;;  %v642_v23 = vmul.f32 %v482_v9, %v3193_v59  ;;  %v647_v31 = vmul.f32 %v483_v14, %v3217_v16  ;;  %v489_v55 = vperm.slane %v425_v25, 3  ;;  %v429_v57 = vrot.slane %v3372_v40, 2 }
  0xa9   : > { %747 = vst [vmem:[#allocation3 + $0x1c8] sm:$0xff] %v619_v28  ;;  %v643_v28 = vmul.f32 %v483_v14, %v3195_v60  ;;  %v652_v36 = vmul.f32 %v488_v34, %v3197_v61  ;;  %v442_v38 = vsel %vm398_vm10, %v3311_v49, %v3316_v62  ;;  %v433_v48 = vrot.slane %v3385_v46, 3 }
  0xaa   : > { %748 = vst [vmem:[#allocation3 + $0xb0] sm:$0xff] %v620_v5  ;;  %v644_v5 = vmul.f32 %v484_v20, %v3197_v61  ;;  %v491_v8 = vperm.slane %v429_v57, 1  ;;  %v492_v43 = vperm.slane %v429_v57, 2  ;;  %v493_v45 = vperm.slane %v429_v57, 3 }
  0xab   : > { %749 = vst [vmem:[#allocation3 + $0x208] sm:$0xff] %v621_v30  ;;  %v486_v30 = vperm.slane %v425_v25, 0  ;;  %v495_v9 = vperm.slane %v433_v48, 1 }
  0xac   : > { %750 = vst [vmem:[#allocation3 + $0x218] sm:$0xff] %v622_v7  ;;  %v3423_v7 = vsel %vm406_vm13, %v438_v29, %v439_v26  ;;  %v660_v52 = vmul.f32 %v492_v43, %v3197_v61  ;;  %v664_v12 = vmul.f32 %v492_v43, %v3219_v17 }
  0xad   : > { %751 = vst [vmem:[#allocation3 + $0x28] sm:$0xff] %v623_v32  ;;  %v487_v32 = vperm.slane %v425_v25, 1  ;;  %v650_v56 = vmul.f32 %v486_v30, %v3193_v59  ;;  %v654_v40 = vmul.f32 %v486_v30, %v3213_v4  ;;  %v667_v14 = vmul.f32 %v495_v9, %v3195_v60 }
  0xae   : > { %752 = vst [vmem:[#allocation3 + $0x3e8] sm:$0xff] %v624_v50  ;;  %v649_v50 = vmul.f32 %v485_v22, %v3230_v24  ;;  %v441_v26 = vrot.slane %v3423_v7, 5 }
  0xaf   : > { %753 = vst [vmem:[#allocation3 + $0x380] sm:$0xff] %v625_v35  ;;  %v651_v35 = vmul.f32 %v487_v32, %v3195_v60  ;;  %v655_v3 = vmul.f32 %v487_v32, %v3217_v16 }
  0xb0   : > { %754 = vst [vmem:[#allocation3 + $0x1e8] sm:$0xff] %v626_v37  ;;  %v653_v37 = vmul.f32 %v489_v55, %v3211_v2 }
  0xb1   : > { %755 = vst [vmem:[#allocation3 + $0x270] sm:$0xff] %v627_v39  ;;  %v443_v39 = vsel %vm372_vm0, %v3322_v10, %v3324_v11 }
  0xb2   : > { %756 = vst [vmem:[#allocation3 + $0x368] sm:$0xff] %v628_v41  ;;  %v490_v41 = vperm.slane %v429_v57, 0  ;;  %v505_v57 = vperm.slane %v441_v26, 3 }
  0xb3   : > { %757 = vst [vmem:[#allocation3 + $0xa0] sm:$0xff] %v629_v42  ;;  %v3441_v42 = vsel %vm411_vm14, %v443_v39, %v442_v38 }
  0xb4   : > { %758 = vst [vmem:[#allocation3 + $0x70] sm:$0xff] %v630_v15  ;;  %v656_v15 = vmul.f32 %v488_v34, %v3219_v17  ;;  %v662_v46 = vmul.f32 %v490_v41, %v3213_v4  ;;  %v685_v39 = vmul.f32 %v505_v57, %v3211_v2  ;;  %v689_v43 = vmul.f32 %v505_v57, %v3230_v24 }
  0xb5   : > { %759 = vst [vmem:[#allocation3 + $0x150] sm:$0xff] %v631_v44  ;;  %v657_v44 = vmul.f32 %v489_v55, %v3230_v24  ;;  %v504_v55 = vperm.slane %v441_v26, 2 }
  0xb6   : > { %760 = vst [vmem:[#allocation3 + $0x250] sm:$0xff] %v632_v47  ;;  %v658_v47 = vmul.f32 %v490_v41, %v3193_v59 }
  0xb7   : > { %761 = vst [vmem:[#allocation3 + $0x338] sm:$0xff] %v633_v51  ;;  %v659_v51 = vmul.f32 %v491_v8, %v3195_v60  ;;  %v684_v38 = vmul.f32 %v504_v55, %v3197_v61 }
  0xb8   : > { %762 = vst [vmem:[#allocation3 + $0x228] sm:$0xff] %v634_v53  ;;  %v661_v53 = vmul.f32 %v493_v45, %v3211_v2 }
  0xb9   : > { %763 = vst [vmem:[#allocation3 + $0x1c0] sm:$0xff] %v635_v54  ;;  %v446_v54 = vsel %vm404_vm12, %v3316_v62, %v3311_v49  ;;  %v665_v49 = vmul.f32 %v493_v45, %v3230_v24  ;;  %v497_v62 = vperm.slane %v433_v48, 3 }
  0xba   : > { %764 = vst [vmem:[#allocation3 + $0x318] sm:$0xff] %v636_v58  ;;  %v447_v58 = vsel %vm378_vm3, %v3322_v10, %v3324_v11  ;;  %v437_v11 = vrot.slane %v3404_v18, 4 }
  0xbb   : > { %765 = vst [vmem:[#allocation3 + $0x288] sm:$0xff] %v637_v63  ;;  %v494_v63 = vperm.slane %v433_v48, 0  ;;  %v3459_v0 = vsel %vm416_vm15, %v447_v58, %v446_v54  ;;  %v669_v20 = vmul.f32 %v497_v62, %v3211_v2 }
  0xbc   : > { %766 = vst [vmem:[#allocation3 + $0x290] sm:$0xff] %v638_v1  ;;  %v663_v1 = vmul.f32 %v491_v8, %v3217_v16  ;;  %v498_v22 = vperm.slane %v437_v11, 0  ;;  %v499_v25 = vperm.slane %v437_v11, 1 }
  0xbd   : > { %767 = vst [vmem:[#allocation3 + $0x48] sm:$0xff] %v639_v13  ;;  %v496_v13 = vperm.slane %v433_v48, 2  ;;  %v666_v10 = vmul.f32 %v494_v63, %v3193_v59 }
  0xbe   : > { %768 = vst [vmem:[#allocation3 + $0x1a0] sm:$0xff] %v640_v19  ;;  %v674_v29 = vmul.f32 %v498_v22, %v3193_v59  ;;  %v678_v32 = vmul.f32 %v498_v22, %v3213_v4  ;;  %v679_v34 = vmul.f32 %v499_v25, %v3217_v16 }
  0xbf   : > { %769 = vst [vmem:[#allocation3 + $0xc8] sm:$0xff] %v641_v21  ;;  %v668_v19 = vmul.f32 %v496_v13, %v3197_v61  ;;  %v670_v21 = vmul.f32 %v494_v63, %v3213_v4  ;;  %v672_v18 = vmul.f32 %v496_v13, %v3219_v17 }
  0xc0   : > { %770 = vst [vmem:[#allocation3 + $0x38] sm:$0xff] %v642_v23  ;;  %v671_v23 = vmul.f32 %v495_v9, %v3217_v16 }
  0xc1   : > { %771 = vst [vmem:[#allocation3 + $0x90] sm:$0xff] %v643_v28  ;;  %v500_v28 = vperm.slane %v437_v11, 2 }
  0xc2   : > { %772 = vst [vmem:[#allocation3 + $0x2f8] sm:$0xff] %v644_v5  ;;  %v673_v5 = vmul.f32 %v497_v62, %v3230_v24 }
  0xc3   : > { %773 = vst [vmem:[#allocation3 + $0x230] sm:$0xff] %v645_v6  ;;  %v501_v6 = vperm.slane %v437_v11, 3  ;;  %v676_v30 = vmul.f32 %v500_v28, %v3197_v61  ;;  %v680_v7 = vmul.f32 %v500_v28, %v3219_v17 }
  0xc4   : > { %774 = vst [vmem:[#allocation3 + $0x108] sm:$0xff] %v646_v27  ;;  %v675_v27 = vmul.f32 %v499_v25, %v3195_v60 }
  0xc5   : > { %775 = vst [vmem:[#allocation3 + $0x1d8] sm:$0xff] %v647_v31  ;;  %v677_v31 = vmul.f32 %v501_v6, %v3211_v2 }
  0xc6   : > { %776 = vst [vmem:[#allocation3 + $0x160] sm:$0xff] %v648_v33  ;;  %v502_v33 = vperm.slane %v441_v26, 0 }
  0xc7   : > { %777 = vst [vmem:[#allocation3 + $0x10] sm:$0xff] %v649_v50  ;;  %v503_v50 = vperm.slane %v441_v26, 1 }
  0xc8   : > { %778 = vst [vmem:[#allocation3 + $0x3d8] sm:$0xff] %v650_v56  ;;  %v681_v56 = vmul.f32 %v501_v6, %v3230_v24 }
  0xc9   : > { %779 = vst [vmem:[#allocation3 + $0xf0] sm:$0xff] %v651_v35  ;;  %v682_v35 = vmul.f32 %v502_v33, %v3193_v59 }
  0xca   : > { %780 = vst [vmem:[#allocation3 + $0xc0] sm:$0xff] %v652_v36  ;;  %v445_v36 = vrot.slane %v3441_v42, 6  ;;  %v688_v42 = vmul.f32 %v504_v55, %v3219_v17 }
  0xcb   : > { %781 = vst [vmem:[#allocation3 + $0x260] sm:$0xff] %v653_v37  ;;  %v683_v37 = vmul.f32 %v503_v50, %v3195_v60 }
  0xcc   : > { %782 = vst [vmem:[#allocation3 + $0x178] sm:$0xff] %v654_v40  ;;  %v686_v40 = vmul.f32 %v502_v33, %v3213_v4  ;;  %v506_v41 = vperm.slane %v445_v36, 0  ;;  %v507_v8 = vperm.slane %v445_v36, 1 }
  0xcd   : > { %783 = vst [vmem:[#allocation3 + $0x3a0] sm:$0xff] %v655_v3  ;;  %v687_v3 = vmul.f32 %v503_v50, %v3217_v16 }
  0xce   : > { %784 = vst [vmem:[#allocation3 + $0x240] sm:$0xff] %v656_v15  ;;  %v508_v15 = vperm.slane %v445_v36, 2  ;;  %v690_v45 = vmul.f32 %v506_v41, %v3193_v59  ;;  %v691_v48 = vmul.f32 %v507_v8, %v3195_v60  ;;  %v695_v58 = vmul.f32 %v507_v8, %v3217_v16 }
  0xcf   : > { %785 = vst [vmem:[#allocation3 + $0x1f8] sm:$0xff] %v657_v44  ;;  %v509_v44 = vperm.slane %v445_v36, 3 }
  0xd0   : > { %786 = vst [vmem:[#allocation3 + $0x2a8] sm:$0xff] %v658_v47  ;;  %v449_v47 = vrot.slane %v3459_v0, 7  ;;  %v696_v63 = vmul.f32 %v508_v15, %v3219_v17 }
  0xd1   : > { %787 = vst [vmem:[#allocation3 + $0x210] sm:$0xff] %v659_v51  ;;  %v692_v51 = vmul.f32 %v508_v15, %v3197_v61 }
  0xd2   : > { %788 = vst [vmem:[#allocation3 + $0x248] sm:$0xff] %v660_v52  ;;  %v693_v52 = vmul.f32 %v509_v44, %v3211_v2  ;;  %v510_v54 = vperm.slane %v449_v47, 0  ;;  %v512_v0 = vperm.slane %v449_v47, 2  ;;  %v513_v9 = vperm.slane %v449_v47, 3 }
  0xd3   : > { %789 = vst [vmem:[#allocation3 + $0x170] sm:$0xff] %v661_v53  ;;  %v694_v53 = vmul.f32 %v506_v41, %v3213_v4 }
  0xd4   : > { %790 = vst [vmem:[#allocation3 + $0x1d0] sm:$0xff] %v662_v46  ;;  %v511_v46 = vperm.slane %v449_v47, 1  ;;  %v701_v62 = vmul.f32 %v513_v9, %v3211_v2 }
  0xd5   : > { %791 = vst [vmem:[#allocation3 + $0x370] sm:$0xff] %v663_v1  ;;  %v697_v1 = vmul.f32 %v509_v44, %v3230_v24 }
  0xd6   : > { %792 = vst [vmem:[#allocation3 + $0x138] sm:$0xff] %v664_v12  ;;  %v698_v12 = vmul.f32 %v510_v54, %v3193_v59  ;;  %v699_v13 = vmul.f32 %v511_v46, %v3195_v60  ;;  %v703_v11 = vmul.f32 %v511_v46, %v3217_v16  ;;  %v705_v59 = vmul.f32 %v513_v9, %v3230_v24 }
  0xd7   : > { %793 = vst [vmem:[#allocation3 + $0x128] sm:$0xff] %v665_v49  ;;  %v700_v49 = vmul.f32 %v512_v0, %v3197_v61 }
  0xd8   : > { %794 = vst [vmem:[#allocation3 + $0x158] sm:$0xff] %v666_v10  ;;  %v702_v10 = vmul.f32 %v510_v54, %v3213_v4 }
  0xd9   : > { %795 = vst [vmem:[#allocation3 + $0x328] sm:$0xff] %v667_v14  ;;  %v704_v14 = vmul.f32 %v512_v0, %v3219_v17 }
  0xda   : > { %796 = vst [vmem:[#allocation3 + $0x3a8] sm:$0xff] %v668_v19 }
  0xdb   : > { %797 = vst [vmem:[#allocation3 + $0x220] sm:$0xff] %v669_v20 }
  0xdc   : > { %798 = vst [vmem:[#allocation3 + $0x118] sm:$0xff] %v670_v21 }
  0xdd   : > { %799 = vst [vmem:[#allocation3 + $0x280] sm:$0xff] %v671_v23 }
  0xde   : > { %800 = vst [vmem:[#allocation3 + $0x50] sm:$0xff] %v672_v18 }
  0xdf   : > { %801 = vst [vmem:[#allocation3 + $0x3e0] sm:$0xff] %v673_v5 }
  0xe0   : > { %802 = vst [vmem:[#allocation3 + $0x390] sm:$0xff] %v674_v29 }
  0xe1   : > { %803 = vst [vmem:[#allocation3 + $0x2e0] sm:$0xff] %v675_v27 }
  0xe2   : > { %804 = vst [vmem:[#allocation3 + $0x168] sm:$0xff] %v676_v30 }
  0xe3   : > { %805 = vst [vmem:[#allocation3 + $0x330] sm:$0xff] %v677_v31 }
  0xe4   : > { %806 = vst [vmem:[#allocation3 + $0x2c0] sm:$0xff] %v678_v32 }
  0xe5   : > { %807 = vst [vmem:[#allocation3 + $0x188] sm:$0xff] %v679_v34 }
  0xe6   : > { %808 = vst [vmem:[#allocation3 + $0x20] sm:$0xff] %v680_v7 }
  0xe7   : > { %809 = vst [vmem:[#allocation3 + $0x80] sm:$0xff] %v681_v56 }
  0xe8   : > { %810 = vst [vmem:[#allocation3 + $0x1e0] sm:$0xff] %v682_v35 }
  0xe9   : > { %811 = vst [vmem:[#allocation3 + $0xa8] sm:$0xff] %v683_v37 }
  0xea   : > { %812 = vst [vmem:[#allocation3 + $0x360] sm:$0xff] %v684_v38 }
  0xeb   : > { %813 = vst [vmem:[#allocation3 + $0x3b0] sm:$0xff] %v685_v39 }
  0xec   : > { %814 = vst [vmem:[#allocation3 + $0x3f0] sm:$0xff] %v686_v40 }
  0xed   : > { %815 = vst [vmem:[#allocation3 + $0x378] sm:$0xff] %v687_v3 }
  0xee   : > { %816 = vst [vmem:[#allocation3 + $0x2e8] sm:$0xff] %v688_v42 }
  0xef   : > { %817 = vst [vmem:[#allocation3 + $0x58] sm:$0xff] %v689_v43 }
  0xf0   : > { %818 = vst [vmem:[#allocation3 + $0x60] sm:$0xff] %v690_v45 }
  0xf1   : > { %819 = vst [vmem:[#allocation3 + $0xb8] sm:$0xff] %v691_v48 }
  0xf2   : > { %820 = vst [vmem:[#allocation3 + $0x348] sm:$0xff] %v692_v51 }
  0xf3   : > { %821 = vst [vmem:[#allocation3 + $0x2a0] sm:$0xff] %v693_v52 }
  0xf4   : > { %822 = vst [vmem:[#allocation3 + $0x1a8] sm:$0xff] %v694_v53 }
  0xf5   : > { %823 = vst [vmem:[#allocation3 + $0x8] sm:$0xff] %v695_v58 }
  0xf6   : > { %824 = vst [vmem:[#allocation3 + $0x148] sm:$0xff] %v696_v63 }
  0xf7   : > { %825 = vst [vmem:[#allocation3 + $0xd0] sm:$0xff] %v697_v1 }
  0xf8   : > { %826 = vst [vmem:[#allocation3 + $0x238] sm:$0xff] %v698_v12 }
  0xf9   : > { %827 = vst [vmem:[#allocation3 + $0xf8] sm:$0xff] %v699_v13 }
  0xfa   : > { %828 = vst [vmem:[#allocation3 + $0x2d8] sm:$0xff] %v700_v49 }
  0xfb   : > { %829 = vst [vmem:[#allocation3 + $0x2c8] sm:$0xff] %v701_v62 }
  0xfc   : > { %830 = vst [vmem:[#allocation3] sm:$0xff] %v702_v10 }
  0xfd   : > { %831 = vst [vmem:[#allocation3 + $0x320] sm:$0xff] %v703_v11 }
  0xfe   : > { %832 = vst [vmem:[#allocation3 + $0x1b0] sm:$0xff] %v704_v14 }
  0xff   : > { %833 = vst [vmem:[#allocation3 + $0x200] sm:$0xff] %v705_v59 }
 0x100 PF: > { %s2520_s8 = sshll.u32 %s2884_s22, 1 }
 0x101   : > { %s835_s30 = sld [smem:[#allocation5 + %s2520_s8]]  ;;  %s836_s29 = sadd.s32 1, %s2520_s8 }
 0x102   : > { %s837_s4 = sld [smem:[#allocation5 + %s836_s29]] }
 0x107   : > { %s838_s19 = sadd.s32 %s2880_s21, %s835_s30 }
 0x108   : > { %p839_p7 = scmp.lt.s32.totalorder %s838_s19, %s837_s4  ;;  %p2521_p0 = scmp.gt.s32.totalorder %s838_s19, %s837_s4 }
 0x10a   : > { %s840_s6 = scalar_select %p839_p7, %s838_s19, %s837_s4 }
 0x10b   : > { %844 = sbr.rel (%p2521_p0) target bundleno = 704 (0x2c0), region = 44 }
 0x110   : > { %v847_v60 = vlaneseq  ;;  %s2523_s5 = sshll.u32 %s840_s6, 2  ;;  %v2522_v61 = vld [vmem:[%s3146_s10 + $0x2] ss:$4 sm:$0xf]  ;;  %vm885_vm0 = vcmask 1040384   ;;  %vm887_vm1 = vcmask 1042434  }
 0x111   : > { %v850_v2 = vstv %s2523_s5  ;;  %v854_v16 = vperm.slane %v2522_v61, 0  ;;  %v855_v24 = vperm.slane %v2522_v61, 1  ;;  %v856_v19 = vperm.slane %v2522_v61, 2  ;;  %v3514_v39 = vld [vmem:[#allocation3 + $0x228] sm:$0xff]  ;;  %v3519_v42 = vld [vmem:[#allocation3 + $0x290] sm:$0xff]  ;;  %v3521_v15 = vld [vmem:[#allocation3 + $0x238] sm:$0xff] }
 0x112   : > { %v848_v4 = vshrl.u32 %v847_v60, 7  ;;  %v857_v20 = vperm.slane %v2522_v61, 3  ;;  %vm889_vm2 = vcmask 1041408   ;;  %vm891_vm3 = vcmask 1041409   ;;  %v3523_v43 = vld [vmem:[#allocation3] sm:$0xff]  ;;  %v3531_v48 = vld [vmem:[#allocation3 + $0x1e8] sm:$0xff] }
 0x113   : > { %vm893_vm4 = vcmask 1043459   ;;  %vm899_vm5 = vcmask 1044484   ;;  %vm905_vm6 = vcmask 1045509   ;;  %vm895_vm7 = vcmask 1042433   ;;  %v3533_v51 = vld [vmem:[#allocation3 + $0x70] sm:$0xff]  ;;  %v3535_v52 = vld [vmem:[#allocation3 + $0x60] sm:$0xff] }
 0x114   : > { %v851_v17 = vadd.s32 %v850_v2, %v848_v4  ;;  %vm901_vm8 = vcmask 1043458   ;;  %vm907_vm9 = vcmask 1044483   ;;  %v3537_v53 = vld [vmem:[#allocation3 + $0x1a8] sm:$0xff]  ;;  %v3539_v54 = vld [vmem:[#allocation3 + $0x1b8] sm:$0xff] }
 0x116   : > { %v852_v21 = vcvt.s32.f32 %v851_v17  ;;  %v3578_v17 = vld [vmem:[#allocation3 + $0x1e0] sm:$0xff] }
 0x118   : > { %v862_v22 = vsub.f32 %v852_v21, %v854_v16  ;;  %v863_v23 = vsub.f32 %v852_v21, %v855_v24  ;;  %v864_v25 = vsub.f32 %v852_v21, %v856_v19  ;;  %v865_v18 = vsub.f32 %v852_v21, %v857_v20  ;;  %v3576_v16 = vld [vmem:[#allocation3 + $0x218] sm:$0xff]  ;;  %v3580_v24 = vld [vmem:[#allocation3 + $0x3f0] sm:$0xff] }
 0x11a   : > { %v866_v28 = vand.u32 2147483647, %v862_v22  ;;  %v867_v5 = vand.u32 2147483647, %v863_v23  ;;  %v868_v6 = vand.u32 2147483647, %v864_v25 }
 0x11b   : > { %v869_v29 = vand.u32 2147483647, %v865_v18 }
 0x11c   : > { %v870_v26 = vsub.f32 1.0, %v866_v28  ;;  %v871_v27 = vsub.f32 1.0, %v867_v5  ;;  %v872_v30 = vsub.f32 1.0, %v868_v6 }
 0x11d   : > { %v873_v31 = vsub.f32 1.0, %v869_v29 }
 0x11e   : > { %v874_v32 = vmax.f32 %v870_v26, 0.0  ;;  %v875_v33 = vmax.f32 %v871_v27, 0.0  ;;  %v876_v34 = vmax.f32 %v872_v30, 0.0  ;;  %v3596_v26 = vld [vmem:[#allocation3 + $0x3d0] sm:$0xff] }
 0x11f   : > { %v877_v50 = vmax.f32 %v873_v31, 0.0 }
 0x120   : > { %v882_v7 = vrot.slane %v875_v33, 7  ;;  %v883_v55 = vrot.slane %v876_v34, 6  ;;  %v3604_v33 = vld [vmem:[#allocation3 + $0x390] sm:$0xff]  ;;  %v3606_v34 = vld [vmem:[#allocation3 + $0x2c0] sm:$0xff] }
 0x121   : > { %v884_v56 = vrot.slane %v877_v50, 5 }
 0x122   : > { %v886_v57 = vsel %vm885_vm0, %v874_v32, %v882_v7  ;;  %v898_v35 = vsel %vm887_vm1, %v874_v32, %v882_v7  ;;  %v892_v36 = vsel %vm891_vm3, %v874_v32, %v882_v7  ;;  %v904_v37 = vsel %vm893_vm4, %v874_v32, %v882_v7  ;;  %v3602_v32 = vld [vmem:[#allocation3 + $0x3c8] sm:$0xff] }
 0x123   : > { %v888_v38 = vsel %vm887_vm1, %v883_v55, %v884_v56  ;;  %v894_v40 = vsel %vm893_vm4, %v883_v55, %v884_v56  ;;  %v900_v41 = vsel %vm899_vm5, %v883_v55, %v884_v56  ;;  %v906_v3 = vsel %vm905_vm6, %v883_v55, %v884_v56 }
 0x124   : > { %v3517_v8 = vsel %vm889_vm2, %v886_v57, %v888_v38  ;;  %v896_v44 = vsel %vm895_vm7, %v892_v36, %v894_v40  ;;  %v3542_v58 = vsel %vm901_vm8, %v898_v35, %v900_v41  ;;  %v3545_v46 = vsel %vm907_vm9, %v904_v37, %v906_v3  ;;  %v3622_v3 = vld [vmem:[#allocation3 + $0x98] sm:$0xff] }
 0x125   : > { %5205 = vst [vmem:[#allocation28_spill] sm:$0xff] %v3517_v8  ;;  %v3527_v45 = vperm.slane %v3517_v8, 0  ;;  %v3529_v47 = vrot.slane %v896_v44, 1  ;;  %v3624_v44 = vld [vmem:[#allocation3 + $0x398] sm:$0xff] }
 0x127   : > { %5206 = vst [vmem:[#allocation29_spill] sm:$0xff] %v3529_v47  ;;  %v1126_v63 = vmul.f32 %v3527_v45, %v3514_v39  ;;  %v1130_v0 = vmul.f32 %v3527_v45, %v3519_v42  ;;  %v1190_v1 = vmul.f32 %v3527_v45, %v3521_v15  ;;  %v1194_v9 = vmul.f32 %v3527_v45, %v3523_v43 }
 0x128   : > { %v3556_v12 = vperm.slane %v3529_v47, 0  ;;  %v1118_v13 = vmul.f32 %v3527_v45, %v3531_v48  ;;  %v1122_v49 = vmul.f32 %v3527_v45, %v3533_v51  ;;  %v1182_v62 = vmul.f32 %v3527_v45, %v3535_v52 }
 0x129   : > { %v1626_v10 = vpack.c.bf16 %v1130_v0, %v1126_v63  ;;  %v1658_v11 = vpack.c.bf16 %v1194_v9, %v1190_v1  ;;  %v1186_v14 = vmul.f32 %v3527_v45, %v3537_v53  ;;  %v1110_v59 = vmul.f32 %v3527_v45, %v3539_v54  ;;  %v3626_v63 = vld [vmem:[#allocation3 + $0x158] sm:$0xff] }
 0x12a   : > { %v1254_v60 = vmul.f32 %v3556_v12, %v3514_v39  ;;  %v1258_v61 = vmul.f32 %v3556_v12, %v3519_v42  ;;  %v1318_v2 = vmul.f32 %v3556_v12, %v3521_v15  ;;  %v1322_v4 = vmul.f32 %v3556_v12, %v3523_v43 }
 0x12b   : > { %1894 = vmatpush.bf16.msra.mxu0 %v1626_v10  ;;  %1908 = vmatpush.bf16.msra.mxu1 %v1658_v11  ;;  %v1622_v19 = vpack.c.bf16 %v1122_v49, %v1118_v13  ;;  %v1654_v20 = vpack.c.bf16 %v1186_v14, %v1182_v62  ;;  %v1246_v21 = vmul.f32 %v3556_v12, %v3531_v48  ;;  %v3632_v13 = vld [vmem:[#allocation3 + $0x118] sm:$0xff] }
 0x12c   : > { %v1690_v22 = vpack.c.bf16 %v1258_v61, %v1254_v60  ;;  %v1722_v23 = vpack.c.bf16 %v1322_v4, %v1318_v2  ;;  %v1250_v25 = vmul.f32 %v3556_v12, %v3533_v51  ;;  %v1310_v18 = vmul.f32 %v3556_v12, %v3535_v52  ;;  %v3642_v61 = vld [vmem:[#allocation3 + $0x180] sm:$0xff] }
 0x12d   : > { %v1314_v28 = vmul.f32 %v3556_v12, %v3537_v53  ;;  %v1114_v5 = vmul.f32 %v3527_v45, %v3576_v16  ;;  %v1174_v6 = vmul.f32 %v3527_v45, %v3578_v17  ;;  %v1178_v29 = vmul.f32 %v3527_v45, %v3580_v24 }
 0x12e   : > { %1922 = vmatpush.bf16.msra.mxu2 %v1690_v22  ;;  %1936 = vmatpush.bf16.msra.mxu3 %v1722_v23  ;;  %v1686_v27 = vpack.c.bf16 %v1250_v25, %v1246_v21  ;;  %v1238_v30 = vmul.f32 %v3556_v12, %v3539_v54  ;;  %v1242_v31 = vmul.f32 %v3556_v12, %v3576_v16  ;;  %v3650_v21 = vld [vmem:[#allocation3 + $0x2d0] sm:$0xff]  ;;  %v3652_v22 = vld [vmem:[#allocation3 + $0x2a8] sm:$0xff] }
 0x12f   : > { %1895 = vmatpush.bf16.msra.mxu0 %v1622_v19  ;;  %1909 = vmatpush.bf16.msra.mxu1 %v1654_v20  ;;  %v1718_v50 = vpack.c.bf16 %v1314_v28, %v1310_v18  ;;  %v1618_v7 = vpack.c.bf16 %v1114_v5, %v1110_v59  ;;  %v1650_v55 = vpack.c.bf16 %v1178_v29, %v1174_v6  ;;  %v3654_v23 = vld [vmem:[#allocation3 + $0x1d0] sm:$0xff] }
 0x130   : > { %v1682_v56 = vpack.c.bf16 %v1242_v31, %v1238_v30  ;;  %v1302_v57 = vmul.f32 %v3556_v12, %v3578_v17  ;;  %v1306_v35 = vmul.f32 %v3556_v12, %v3580_v24  ;;  %v1102_v36 = vmul.f32 %v3527_v45, %v3596_v26 }
 0x131   : > { %v1106_v37 = vmul.f32 %v3527_v45, %v3602_v32  ;;  %v1166_v38 = vmul.f32 %v3527_v45, %v3604_v33  ;;  %v1170_v40 = vmul.f32 %v3527_v45, %v3606_v34  ;;  %v1230_v41 = vmul.f32 %v3556_v12, %v3596_v26 }
 0x132   : > { %1923 = vmatpush.bf16.msra.mxu2 %v1686_v27  ;;  %1937 = vmatpush.bf16.msra.mxu3 %v1718_v50  ;;  %v1714_v0 = vpack.c.bf16 %v1306_v35, %v1302_v57  ;;  %v1234_v1 = vmul.f32 %v3556_v12, %v3602_v32  ;;  %v1294_v9 = vmul.f32 %v3556_v12, %v3604_v33  ;;  %v3662_v27 = vld [vmem:[#allocation3 + $0xd8] sm:$0xff]  ;;  %v3665_v30 = vrot.slane %v3542_v58, 2 }
 0x133   : > { %1896 = vmatpush.bf16.msra.mxu0 %v1618_v7  ;;  %1910 = vmatpush.bf16.msra.mxu1 %v1650_v55  ;;  %v1614_v49 = vpack.c.bf16 %v1106_v37, %v1102_v36  ;;  %v1646_v62 = vpack.c.bf16 %v1170_v40, %v1166_v38  ;;  %v1298_v10 = vmul.f32 %v3556_v12, %v3606_v34  ;;  %v3683_v37 = vld [vmem:[#allocation3 + $0x3d8] sm:$0xff] }
 0x134   : > { %v1678_v11 = vpack.c.bf16 %v1234_v1, %v1230_v41  ;;  %v1094_v14 = vmul.f32 %v3527_v45, %v3622_v3  ;;  %v1098_v59 = vmul.f32 %v3527_v45, %v3624_v44  ;;  %v1158_v60 = vmul.f32 %v3527_v45, %v3626_v63  ;;  %5207 = vst [vmem:[#allocation30_spill] sm:$0xff] %v3665_v30  ;;  %v3685_v38 = vld [vmem:[#allocation3 + $0x178] sm:$0xff]  ;;  %v3689_v1 = vld [vmem:[#allocation3 + $0x300] sm:$0xff] }
 0x135   : > { %v1710_v2 = vpack.c.bf16 %v1298_v10, %v1294_v9  ;;  %v1162_v4 = vmul.f32 %v3527_v45, %v3632_v13  ;;  %v1222_v19 = vmul.f32 %v3556_v12, %v3622_v3  ;;  %v1226_v20 = vmul.f32 %v3556_v12, %v3624_v44 }
 0x136   : > { %1924 = vmatpush.bf16.msra.mxu2 %v1682_v56  ;;  %1938 = vmatpush.bf16.msra.mxu3 %v1714_v0  ;;  %v1610_v25 = vpack.c.bf16 %v1098_v59, %v1094_v14  ;;  %v1286_v18 = vmul.f32 %v3556_v12, %v3626_v63  ;;  %v1290_v28 = vmul.f32 %v3556_v12, %v3632_v13  ;;  %v3673_v56 = vld [vmem:[#allocation3 + $0x308] sm:$0xff]  ;;  %v3692_v9 = vrot.slane %v3545_v46, 3 }
 0x137   : > { %1897 = vmatpush.bf16.msra.mxu0 %v1614_v49  ;;  %1911 = vmatpush.bf16.msra.mxu1 %v1646_v62  ;;  %v1642_v5 = vpack.c.bf16 %v1162_v4, %v1158_v60  ;;  %v1674_v6 = vpack.c.bf16 %v1226_v20, %v1222_v19  ;;  %v1086_v29 = vmul.f32 %v3527_v45, %v3642_v61  ;;  %v3696_v14 = vld [vmem:[#allocation3 + $0xe8] sm:$0xff]  ;;  %v3709_v4 = vld [vmem:[#allocation3 + $0x38] sm:$0xff] }
 0x138   : > { %v1706_v31 = vpack.c.bf16 %v1290_v28, %v1286_v18  ;;  %v1090_v50 = vmul.f32 %v3527_v45, %v3650_v21  ;;  %v1150_v7 = vmul.f32 %v3527_v45, %v3652_v22  ;;  %v1154_v55 = vmul.f32 %v3527_v45, %v3654_v23  ;;  %5208 = vst [vmem:[#allocation31_spill] sm:$0xff] %v3692_v9  ;;  %v3711_v19 = vld [vmem:[#allocation3 + $0x108] sm:$0xff] }
 0x139   : > { %v1214_v57 = vmul.f32 %v3556_v12, %v3642_v61  ;;  %v1218_v35 = vmul.f32 %v3556_v12, %v3650_v21  ;;  %v1278_v58 = vmul.f32 %v3556_v12, %v3652_v22  ;;  %v1282_v36 = vmul.f32 %v3556_v12, %v3654_v23 }
 0x13a   : > { %1925 = vmatpush.bf16.msra.mxu2 %v1678_v11  ;;  %1939 = vmatpush.bf16.msra.mxu3 %v1710_v2  ;;  %v1606_v40 = vpack.c.bf16 %v1090_v50, %v1086_v29  ;;  %v1638_v41 = vpack.c.bf16 %v1154_v55, %v1150_v7  ;;  %v1078_v0 = vmul.f32 %v3527_v45, %v3662_v27  ;;  %v3699_v11 = vperm.slane %v3665_v30, 0 }
 0x13b   : > { %1898 = vmatpush.bf16.msra.mxu0 %v1610_v25  ;;  %1912 = vmatpush.bf16.msra.mxu1 %v1642_v5  ;;  %v1670_v49 = vpack.c.bf16 %v1218_v35, %v1214_v57  ;;  %v1702_v62 = vpack.c.bf16 %v1282_v36, %v1278_v58  ;;  %v1082_v10 = vmul.f32 %v3527_v45, %v3673_v56  ;;  %v3726_v35 = vperm.slane %v3692_v9, 0 }
 0x13c   : > { %v1142_v59 = vmul.f32 %v3527_v45, %v3683_v37  ;;  %v1146_v60 = vmul.f32 %v3527_v45, %v3685_v38  ;;  %v1206_v46 = vmul.f32 %v3556_v12, %v3662_v27  ;;  %v1210_v2 = vmul.f32 %v3556_v12, %v3673_v56 }
 0x13d   : > { %v1602_v20 = vpack.c.bf16 %v1082_v10, %v1078_v0  ;;  %v1270_v25 = vmul.f32 %v3556_v12, %v3683_v37  ;;  %v1274_v18 = vmul.f32 %v3556_v12, %v3685_v38  ;;  %v1070_v28 = vmul.f32 %v3527_v45, %v3689_v1 }
 0x13e   : > { %1926 = vmatpush.bf16.msra.mxu2 %v1674_v6  ;;  %1940 = vmatpush.bf16.msra.mxu3 %v1706_v31  ;;  %v1634_v5 = vpack.c.bf16 %v1146_v60, %v1142_v59  ;;  %v1666_v29 = vpack.c.bf16 %v1210_v2, %v1206_v46  ;;  %v1074_v50 = vmul.f32 %v3527_v45, %v3696_v14 }
 0x13f   : > { %1899 = vmatpush.bf16.msra.mxu0 %v1606_v40  ;;  %1913 = vmatpush.bf16.msra.mxu1 %v1638_v41  ;;  %v1698_v7 = vpack.c.bf16 %v1274_v18, %v1270_v25  ;;  %v1134_v55 = vmul.f32 %v3527_v45, %v3709_v4  ;;  %v1138_v57 = vmul.f32 %v3527_v45, %v3711_v19 }
 0x140   : > { %v1598_v58 = vpack.c.bf16 %v1074_v50, %v1070_v28  ;;  %v1382_v6 = vmul.f32 %v3699_v11, %v3514_v39  ;;  %v1386_v31 = vmul.f32 %v3699_v11, %v3519_v42  ;;  %v1446_v36 = vmul.f32 %v3699_v11, %v3521_v15 }
 0x141   : > { %v1630_v40 = vpack.c.bf16 %v1138_v57, %v1134_v55  ;;  %v1450_v41 = vmul.f32 %v3699_v11, %v3523_v43  ;;  %v1198_v45 = vmul.f32 %v3556_v12, %v3689_v1  ;;  %v1202_v0 = vmul.f32 %v3556_v12, %v3696_v14 }
 0x142   : > { %1927 = vmatpush.bf16.msra.mxu2 %v1670_v49  ;;  %1941 = vmatpush.bf16.msra.mxu3 %v1702_v62  ;;  %v1754_v10 = vpack.c.bf16 %v1386_v31, %v1382_v6  ;;  %v1262_v59 = vmul.f32 %v3556_v12, %v3709_v4  ;;  %v1266_v60 = vmul.f32 %v3556_v12, %v3711_v19 }
 0x143   : > { %1900 = vmatpush.bf16.msra.mxu0 %v1602_v20  ;;  %1914 = vmatpush.bf16.msra.mxu1 %v1634_v5  ;;  %v1786_v46 = vpack.c.bf16 %v1450_v41, %v1446_v36  ;;  %v1662_v2 = vpack.c.bf16 %v1202_v0, %v1198_v45  ;;  %v1510_v25 = vmul.f32 %v3726_v35, %v3514_v39 }
 0x144   : > { %v1694_v18 = vpack.c.bf16 %v1266_v60, %v1262_v59  ;;  %v1514_v28 = vmul.f32 %v3726_v35, %v3519_v42  ;;  %v1574_v49 = vmul.f32 %v3726_v35, %v3521_v15  ;;  %v1578_v62 = vmul.f32 %v3726_v35, %v3523_v43  ;;  %v2526_v59 = vld [vmem:[%s3153_s12] sm:$0xf] }
 0x145   : > { %v1374_v12 = vmul.f32 %v3699_v11, %v3531_v48  ;;  %v1378_v20 = vmul.f32 %v3699_v11, %v3533_v51  ;;  %v1438_v5 = vmul.f32 %v3699_v11, %v3535_v52  ;;  %v1442_v39 = vmul.f32 %v3699_v11, %v3537_v53 }
 0x146   : > { %1928 = vmatpush.bf16.msra.mxu2 %v1666_v29  ;;  %1942 = vmatpush.bf16.msra.mxu3 %v1698_v7  ;;  %v1818_v42 = vpack.c.bf16 %v1514_v28, %v1510_v25  ;;  %v1850_v50 = vpack.c.bf16 %v1578_v62, %v1574_v49  ;;  %v1502_v15 = vmul.f32 %v3726_v35, %v3531_v48  ;;  %v2564_v49 = vld [vmem:[%s3153_s12 + $0x4] sm:$0xf] }
 0x147   : > { %1901 = vmatpush.bf16.msra.mxu0 %v1598_v58  ;;  %1915 = vmatpush.bf16.msra.mxu1 %v1630_v40  ;;  %v1750_v43 = vpack.c.bf16 %v1378_v20, %v1374_v12  ;;  %v1782_v55 = vpack.c.bf16 %v1442_v39, %v1438_v5  ;;  %v1506_v57 = vmul.f32 %v3726_v35, %v3533_v51  ;;  %v2528_v62 = vld [vmem:[%s3153_s12 + $0x20] sm:$0xf0]  ;;  %v2569_v39 = vld [vmem:[%s3153_s12 + $0x24] sm:$0xf0] }
 0x148   : > { %v1566_v6 = vmul.f32 %v3726_v35, %v3535_v52  ;;  %v1570_v29 = vmul.f32 %v3726_v35, %v3537_v53  ;;  %v1366_v7 = vmul.f32 %v3699_v11, %v3539_v54  ;;  %v1370_v48 = vmul.f32 %v3699_v11, %v3576_v16 }
 0x149   : > { %v1814_v31 = vpack.c.bf16 %v1506_v57, %v1502_v15  ;;  %v1430_v58 = vmul.f32 %v3699_v11, %v3578_v17  ;;  %v1434_v51 = vmul.f32 %v3699_v11, %v3580_v24  ;;  %v1494_v53 = vmul.f32 %v3726_v35, %v3539_v54  ;;  %v2536_v57 = vld [vmem:[%s3153_s12 + $0x28] sm:$0xf0] }
 0x14a   : > { %1929 = vmatpush.bf16.msra.mxu2 %v1662_v2  ;;  %1943 = vmatpush.bf16.msra.mxu3 %v1694_v18  ;;  %v1846_v52 = vpack.c.bf16 %v1570_v29, %v1566_v6  ;;  %v1498_v36 = vmul.f32 %v3726_v35, %v3576_v16  ;;  %v1746_v40 = vpack.c.bf16 %v1370_v48, %v1366_v7  ;;  %v2568_v16 = vld [vmem:[%s3153_s12 + $0x1c] sm:$0xf0] }
 0x14b   : > { %1950 = vmatpush.bf16.msrb.mxu0 %v1754_v10  ;;  %1964 = vmatpush.bf16.msrb.mxu1 %v1786_v46  ;;  %v1778_v41 = vpack.c.bf16 %v1434_v51, %v1430_v58  ;;  %v1558_v45 = vmul.f32 %v3726_v35, %v3578_v17  ;;  %v1562_v10 = vmul.f32 %v3726_v35, %v3580_v24 }
 0x14c   : > { %v1810_v0 = vpack.c.bf16 %v1498_v36, %v1494_v53  ;;  %v1358_v54 = vmul.f32 %v3699_v11, %v3596_v26  ;;  %v1362_v60 = vmul.f32 %v3699_v11, %v3602_v32  ;;  %v1422_v17 = vmul.f32 %v3699_v11, %v3604_v33 }
 0x14d   : > { %v1426_v46 = vmul.f32 %v3699_v11, %v3606_v34  ;;  %v1486_v2 = vmul.f32 %v3726_v35, %v3596_v26  ;;  %v1842_v24 = vpack.c.bf16 %v1562_v10, %v1558_v45  ;;  %v1490_v25 = vmul.f32 %v3726_v35, %v3602_v32  ;;  %v2534_v26 = vld [vmem:[%s3153_s12 + $0x8] sm:$0xf] }
 0x14e   : > { %1978 = vmatpush.bf16.msrb.mxu2 %v1818_v42  ;;  %1992 = vmatpush.bf16.msrb.mxu3 %v1850_v50  ;;  %v1550_v18 = vmul.f32 %v3726_v35, %v3604_v33  ;;  %v1554_v28 = vmul.f32 %v3726_v35, %v3606_v34  ;;  %v1742_v12 = vpack.c.bf16 %v1362_v60, %v1358_v54 }
 0x14f   : > { %1951 = vmatpush.bf16.msrb.mxu0 %v1750_v43  ;;  %1965 = vmatpush.bf16.msrb.mxu1 %v1782_v55  ;;  %v1774_v20 = vpack.c.bf16 %v1426_v46, %v1422_v17  ;;  %v3804_v5 = vor.u32 %v2568_v16, %v2526_v59  ;;  %v1806_v32 = vpack.c.bf16 %v1490_v25, %v1486_v2  ;;  %v2565_v55 = vld [vmem:[%s3153_s12 + $0xc] sm:$0xf] }
 0x150   : > { %v1838_v42 = vpack.c.bf16 %v1554_v28, %v1550_v18  ;;  %v1350_v33 = vmul.f32 %v3699_v11, %v3622_v3  ;;  %v1354_v34 = vmul.f32 %v3699_v11, %v3624_v44  ;;  %v1414_v50 = vmul.f32 %v3699_v11, %v3626_v63  ;;  %v3871_v18 = vld [vmem:[#allocation3 + $0x1c0] sm:$0xff]  ;;  %v3873_v28 = vld [vmem:[#allocation3 + $0x48] sm:$0xff] }
 0x151   : > { %1902 = vmatmul.bf16.vlgmr.msra.gmra.mxu0 %v3804_v5  ;;  %v1418_v15 = vmul.f32 %v3699_v11, %v3632_v13  ;;  %v3817_v43 = vor.u32 %v2564_v49, %v2528_v62  ;;  %v3821_v6 = vor.u32 %v2569_v39, %v2534_v26  ;;  %v1478_v29 = vmul.f32 %v3726_v35, %v3622_v3 }
 0x152   : > { %1979 = vmatpush.bf16.msrb.mxu2 %v1814_v31  ;;  %1993 = vmatpush.bf16.msrb.mxu3 %v1846_v52  ;;  %v1482_v7 = vmul.f32 %v3726_v35, %v3624_v44  ;;  %v1542_v31 = vmul.f32 %v3726_v35, %v3626_v63  ;;  %v1738_v48 = vpack.c.bf16 %v1354_v34, %v1350_v33  ;;  %v3886_v26 = vperm.slane %v3529_v47, 1 }
 0x153   : > { %1952 = vmatpush.bf16.msrb.mxu0 %v1746_v40  ;;  %1966 = vmatpush.bf16.msrb.mxu1 %v1778_v41  ;;  %v1770_v58 = vpack.c.bf16 %v1418_v15, %v1414_v50  ;;  %v1546_v51 = vmul.f32 %v3726_v35, %v3632_v13  ;;  %v3831_v53 = vor.u32 %v2565_v55, %v2536_v57  ;;  %v2542_v55 = vld [vmem:[%s3153_s12 + $0x10] sm:$0xf] }
 0x154   : > { %v1802_v52 = vpack.c.bf16 %v1482_v7, %v1478_v29  ;;  %v1342_v3 = vmul.f32 %v3699_v11, %v3642_v61  ;;  %1916 = vmatmul.bf16.vlgmr.msra.gmra.mxu1 %v3817_v43  ;;  %1930 = vmatmul.bf16.vlgmr.msra.gmra.mxu2 %v3821_v6  ;;  %v1346_v63 = vmul.f32 %v3699_v11, %v3650_v21  ;;  %v2570_v57 = vld [vmem:[%s3153_s12 + $0x2c] sm:$0xf0]  ;;  %v2566_v29 = vld [vmem:[%s3153_s12 + $0x14] sm:$0xf] }
 0x155   : > { %v1834_v44 = vpack.c.bf16 %v1546_v51, %v1542_v31  ;;  %v1406_v36 = vmul.f32 %v3699_v11, %v3652_v22  ;;  %1944 = vmatmul.bf16.vlgmr.msra.gmra.mxu3 %v3831_v53  ;;  %v1410_v13 = vmul.f32 %v3699_v11, %v3654_v23  ;;  %v1470_v40 = vmul.f32 %v3726_v35, %v3642_v61  ;;  %v2550_v51 = vld [vmem:[%s3153_s12 + $0x18] sm:$0xf] }
 0x156   : > { %1980 = vmatpush.bf16.msrb.mxu2 %v1810_v0  ;;  %1994 = vmatpush.bf16.msrb.mxu3 %v1842_v24  ;;  %v1474_v41 = vmul.f32 %v3726_v35, %v3650_v21  ;;  %v1534_v45 = vmul.f32 %v3726_v35, %v3652_v22  ;;  %v1734_v0 = vpack.c.bf16 %v1346_v63, %v1342_v3  ;;  %v3857_v21 = vperm.slane %v3517_v8, 1  ;;  %v3914_v63 = vld [vmem:[#allocation3 + $0x150] sm:$0xff] }
 0x157   : > { %1953 = vmatpush.bf16.msrb.mxu0 %v1742_v12  ;;  %1967 = vmatpush.bf16.msrb.mxu1 %v1774_v20  ;;  %v1538_v10 = vmul.f32 %v3726_v35, %v3654_v23  ;;  %v1334_v54 = vmul.f32 %v3699_v11, %v3662_v27  ;;  %v1766_v59 = vpack.c.bf16 %v1410_v13, %v1406_v36 }
 0x158   : > { %v1798_v16 = vpack.c.bf16 %v1474_v41, %v1470_v40  ;;  %v1338_v61 = vmul.f32 %v3699_v11, %v3673_v56  ;;  %v1398_v60 = vmul.f32 %v3699_v11, %v3683_v37  ;;  %v1402_v23 = vmul.f32 %v3699_v11, %v3685_v38  ;;  %v3924_v41 = vld [vmem:[#allocation3 + $0xb8] sm:$0xff] }
 0x159   : > { %v1830_v22 = vpack.c.bf16 %v1538_v10, %v1534_v45  ;;  %v1462_v17 = vmul.f32 %v3726_v35, %v3662_v27  ;;  %v1466_v2 = vmul.f32 %v3726_v35, %v3673_v56  ;;  %v1526_v24 = vmul.f32 %v3726_v35, %v3683_v37  ;;  %v3879_v56 = vld [vmem:[#allocation3 + $0xf8] sm:$0xff]  ;;  %v3881_v37 = vld [vmem:[#allocation3 + $0x320] sm:$0xff]  ;;  %v3926_v45 = vld [vmem:[#allocation3 + $0x8] sm:$0xff] }
 0x15a   : > { %1981 = vmatpush.bf16.msrb.mxu2 %v1806_v32  ;;  %1995 = vmatpush.bf16.msrb.mxu3 %v1838_v42  ;;  %v1730_v46 = vpack.c.bf16 %v1338_v61, %v1334_v54  ;;  %v1530_v25 = vmul.f32 %v3726_v35, %v3685_v38  ;;  %v1762_v49 = vpack.c.bf16 %v1402_v23, %v1398_v60  ;;  %v2567_v54 = vld [vmem:[%s3153_s12 + $0x1c] sm:$0xf] }
 0x15b   : > { %1954 = vmatpush.bf16.msrb.mxu0 %v1738_v48  ;;  %1968 = vmatpush.bf16.msrb.mxu1 %v1770_v58  ;;  %v1326_v27 = vmul.f32 %v3699_v11, %v3689_v1  ;;  %v1330_v62 = vmul.f32 %v3699_v11, %v3696_v14  ;;  %v1794_v38 = vpack.c.bf16 %v1466_v2, %v1462_v17  ;;  %v2544_v58 = vld [vmem:[%s3153_s12 + $0x30] sm:$0xf0]  ;;  %v3946_v2 = vld [vmem:[#allocation3 + $0x28] sm:$0xff] }
 0x15c   : > { %v1826_v12 = vpack.c.bf16 %v1530_v25, %v1526_v24  ;;  %v1390_v20 = vmul.f32 %v3699_v11, %v3709_v4  ;;  %v1394_v32 = vmul.f32 %v3699_v11, %v3711_v19  ;;  %v1127_v42 = vmul.f32 %v3857_v21, %v3871_v18  ;;  %v3948_v24 = vld [vmem:[#allocation3 + $0xa8] sm:$0xff] }
 0x15d   : > { %v1726_v39 = vpack.c.bf16 %v1330_v62, %v1326_v27  ;;  %v1131_v33 = vmul.f32 %v3857_v21, %v3873_v28  ;;  %v1191_v34 = vmul.f32 %v3857_v21, %v3879_v56  ;;  %v1195_v50 = vmul.f32 %v3857_v21, %v3881_v37  ;;  %v3954_v62 = vld [vmem:[#allocation3 + $0x378] sm:$0xff] }
 0x15e   : > { %1982 = vmatpush.bf16.msrb.mxu2 %v1802_v52  ;;  %1996 = vmatpush.bf16.msrb.mxu3 %v1834_v44  ;;  %v1454_v15 = vmul.f32 %v3726_v35, %v3689_v1  ;;  %v1458_v11 = vmul.f32 %v3726_v35, %v3696_v14  ;;  %v1758_v7 = vpack.c.bf16 %v1394_v32, %v1390_v20  ;;  %v2571_v52 = vld [vmem:[%s3153_s12 + $0x34] sm:$0xf0]  ;;  %v3912_v44 = vld [vmem:[#allocation3 + $0x270] sm:$0xff] }
 0x15f   : > { %1955 = vmatpush.bf16.msrb.mxu0 %v1734_v0  ;;  %1969 = vmatpush.bf16.msrb.mxu1 %v1766_v59  ;;  %v1627_v31 = vpack.c.bf16 %v1131_v33, %v1127_v42  ;;  %v1518_v48 = vmul.f32 %v3726_v35, %v3709_v4  ;;  %v1659_v1 = vpack.c.bf16 %v1195_v50, %v1191_v34  ;;  %v2552_v59 = vld [vmem:[%s3153_s12 + $0x38] sm:$0xf0] }
 0x160   : > { %v1790_v3 = vpack.c.bf16 %v1458_v11, %v1454_v15  ;;  %v1522_v14 = vmul.f32 %v3726_v35, %v3711_v19  ;;  %v3916_v36 = vor.u32 %v2570_v57, %v2542_v55  ;;  %v1255_v4 = vmul.f32 %v3886_v26, %v3871_v18  ;;  %v3971_v15 = vld [vmem:[#allocation3 + $0x388] sm:$0xff]  ;;  %v3973_v11 = vld [vmem:[#allocation3 + $0x78] sm:$0xff] }
 0x161   : > { %v1259_v13 = vmul.f32 %v3886_v26, %v3873_v28  ;;  %v1319_v40 = vmul.f32 %v3886_v26, %v3879_v56  ;;  %v1323_v35 = vmul.f32 %v3886_v26, %v3881_v37  ;;  %v3930_v0 = vor.u32 %v2566_v29, %v2544_v58 }
 0x162   : > { %1983 = vmatpush.bf16.msrb.mxu2 %v1798_v16  ;;  %1997 = vmatpush.bf16.msrb.mxu3 %v1830_v22  ;;  %5209 = vst [vmem:[#allocation32_spill] sm:$0xff] %v3916_v36  ;;  %v1822_v19 = vpack.c.bf16 %v1522_v14, %v1518_v48  ;;  %v3932_v10 = vor.u32 %v2571_v52, %v2550_v51  ;;  %v3994_v14 = vld [vmem:[#allocation3 + $0x198] sm:$0xff] }
 0x163   : > { %1956 = vmatpush.bf16.msrb.mxu0 %v1730_v46  ;;  %1970 = vmatpush.bf16.msrb.mxu1 %v1762_v49  ;;  %5210 = vst [vmem:[#allocation33_spill] sm:$0xff] %v3930_v0  ;;  %v1691_v16 = vpack.c.bf16 %v1259_v13, %v1255_v4  ;;  %v1119_v61 = vmul.f32 %v3857_v21, %v3912_v44  ;;  %v3944_v46 = vld [vmem:[#allocation3 + $0x1c8] sm:$0xff]  ;;  %v3996_v4 = vld [vmem:[#allocation3 + $0x130] sm:$0xff] }
 0x164   : > { %5211 = vst [vmem:[#allocation34_spill] sm:$0xff] %v3932_v10  ;;  %v1123_v22 = vmul.f32 %v3857_v21, %v3914_v63  ;;  %v1723_v60 = vpack.c.bf16 %v1323_v35, %v1319_v40  ;;  %v1183_v23 = vmul.f32 %v3857_v21, %v3924_v41  ;;  %v1187_v17 = vmul.f32 %v3857_v21, %v3926_v45  ;;  %v3998_v13 = vld [vmem:[#allocation3 + $0x328] sm:$0xff] }
 0x165   : > { %v3950_v49 = vor.u32 %v2567_v54, %v2552_v59  ;;  %v1247_v27 = vmul.f32 %v3886_v26, %v3912_v44  ;;  %v1311_v20 = vmul.f32 %v3886_v26, %v3924_v41  ;;  %v1111_v32 = vmul.f32 %v3857_v21, %v3944_v46  ;;  %v4006_v59 = vld [vmem:[#allocation3 + $0x280] sm:$0xff] }
 0x166   : > { %1984 = vmatpush.bf16.msrb.mxu2 %v1794_v38  ;;  %1998 = vmatpush.bf16.msrb.mxu3 %v1826_v12  ;;  %v1623_v25 = vpack.c.bf16 %v1123_v22, %v1119_v61  ;;  %v1655_v38 = vpack.c.bf16 %v1187_v17, %v1183_v23  ;;  %v1251_v12 = vmul.f32 %v3886_v26, %v3914_v63 }
 0x167   : > { %1957 = vmatpush.bf16.msrb.mxu0 %v1726_v39  ;;  %1971 = vmatpush.bf16.msrb.mxu1 %v1758_v7  ;;  %5212 = vst [vmem:[#allocation35_spill] sm:$0xff] %v3950_v49  ;;  %v1315_v39 = vmul.f32 %v3886_v26, %v3926_v45  ;;  %v1115_v42 = vmul.f32 %v3857_v21, %v3946_v2  ;;  %v3980_v7 = vld [vmem:[#allocation3 + $0x2e0] sm:$0xff] }
 0x168   : > { %v1175_v33 = vmul.f32 %v3857_v21, %v3948_v24  ;;  %v1687_v34 = vpack.c.bf16 %v1251_v12, %v1247_v27  ;;  %v1179_v50 = vmul.f32 %v3857_v21, %v3954_v62  ;;  %v1239_v57 = vmul.f32 %v3886_v26, %v3944_v46  ;;  %v4022_v12 = vld [vmem:[#allocation3 + $0x268] sm:$0xff] }
 0x169   : > { %v1719_v55 = vpack.c.bf16 %v1315_v39, %v1311_v20  ;;  %v1243_v29 = vmul.f32 %v3886_v26, %v3946_v2  ;;  %v1619_v48 = vpack.c.bf16 %v1115_v42, %v1111_v32  ;;  %v1303_v58 = vmul.f32 %v3886_v26, %v3948_v24  ;;  %v4028_v42 = vld [vmem:[#allocation3 + $0x210] sm:$0xff] }
 0x16a   : > { %1985 = vmatpush.bf16.msrb.mxu2 %v1790_v3  ;;  %1999 = vmatpush.bf16.msrb.mxu3 %v1822_v19  ;;  %v1307_v51 = vmul.f32 %v3886_v26, %v3954_v62  ;;  %v1651_v52 = vpack.c.bf16 %v1179_v50, %v1175_v33  ;;  %v1107_v3 = vmul.f32 %v3857_v21, %v3973_v11 }
 0x16b   : > { %2006 = vmatpush.bf16.msra.mxu0 %v1627_v31  ;;  %2020 = vmatpush.bf16.msra.mxu1 %v1659_v1  ;;  %v3982_v31 = vld [vmem:[#allocation3 + $0x188] sm:$0xff]  ;;  %v1103_v1 = vmul.f32 %v3857_v21, %v3971_v15  ;;  %v1683_v40 = vpack.c.bf16 %v1243_v29, %v1239_v57  ;;  %v1167_v19 = vmul.f32 %v3857_v21, %v3980_v7  ;;  %v4036_v57 = vld [vmem:[#allocation3 + $0x370] sm:$0xff] }
 0x16c   : > { %1958 = vmatmul.bf16.vlgmr.msrb.gmra.mxu0 %v3916_v36  ;;  %1972 = vmatmul.bf16.vlgmr.msrb.gmra.mxu1 %v3930_v0  ;;  %v1171_v35 = vmul.f32 %v3857_v21, %v3982_v31  ;;  %v1231_v54 = vmul.f32 %v3886_v26, %v3971_v15  ;;  %v1235_v61 = vmul.f32 %v3886_v26, %v3973_v11 }
 0x16d   : > { %1986 = vmatmul.bf16.vlgmr.msrb.gmra.mxu2 %v3932_v10  ;;  %2000 = vmatmul.bf16.vlgmr.msrb.gmra.mxu3 %v3950_v49  ;;  %v1295_v22 = vmul.f32 %v3886_v26, %v3980_v7  ;;  %v1615_v23 = vpack.c.bf16 %v1107_v3, %v1103_v1  ;;  %v1095_v17 = vmul.f32 %v3857_v21, %v3994_v14 }
 0x16e   : > { %2034 = vmatpush.bf16.msra.mxu2 %v1691_v16  ;;  %2048 = vmatpush.bf16.msra.mxu3 %v1723_v60  ;;  %v1715_v16 = vpack.c.bf16 %v1307_v51, %v1303_v58  ;;  %v1299_v60 = vmul.f32 %v3886_v26, %v3982_v31  ;;  %v1159_v27 = vmul.f32 %v3857_v21, %v3998_v13  ;;  %v4042_v51 = vld [vmem:[#allocation3 + $0x30] sm:$0xff] }
 0x16f   : > { %2007 = vmatpush.bf16.msra.mxu0 %v1623_v25  ;;  %2021 = vmatpush.bf16.msra.mxu1 %v1655_v38  ;;  %v1099_v25 = vmul.f32 %v3857_v21, %v3996_v4  ;;  %v4020_v38 = vld [vmem:[#allocation3 + $0x190] sm:$0xff]  ;;  %v1647_v20 = vpack.c.bf16 %v1171_v35, %v1167_v19  ;;  %v1163_v39 = vmul.f32 %v3857_v21, %v4006_v59  ;;  %v4050_v35 = vld [vmem:[#allocation3 + $0x3a0] sm:$0xff] }
 0x170   : > { %v1223_v32 = vmul.f32 %v3886_v26, %v3994_v14  ;;  %v1679_v33 = vpack.c.bf16 %v1235_v61, %v1231_v54  ;;  %v1287_v50 = vmul.f32 %v3886_v26, %v3998_v13  ;;  %v1711_v29 = vpack.c.bf16 %v1299_v60, %v1295_v22  ;;  %5213 = vst [vmem:[#allocation36_spill] sm:$0xff] %v4042_v51  ;;  %v4048_v19 = vld [vmem:[#allocation3 + $0xf0] sm:$0xff] }
 0x171   : > { %v1091_v58 = vmul.f32 %v3857_v21, %v4022_v12  ;;  %v1643_v1 = vpack.c.bf16 %v1163_v39, %v1159_v27  ;;  %v1151_v3 = vmul.f32 %v3857_v21, %v4028_v42  ;;  %5215 = vst [vmem:[#allocation38_spill] sm:$0xff] %v4048_v19  ;;  %v4053_v54 = vperm.slane %v3665_v30, 1  ;;  %v4067_v39 = vld [vmem:[#allocation3 + $0x68] sm:$0xff] }
 0x172   : > { %2035 = vmatpush.bf16.msra.mxu2 %v1687_v34  ;;  %2049 = vmatpush.bf16.msra.mxu3 %v1719_v55  ;;  %v1227_v34 = vmul.f32 %v3886_v26, %v3996_v4  ;;  %v1291_v55 = vmul.f32 %v3886_v26, %v4006_v59  ;;  %5216 = vst [vmem:[#allocation39_spill] sm:$0xff] %v4050_v35 }
 0x173   : > { %2008 = vmatpush.bf16.msra.mxu0 %v1619_v48  ;;  %2022 = vmatpush.bf16.msra.mxu1 %v1651_v52  ;;  %v1087_v48 = vmul.f32 %v3857_v21, %v4020_v38  ;;  %v1611_v52 = vpack.c.bf16 %v1099_v25, %v1095_v17  ;;  %v1155_v22 = vmul.f32 %v3857_v21, %v4036_v57 }
 0x174   : > { %v1707_v61 = vpack.c.bf16 %v1291_v55, %v1287_v50  ;;  %v1215_v60 = vmul.f32 %v3886_v26, %v4020_v38  ;;  %v1219_v17 = vmul.f32 %v3886_v26, %v4022_v12  ;;  %v1279_v25 = vmul.f32 %v3886_v26, %v4028_v42 }
 0x175   : > { %v1283_v27 = vmul.f32 %v3886_v26, %v4036_v57  ;;  %v1143_v50 = vmul.f32 %v3857_v21, %v4048_v19  ;;  %v1147_v55 = vmul.f32 %v3857_v21, %v4050_v35  ;;  %v1271_v30 = vmul.f32 %v3886_v26, %v4048_v19 }
 0x176   : > { %2036 = vmatpush.bf16.msra.mxu2 %v1683_v40  ;;  %2050 = vmatpush.bf16.msra.mxu3 %v1715_v16  ;;  %v4046_v40 = vld [vmem:[#allocation3 + $0x310] sm:$0xff]  ;;  %v1675_v16 = vpack.c.bf16 %v1227_v34, %v1223_v32  ;;  %v1275_v49 = vmul.f32 %v3886_v26, %v4050_v35  ;;  %v1639_v10 = vpack.c.bf16 %v1155_v22, %v1151_v3  ;;  %v4102_v35 = vperm.slane %v3692_v9, 1 }
 0x177   : > { %2009 = vmatpush.bf16.msra.mxu0 %v1615_v23  ;;  %5214 = vst [vmem:[#allocation37_spill] sm:$0xff] %v4046_v40  ;;  %2023 = vmatpush.bf16.msra.mxu1 %v1647_v20  ;;  %v1607_v23 = vpack.c.bf16 %v1091_v58, %v1087_v48  ;;  %v4065_v20 = vld [vmem:[#allocation3 + $0x18] sm:$0xff]  ;;  %v4069_v32 = vld [vmem:[#allocation3 + $0x90] sm:$0xff]  ;;  %v1083_v34 = vmul.f32 %v3857_v21, %v4046_v40 }
 0x178   : > { %v4079_v48 = vld [vmem:[#allocation3 + $0x1d8] sm:$0xff]  ;;  %v1207_v58 = vmul.f32 %v3886_v26, %v4042_v51  ;;  %v1071_v0 = vmul.f32 %v3857_v21, %v4065_v20  ;;  %v1135_v36 = vmul.f32 %v3857_v21, %v4069_v32  ;;  %v1671_v47 = vpack.c.bf16 %v1219_v17, %v1215_v60 }
 0x179   : > { %v1139_v8 = vmul.f32 %v3857_v21, %v4079_v48  ;;  %v1383_v19 = vmul.f32 %v4053_v54, %v3871_v18  ;;  %v1387_v22 = vmul.f32 %v4053_v54, %v3873_v28 }
 0x17a   : > { %2037 = vmatpush.bf16.msra.mxu2 %v1679_v33  ;;  %2051 = vmatpush.bf16.msra.mxu3 %v1711_v29  ;;  %v1079_v33 = vmul.f32 %v3857_v21, %v4042_v51  ;;  %v1211_v29 = vmul.f32 %v3886_v26, %v4046_v40  ;;  %v1635_v40 = vpack.c.bf16 %v1147_v55, %v1143_v50 }
 0x17b   : > { %2010 = vmatpush.bf16.msra.mxu0 %v1611_v52  ;;  %2024 = vmatpush.bf16.msra.mxu1 %v1643_v1  ;;  %v1075_v52 = vmul.f32 %v3857_v21, %v4067_v39  ;;  %v1703_v1 = vpack.c.bf16 %v1283_v27, %v1279_v25  ;;  %v1631_v17 = vpack.c.bf16 %v1139_v8, %v1135_v36 }
 0x17c   : > { %v1603_v3 = vpack.c.bf16 %v1083_v34, %v1079_v33  ;;  %v1667_v51 = vpack.c.bf16 %v1211_v29, %v1207_v58  ;;  %v1447_v21 = vmul.f32 %v4053_v54, %v3879_v56  ;;  %v1199_v25 = vmul.f32 %v3886_v26, %v4065_v20 }
 0x17d   : > { %v1599_v60 = vpack.c.bf16 %v1075_v52, %v1071_v0  ;;  %v1755_v27 = vpack.c.bf16 %v1387_v22, %v1383_v19  ;;  %v1267_v8 = vmul.f32 %v3886_v26, %v4079_v48  ;;  %v1511_v36 = vmul.f32 %v4102_v35, %v3871_v18 }
 0x17e   : > { %2038 = vmatpush.bf16.msra.mxu2 %v1675_v16  ;;  %2052 = vmatpush.bf16.msra.mxu3 %v1707_v61  ;;  %v1699_v16 = vpack.c.bf16 %v1275_v49, %v1271_v30  ;;  %v1451_v61 = vmul.f32 %v4053_v54, %v3881_v37  ;;  %v1263_v30 = vmul.f32 %v3886_v26, %v4069_v32 }
 0x17f   : > { %2011 = vmatpush.bf16.msra.mxu0 %v1607_v23  ;;  %2025 = vmatpush.bf16.msra.mxu1 %v1639_v10  ;;  %v1203_v23 = vmul.f32 %v3886_v26, %v4067_v39  ;;  %v1515_v0 = vmul.f32 %v4102_v35, %v3873_v28  ;;  %v1579_v10 = vmul.f32 %v4102_v35, %v3881_v37 }
 0x180   : > { %v1375_v49 = vmul.f32 %v4053_v54, %v3912_v44  ;;  %v1379_v26 = vmul.f32 %v4053_v54, %v3914_v63  ;;  %v1439_v19 = vmul.f32 %v4053_v54, %v3924_v41  ;;  %v1443_v18 = vmul.f32 %v4053_v54, %v3926_v45 }
 0x181   : > { %v1503_v28 = vmul.f32 %v4102_v35, %v3912_v44  ;;  %v1567_v37 = vmul.f32 %v4102_v35, %v3924_v41  ;;  %v1571_v33 = vmul.f32 %v4102_v35, %v3926_v45  ;;  %v1787_v34 = vpack.c.bf16 %v1451_v61, %v1447_v21 }
 0x182   : > { %2039 = vmatpush.bf16.msra.mxu2 %v1671_v47  ;;  %2053 = vmatpush.bf16.msra.mxu3 %v1703_v1  ;;  %v1575_v47 = vmul.f32 %v4102_v35, %v3879_v56  ;;  %v1507_v56 = vmul.f32 %v4102_v35, %v3914_v63  ;;  %v1663_v50 = vpack.c.bf16 %v1203_v23, %v1199_v25 }
 0x183   : > { %2012 = vmatpush.bf16.msra.mxu0 %v1603_v3  ;;  %2026 = vmatpush.bf16.msra.mxu1 %v1635_v40  ;;  %v1367_v55 = vmul.f32 %v4053_v54, %v3944_v46  ;;  %v1371_v40 = vmul.f32 %v4053_v54, %v3946_v2  ;;  %v1695_v44 = vpack.c.bf16 %v1267_v8, %v1263_v30 }
 0x184   : > { %v1819_v58 = vpack.c.bf16 %v1515_v0, %v1511_v36  ;;  %v1431_v63 = vmul.f32 %v4053_v54, %v3948_v24  ;;  %v1435_v41 = vmul.f32 %v4053_v54, %v3954_v62  ;;  %v1851_v45 = vpack.c.bf16 %v1579_v10, %v1575_v47 }
 0x185   : > { %v1783_v29 = vpack.c.bf16 %v1443_v18, %v1439_v19  ;;  %v1815_v52 = vpack.c.bf16 %v1507_v56, %v1503_v28  ;;  %v1847_v1 = vpack.c.bf16 %v1571_v33, %v1567_v37  ;;  %v1747_v3 = vpack.c.bf16 %v1371_v40, %v1367_v55  ;;  %v5217_v55 = vld [vmem:[#allocation36_spill] sm:$0xff] }
 0x186   : > { %2040 = vmatpush.bf16.msra.mxu2 %v1667_v51  ;;  %2054 = vmatpush.bf16.msra.mxu3 %v1699_v16  ;;  %v1751_v51 = vpack.c.bf16 %v1379_v26, %v1375_v49  ;;  %v1495_v22 = vmul.f32 %v4102_v35, %v3944_v46  ;;  %v1499_v16 = vmul.f32 %v4102_v35, %v3946_v2 }
 0x187   : > { %2013 = vmatpush.bf16.msra.mxu0 %v1599_v60  ;;  %2027 = vmatpush.bf16.msra.mxu1 %v1631_v17  ;;  %v1779_v21 = vpack.c.bf16 %v1435_v41, %v1431_v63  ;;  %v1559_v60 = vmul.f32 %v4102_v35, %v3948_v24  ;;  %v1563_v17 = vmul.f32 %v4102_v35, %v3954_v62 }
 0x188   : > { %v1359_v61 = vmul.f32 %v4053_v54, %v3971_v15  ;;  %v1363_v25 = vmul.f32 %v4053_v54, %v3973_v11  ;;  %v1423_v46 = vmul.f32 %v4053_v54, %v3980_v7  ;;  %v1427_v2 = vmul.f32 %v4053_v54, %v3982_v31 }
 0x189   : > { %v1487_v24 = vmul.f32 %v4102_v35, %v3971_v15  ;;  %v1491_v62 = vmul.f32 %v4102_v35, %v3973_v11  ;;  %v1555_v23 = vmul.f32 %v4102_v35, %v3982_v31  ;;  %v1351_v30 = vmul.f32 %v4053_v54, %v3994_v14 }
 0x18a   : > { %2041 = vmatpush.bf16.msra.mxu2 %v1663_v50  ;;  %2055 = vmatpush.bf16.msra.mxu3 %v1695_v44  ;;  %v1355_v8 = vmul.f32 %v4053_v54, %v3996_v4  ;;  %v1811_v15 = vpack.c.bf16 %v1499_v16, %v1495_v22  ;;  %v1843_v11 = vpack.c.bf16 %v1563_v17, %v1559_v60  ;;  %v5218_v44 = vld [vmem:[#allocation37_spill] sm:$0xff]  ;;  %v4224_v60 = vld [vmem:[#allocation3 + $0x1a0] sm:$0xff] }
 0x18b   : > { %2062 = vmatpush.bf16.msrb.mxu0 %v1755_v27  ;;  %2076 = vmatpush.bf16.msrb.mxu1 %v1787_v34  ;;  %v1551_v27 = vmul.f32 %v4102_v35, %v3980_v7  ;;  %v1743_v7 = vpack.c.bf16 %v1363_v25, %v1359_v61  ;;  %v1775_v36 = vpack.c.bf16 %v1427_v2, %v1423_v46  ;;  %v4232_v2 = vld [vmem:[#allocation3 + $0x2d8] sm:$0xff] }
 0x18c   : > { %2014 = vmatmul.bf16.vlgmr.msra.gmra.mxu0 %v3804_v5  ;;  %2028 = vmatmul.bf16.vlgmr.msra.gmra.mxu1 %v3817_v43  ;;  %v1415_v31 = vmul.f32 %v4053_v54, %v3998_v13  ;;  %v1807_v0 = vpack.c.bf16 %v1491_v62, %v1487_v24  ;;  %v1739_v10 = vpack.c.bf16 %v1355_v8, %v1351_v30  ;;  %v4234_v24 = vld [vmem:[#allocation3 + $0x1b0] sm:$0xff] }
 0x18d   : > { %2042 = vmatmul.bf16.vlgmr.msra.gmra.mxu2 %v3821_v6  ;;  %2056 = vmatmul.bf16.vlgmr.msra.gmra.mxu3 %v3831_v53  ;;  %v1839_v47 = vpack.c.bf16 %v1555_v23, %v1551_v27  ;;  %v1419_v49 = vmul.f32 %v4053_v54, %v4006_v59  ;;  %v1479_v26 = vmul.f32 %v4102_v35, %v3994_v14 }
 0x18e   : > { %2090 = vmatpush.bf16.msrb.mxu2 %v1819_v58  ;;  %2104 = vmatpush.bf16.msrb.mxu3 %v1851_v45  ;;  %v1483_v19 = vmul.f32 %v4102_v35, %v3996_v4  ;;  %v1543_v18 = vmul.f32 %v4102_v35, %v3998_v13  ;;  %v1547_v28 = vmul.f32 %v4102_v35, %v4006_v59 }
 0x18f   : > { %2063 = vmatpush.bf16.msrb.mxu0 %v1751_v51  ;;  %2077 = vmatpush.bf16.msrb.mxu1 %v1783_v29  ;;  %v1343_v56 = vmul.f32 %v4053_v54, %v4020_v38  ;;  %v1347_v37 = vmul.f32 %v4053_v54, %v4022_v12  ;;  %v1407_v33 = vmul.f32 %v4053_v54, %v4028_v42  ;;  %v5221_v51 = vld [vmem:[#allocation28_spill] sm:$0xff]  ;;  %v5222_v29 = vld [vmem:[#allocation29_spill] sm:$0xff] }
 0x190   : > { %v1411_v14 = vmul.f32 %v4053_v54, %v4036_v57  ;;  %v1471_v4 = vmul.f32 %v4102_v35, %v4020_v38  ;;  %v1475_v13 = vmul.f32 %v4102_v35, %v4022_v12  ;;  %v1535_v59 = vmul.f32 %v4102_v35, %v4028_v42  ;;  %v5219_v38 = vld [vmem:[#allocation38_spill] sm:$0xff]  ;;  %v5220_v12 = vld [vmem:[#allocation39_spill] sm:$0xff] }
 0x191   : > { %v1539_v34 = vmul.f32 %v4102_v35, %v4036_v57  ;;  %v1771_v50 = vpack.c.bf16 %v1419_v49, %v1415_v31  ;;  %v1335_v40 = vmul.f32 %v4053_v54, %v5217_v55  ;;  %v1339_v58 = vmul.f32 %v4053_v54, %v5218_v44 }
 0x192   : > { %2091 = vmatpush.bf16.msrb.mxu2 %v1815_v52  ;;  %2105 = vmatpush.bf16.msrb.mxu3 %v1847_v1  ;;  %v1803_v63 = vpack.c.bf16 %v1483_v19, %v1479_v26  ;;  %v1399_v41 = vmul.f32 %v4053_v54, %v5219_v38  ;;  %v1403_v45 = vmul.f32 %v4053_v54, %v5220_v12  ;;  %v4217_v57 = vperm.slane %v5221_v51, 2  ;;  %v4428_v51 = vld [vmem:[#allocation3 + $0x2f0] sm:$0xff] }
 0x193   : > { %2064 = vmatpush.bf16.msrb.mxu0 %v1747_v3  ;;  %2078 = vmatpush.bf16.msrb.mxu1 %v1779_v21  ;;  %v1835_v42 = vpack.c.bf16 %v1547_v28, %v1543_v18  ;;  %v4220_v52 = vperm.slane %v5222_v29, 2  ;;  %v1735_v1 = vpack.c.bf16 %v1347_v37, %v1343_v56  ;;  %v1767_v3 = vpack.c.bf16 %v1411_v14, %v1407_v33  ;;  %v4222_v21 = vld [vmem:[#allocation3 + $0x318] sm:$0xff]  ;;  %v4274_v56 = vld [vmem:[#allocation3 + $0x348] sm:$0xff] }
 0x194   : > { %v1799_v22 = vpack.c.bf16 %v1475_v13, %v1471_v4  ;;  %v1831_v16 = vpack.c.bf16 %v1539_v34, %v1535_v59  ;;  %v1731_v17 = vpack.c.bf16 %v1339_v58, %v1335_v40  ;;  %v1463_v61 = vmul.f32 %v4102_v35, %v5217_v55  ;;  %v4284_v37 = vld [vmem:[#allocation3 + $0x148] sm:$0xff]  ;;  %v4286_v59 = vld [vmem:[#allocation3 + $0xb0] sm:$0xff]  ;;  %v4292_v58 = vld [vmem:[#allocation3 + $0x360] sm:$0xff]  ;;  %5233 = vst [vmem:[#allocation42_spill] sm:$0xff] %v4428_v51 }
 0x195   : > { %v1467_v25 = vmul.f32 %v4102_v35, %v5218_v44  ;;  %v1527_v46 = vmul.f32 %v4102_v35, %v5219_v38  ;;  %v1763_v62 = vpack.c.bf16 %v1403_v45, %v1399_v41  ;;  %v1531_v27 = vmul.f32 %v4102_v35, %v5220_v12  ;;  %v4290_v44 = vld [vmem:[#allocation3 + $0x3e8] sm:$0xff] }
 0x196   : > { %2092 = vmatpush.bf16.msrb.mxu2 %v1811_v15  ;;  %2106 = vmatpush.bf16.msrb.mxu3 %v1843_v11  ;;  %v1327_v23 = vmul.f32 %v4053_v54, %v4065_v20  ;;  %v1331_v30 = vmul.f32 %v4053_v54, %v4067_v39  ;;  %v1391_v8 = vmul.f32 %v4053_v54, %v4069_v32 }
 0x197   : > { %2065 = vmatpush.bf16.msrb.mxu0 %v1743_v7  ;;  %2079 = vmatpush.bf16.msrb.mxu1 %v1775_v36  ;;  %v1395_v15 = vmul.f32 %v4053_v54, %v4079_v48  ;;  %v1128_v11 = vmul.f32 %v4217_v57, %v4222_v21  ;;  %v1132_v7 = vmul.f32 %v4217_v57, %v4224_v60  ;;  %v4258_v54 = vld [vmem:[#allocation3 + $0x368] sm:$0xff] }
 0x198   : > { %v1192_v36 = vmul.f32 %v4217_v57, %v4232_v2  ;;  %v1196_v31 = vmul.f32 %v4217_v57, %v4234_v24  ;;  %v1519_v49 = vmul.f32 %v4102_v35, %v4069_v32  ;;  %v1523_v26 = vmul.f32 %v4102_v35, %v4079_v48 }
 0x199   : > { %v1256_v19 = vmul.f32 %v4220_v52, %v4222_v21  ;;  %v1795_v18 = vpack.c.bf16 %v1467_v25, %v1463_v61  ;;  %v1324_v28 = vmul.f32 %v4220_v52, %v4234_v24  ;;  %v1827_v32 = vpack.c.bf16 %v1531_v27, %v1527_v46  ;;  %v4324_v27 = vld [vmem:[#allocation3 + $0x168] sm:$0xff] }
 0x19a   : > { %2093 = vmatpush.bf16.msrb.mxu2 %v1807_v0  ;;  %2107 = vmatpush.bf16.msrb.mxu3 %v1839_v47  ;;  %v1455_v0 = vmul.f32 %v4102_v35, %v4065_v20  ;;  %v1459_v47 = vmul.f32 %v4102_v35, %v4067_v39  ;;  %v1260_v20 = vmul.f32 %v4220_v52, %v4224_v60 }
 0x19b   : > { %2066 = vmatpush.bf16.msrb.mxu0 %v1739_v10  ;;  %2080 = vmatpush.bf16.msrb.mxu1 %v1771_v50  ;;  %v4260_v10 = vld [vmem:[#allocation3 + $0x250] sm:$0xff]  ;;  %v1320_v39 = vmul.f32 %v4220_v52, %v4232_v2  ;;  %v4278_v35 = vmul.f32 %v4217_v57, %v4258_v54  ;;  %v1727_v33 = vpack.c.bf16 %v1331_v30, %v1327_v23  ;;  %v4326_v23 = vld [vmem:[#allocation3 + $0x20] sm:$0xff] }
 0x19c   : > { %v4282_v48 = vmul.f32 %v4217_v57, %v4260_v10  ;;  %v1759_v14 = vpack.c.bf16 %v1395_v15, %v1391_v8  ;;  %v1628_v4 = vpack.c.bf16 %v1132_v7, %v1128_v11  ;;  %v1660_v13 = vpack.c.bf16 %v1196_v31, %v1192_v36  ;;  %v5223_v31 = vld [vmem:[#allocation32_spill] sm:$0xff] }
 0x19d   : > { %v1791_v34 = vpack.c.bf16 %v1459_v47, %v1455_v0  ;;  %v1823_v50 = vpack.c.bf16 %v1523_v26, %v1519_v49  ;;  %v1692_v55 = vpack.c.bf16 %v1260_v20, %v1256_v19  ;;  %v1184_v40 = vmul.f32 %v4217_v57, %v4274_v56 }
 0x19e   : > { %2094 = vmatpush.bf16.msrb.mxu2 %v1803_v63  ;;  %2108 = vmatpush.bf16.msrb.mxu3 %v1835_v42  ;;  %v4294_v63 = vld [vmem:[#allocation3 + $0x2e8] sm:$0xff]  ;;  %v1724_v38 = vpack.c.bf16 %v1324_v28, %v1320_v39  ;;  %v1188_v41 = vmul.f32 %v4217_v57, %v4284_v37  ;;  %v1248_v12 = vmul.f32 %v4220_v52, %v4258_v54  ;;  %v4349_v39 = vld [vmem:[#allocation3 + $0x3b8] sm:$0xff] }
 0x19f   : > { %2067 = vmatpush.bf16.msrb.mxu0 %v1735_v1  ;;  %2081 = vmatpush.bf16.msrb.mxu1 %v1767_v3  ;;  %v1252_v45 = vmul.f32 %v4220_v52, %v4260_v10  ;;  %v1624_v42 = vpack.c.bf16 %v4282_v48, %v4278_v35  ;;  %v1312_v1 = vmul.f32 %v4220_v52, %v4274_v56  ;;  %v5224_v28 = vld [vmem:[#allocation33_spill] sm:$0xff] }
 0x1a0   : > { %v1316_v3 = vmul.f32 %v4220_v52, %v4284_v37  ;;  %v1116_v61 = vmul.f32 %v4217_v57, %v4290_v44  ;;  %v1176_v25 = vmul.f32 %v4217_v57, %v4292_v58  ;;  %v1180_v46 = vmul.f32 %v4217_v57, %v4294_v63 }
 0x1a1   : > { %v1244_v30 = vmul.f32 %v4220_v52, %v4290_v44  ;;  %v1304_v8 = vmul.f32 %v4220_v52, %v4292_v58  ;;  %v1308_v15 = vmul.f32 %v4220_v52, %v4294_v63  ;;  %v1656_v11 = vpack.c.bf16 %v1188_v41, %v1184_v40  ;;  %v5226_v40 = vld [vmem:[#allocation35_spill] sm:$0xff] }
 0x1a2   : > { %2095 = vmatpush.bf16.msrb.mxu2 %v1799_v22  ;;  %2109 = vmatpush.bf16.msrb.mxu3 %v1831_v16  ;;  %v1112_v22 = vmul.f32 %v4217_v57, %v4286_v59  ;;  %v4310_v16 = vld [vmem:[#allocation3 + $0x100] sm:$0xff]  ;;  %v1688_v0 = vpack.c.bf16 %v1252_v45, %v1248_v12  ;;  %v1168_v47 = vmul.f32 %v4217_v57, %v4324_v27 }
 0x1a3   : > { %2068 = vmatpush.bf16.msrb.mxu0 %v1731_v17  ;;  %2082 = vmatpush.bf16.msrb.mxu1 %v1763_v62  ;;  %v4312_v17 = vld [vmem:[#allocation3 + $0x298] sm:$0xff]  ;;  %v4322_v62 = vmul.f32 %v4220_v52, %v4286_v59  ;;  %v4336_v7 = vmul.f32 %v4217_v57, %v4310_v16  ;;  %v1172_v49 = vmul.f32 %v4217_v57, %v4326_v23 }
 0x1a4   : > { %v4340_v36 = vmul.f32 %v4217_v57, %v4312_v17  ;;  %v1720_v26 = vpack.c.bf16 %v1316_v3, %v1312_v1  ;;  %v1620_v19 = vpack.c.bf16 %v1116_v61, %v1112_v22  ;;  %v1652_v20 = vpack.c.bf16 %v1180_v46, %v1176_v25  ;;  %v4377_v1 = vld [vmem:[#allocation3 + $0x248] sm:$0xff]  ;;  %v4379_v3 = vld [vmem:[#allocation3 + $0x138] sm:$0xff] }
 0x1a5   : > { %v1684_v35 = vpack.c.bf16 %v1244_v30, %v4322_v62  ;;  %v1716_v48 = vpack.c.bf16 %v1308_v15, %v1304_v8  ;;  %v1300_v41 = vmul.f32 %v4220_v52, %v4326_v23  ;;  %v1100_v45 = vmul.f32 %v4217_v57, %v4349_v39  ;;  %5227 = vst [vmem:[#allocation36_spill] sm:$0xff] %v4377_v1 }
 0x1a6   : > { %2096 = vmatpush.bf16.msrb.mxu2 %v1795_v18  ;;  %2110 = vmatpush.bf16.msrb.mxu3 %v1827_v32  ;;  %v4347_v18 = vld [vmem:[#allocation3 + $0x258] sm:$0xff]  ;;  %v5225_v32 = vld [vmem:[#allocation34_spill] sm:$0xff]  ;;  %5228 = vst [vmem:[#allocation37_spill] sm:$0xff] %v4379_v3  ;;  %v1228_v46 = vmul.f32 %v4220_v52, %v4349_v39 }
 0x1a7   : > { %2069 = vmatpush.bf16.msrb.mxu0 %v1727_v33  ;;  %2083 = vmatpush.bf16.msrb.mxu1 %v1759_v14  ;;  %v1232_v33 = vmul.f32 %v4220_v52, %v4310_v16  ;;  %v4356_v14 = vld [vmem:[#allocation3 + $0x3a8] sm:$0xff]  ;;  %v1096_v12 = vmul.f32 %v4217_v57, %v4347_v18  ;;  %v1224_v25 = vmul.f32 %v4220_v52, %v4347_v18 }
 0x1a8   : > { %v1160_v22 = vmul.f32 %v4217_v57, %v4356_v14  ;;  %v1288_v62 = vmul.f32 %v4220_v52, %v4356_v14 }
 0x1aa   : > { %2097 = vmatpush.bf16.msrb.mxu2 %v1791_v34  ;;  %2111 = vmatpush.bf16.msrb.mxu3 %v1823_v50  ;;  %v1236_v34 = vmul.f32 %v4220_v52, %v4312_v17  ;;  %v1296_v50 = vmul.f32 %v4220_v52, %v4324_v27 }
 0x1ab   : > { %2118 = vmatpush.bf16.msra.mxu0 %v1628_v4  ;;  %2132 = vmatpush.bf16.msra.mxu1 %v1660_v13  ;;  %v4358_v4 = vld [vmem:[#allocation3 + $0x50] sm:$0xff]  ;;  %v1616_v13 = vpack.c.bf16 %v4340_v36, %v4336_v7  ;;  %v1156_v7 = vmul.f32 %v4217_v57, %v4379_v3 }
 0x1ac   : > { %2070 = vmatmul.bf16.vlgmr.msrb.gmra.mxu0 %v5223_v31  ;;  %2084 = vmatmul.bf16.vlgmr.msrb.gmra.mxu1 %v5224_v28  ;;  %v1164_v61 = vmul.f32 %v4217_v57, %v4358_v4  ;;  %v1292_v30 = vmul.f32 %v4220_v52, %v4358_v4  ;;  %v1680_v36 = vpack.c.bf16 %v1236_v34, %v1232_v33  ;;  %v4417_v33 = vld [vmem:[#allocation3 + $0x3f8] sm:$0xff]  ;;  %v4419_v34 = vld [vmem:[#allocation3 + $0xc0] sm:$0xff] }
 0x1ad   : > { %2098 = vmatmul.bf16.vlgmr.msrb.gmra.mxu2 %v5225_v32  ;;  %2112 = vmatmul.bf16.vlgmr.msrb.gmra.mxu3 %v5226_v40  ;;  %5229 = vst [vmem:[#allocation38_spill] sm:$0xff] %v4417_v33  ;;  %v4421_v40 = vld [vmem:[#allocation3 + $0x240] sm:$0xff]  ;;  %v1612_v32 = vpack.c.bf16 %v1100_v45, %v1096_v12  ;;  %v1676_v31 = vpack.c.bf16 %v1228_v46, %v1224_v25 }
 0x1ae   : > { %2146 = vmatpush.bf16.msra.mxu2 %v1692_v55  ;;  %2160 = vmatpush.bf16.msra.mxu3 %v1724_v38  ;;  %v4366_v55 = vld [vmem:[#allocation3 + $0x140] sm:$0xff]  ;;  %v1648_v38 = vpack.c.bf16 %v1172_v49, %v1168_v47  ;;  %v4411_v49 = vld [vmem:[#allocation3 + $0x2b0] sm:$0xff]  ;;  %5230 = vst [vmem:[#allocation39_spill] sm:$0xff] %v4419_v34  ;;  %v1644_v28 = vpack.c.bf16 %v1164_v61, %v1160_v22  ;;  %v4441_v22 = vld [vmem:[#allocation3 + $0x2f8] sm:$0xff] }
 0x1af   : > { %2119 = vmatpush.bf16.msra.mxu0 %v1624_v42  ;;  %2133 = vmatpush.bf16.msra.mxu1 %v1656_v11  ;;  %v4375_v42 = vld [vmem:[#allocation3 + $0x340] sm:$0xff]  ;;  %v4395_v8 = vmul.f32 %v4217_v57, %v4366_v55  ;;  %v1152_v11 = vmul.f32 %v4217_v57, %v4377_v1  ;;  %5231 = vst [vmem:[#allocation40_spill] sm:$0xff] %v4421_v40 }
 0x1b0   : > { %v1092_v15 = vmul.f32 %v4217_v57, %v4375_v42  ;;  %v4409_v47 = vmul.f32 %v4220_v52, %v4375_v42  ;;  %v1708_v29 = vpack.c.bf16 %v1292_v30, %v1288_v62  ;;  %v1148_v45 = vmul.f32 %v4217_v57, %v4421_v40  ;;  %5235 = vst [vmem:[#allocation43_spill] sm:$0xff] %v4441_v22  ;;  %v4443_v61 = vld [vmem:[#allocation3 + $0x160] sm:$0xff] }
 0x1b1   : > { %v1208_v46 = vmul.f32 %v4220_v52, %v4411_v49  ;;  %v1212_v62 = vmul.f32 %v4220_v52, %v4417_v33  ;;  %v4450_v30 = vperm.slane %v3692_v9, 2  ;;  %v1268_v9 = vmul.f32 %v4220_v52, %v4443_v61 }
 0x1b2   : > { %2147 = vmatpush.bf16.msra.mxu2 %v1688_v0  ;;  %2161 = vmatpush.bf16.msra.mxu3 %v1720_v26  ;;  %v4405_v0 = vmul.f32 %v4220_v52, %v4366_v55  ;;  %v1712_v26 = vpack.c.bf16 %v1300_v41, %v1296_v50  ;;  %v1080_v50 = vmul.f32 %v4217_v57, %v4411_v49  ;;  %v4426_v41 = vld [vmem:[#allocation3 + $0x350] sm:$0xff] }
 0x1b3   : > { %2120 = vmatpush.bf16.msra.mxu0 %v1620_v19  ;;  %2134 = vmatpush.bf16.msra.mxu1 %v1652_v20  ;;  %v1280_v19 = vmul.f32 %v4220_v52, %v4377_v1  ;;  %v1284_v20 = vmul.f32 %v4220_v52, %v4379_v3  ;;  %5232 = vst [vmem:[#allocation41_spill] sm:$0xff] %v4426_v41  ;;  %v5234_v3 = vld [vmem:[#allocation30_spill] sm:$0xff] }
 0x1b4   : > { %v4431_v1 = vperm.slane %v5234_v3, 2  ;;  %v1672_v12 = vpack.c.bf16 %v4409_v47, %v4405_v0  ;;  %v1140_v0 = vmul.f32 %v4217_v57, %v4443_v61 }
 0x1b5   : > { %v1704_v25 = vpack.c.bf16 %v1284_v20, %v1280_v19 }
 0x1b6   : > { %2148 = vmatpush.bf16.msra.mxu2 %v1684_v35  ;;  %2162 = vmatpush.bf16.msra.mxu3 %v1716_v48  ;;  %v1608_v35 = vpack.c.bf16 %v1092_v15, %v4395_v8  ;;  %v1640_v48 = vpack.c.bf16 %v1156_v7, %v1152_v11  ;;  %v1272_v8 = vmul.f32 %v4220_v52, %v4419_v34 }
 0x1b7   : > { %2121 = vmatpush.bf16.msra.mxu0 %v1616_v13  ;;  %2135 = vmatpush.bf16.msra.mxu1 %v1648_v38  ;;  %v1084_v13 = vmul.f32 %v4217_v57, %v4417_v33  ;;  %v1144_v38 = vmul.f32 %v4217_v57, %v4419_v34  ;;  %v1276_v15 = vmul.f32 %v4220_v52, %v4421_v40 }
 0x1b8   : > { %v1072_v11 = vmul.f32 %v4217_v57, %v4426_v41  ;;  %v1076_v7 = vmul.f32 %v4217_v57, %v4428_v51  ;;  %v1384_v47 = vmul.f32 %v4431_v1, %v4222_v21  ;;  %v1448_v19 = vmul.f32 %v4431_v1, %v4232_v2 }
 0x1b9   : > { %v1452_v20 = vmul.f32 %v4431_v1, %v4234_v24  ;;  %v1604_v3 = vpack.c.bf16 %v1084_v13, %v1080_v50  ;;  %v1636_v40 = vpack.c.bf16 %v1148_v45, %v1144_v38  ;;  %v1512_v34 = vmul.f32 %v4450_v30, %v4222_v21 }
 0x1ba   : > { %2149 = vmatpush.bf16.msra.mxu2 %v1680_v36  ;;  %2163 = vmatpush.bf16.msra.mxu3 %v1712_v26  ;;  %v1136_v36 = vmul.f32 %v4217_v57, %v4441_v22  ;;  %v1388_v26 = vmul.f32 %v4431_v1, %v4224_v60  ;;  %v1204_v57 = vmul.f32 %v4220_v52, %v4428_v51 }
 0x1bb   : > { %2122 = vmatpush.bf16.msra.mxu0 %v1612_v32  ;;  %2136 = vmatpush.bf16.msra.mxu1 %v1644_v28  ;;  %v1200_v28 = vmul.f32 %v4220_v52, %v4426_v41  ;;  %v1264_v32 = vmul.f32 %v4220_v52, %v4441_v22  ;;  %v1516_v33 = vmul.f32 %v4450_v30, %v4224_v60 }
 0x1bc   : > { %v1580_v22 = vmul.f32 %v4450_v30, %v4234_v24  ;;  %v1700_v51 = vpack.c.bf16 %v1276_v15, %v1272_v8  ;;  %v1600_v41 = vpack.c.bf16 %v1076_v7, %v1072_v11  ;;  %v1632_v52 = vpack.c.bf16 %v1140_v0, %v1136_v36 }
 0x1bd   : > { %v1756_v50 = vpack.c.bf16 %v1388_v26, %v1384_v47  ;;  %v1788_v13 = vpack.c.bf16 %v1452_v20, %v1448_v19  ;;  %v1664_v21 = vpack.c.bf16 %v1204_v57, %v1200_v28  ;;  %v1696_v38 = vpack.c.bf16 %v1268_v9, %v1264_v32 }
 0x1be   : > { %2150 = vmatpush.bf16.msra.mxu2 %v1676_v31  ;;  %2164 = vmatpush.bf16.msra.mxu3 %v1708_v29  ;;  %v1668_v29 = vpack.c.bf16 %v1212_v62, %v1208_v46  ;;  %v1576_v31 = vmul.f32 %v4450_v30, %v4232_v2  ;;  %v1820_v45 = vpack.c.bf16 %v1516_v33, %v1512_v34 }
 0x1bf   : > { %2123 = vmatpush.bf16.msra.mxu0 %v1608_v35  ;;  %2137 = vmatpush.bf16.msra.mxu1 %v1640_v48  ;;  %v1376_v60 = vmul.f32 %v4431_v1, %v4258_v54  ;;  %v1380_v35 = vmul.f32 %v4431_v1, %v4260_v10  ;;  %v1440_v2 = vmul.f32 %v4431_v1, %v4274_v56 }
 0x1c0   : > { %v1852_v24 = vpack.c.bf16 %v1580_v22, %v1576_v31  ;;  %v1444_v48 = vmul.f32 %v4431_v1, %v4284_v37  ;;  %v1508_v9 = vmul.f32 %v4450_v30, %v4260_v10  ;;  %v1568_v33 = vmul.f32 %v4450_v30, %v4274_v56 }
 0x1c1   : > { %v1572_v34 = vmul.f32 %v4450_v30, %v4284_v37  ;;  %v1436_v10 = vmul.f32 %v4431_v1, %v4294_v63  ;;  %v1496_v56 = vmul.f32 %v4450_v30, %v4286_v59  ;;  %v1500_v37 = vmul.f32 %v4450_v30, %v4290_v44 }
 0x1c2   : > { %2151 = vmatpush.bf16.msra.mxu2 %v1672_v12  ;;  %2165 = vmatpush.bf16.msra.mxu3 %v1704_v25  ;;  %v1504_v12 = vmul.f32 %v4450_v30, %v4258_v54  ;;  %v1432_v54 = vmul.f32 %v4431_v1, %v4292_v58  ;;  %v1560_v22 = vmul.f32 %v4450_v30, %v4292_v58 }
 0x1c3   : > { %2124 = vmatpush.bf16.msra.mxu0 %v1604_v3  ;;  %2138 = vmatpush.bf16.msra.mxu1 %v1636_v40  ;;  %v1368_v3 = vmul.f32 %v4431_v1, %v4286_v59  ;;  %v1372_v40 = vmul.f32 %v4431_v1, %v4290_v44  ;;  %v1752_v25 = vpack.c.bf16 %v1380_v35, %v1376_v60 }
 0x1c4   : > { %v1784_v46 = vpack.c.bf16 %v1444_v48, %v1440_v2  ;;  %v1816_v62 = vpack.c.bf16 %v1508_v9, %v1504_v12  ;;  %v1360_v8 = vmul.f32 %v4431_v1, %v4310_v16  ;;  %v1364_v59 = vmul.f32 %v4431_v1, %v4312_v17 }
 0x1c5   : > { %v1848_v44 = vpack.c.bf16 %v1572_v34, %v1568_v33  ;;  %v1748_v58 = vpack.c.bf16 %v1372_v40, %v1368_v3  ;;  %v1780_v15 = vpack.c.bf16 %v1436_v10, %v1432_v54  ;;  %v1424_v11 = vmul.f32 %v4431_v1, %v4324_v27  ;;  %v5238_v33 = vld [vmem:[#allocation28_spill] sm:$0xff] }
 0x1c6   : > { %2152 = vmatpush.bf16.msra.mxu2 %v1668_v29  ;;  %2166 = vmatpush.bf16.msra.mxu3 %v1700_v51  ;;  %v1564_v51 = vmul.f32 %v4450_v30, %v4294_v63  ;;  %v1812_v63 = vpack.c.bf16 %v1500_v37, %v1496_v56  ;;  %v1428_v7 = vmul.f32 %v4431_v1, %v4326_v23  ;;  %v4573_v34 = vperm.slane %v5238_v33, 3  ;;  %v5241_v10 = vld [vmem:[#allocation40_spill] sm:$0xff]  ;;  %v4585_v37 = vld [vmem:[#allocation3 + $0x288] sm:$0xff]  ;;  %v4694_v33 = vld [vmem:[#allocation3 + $0x3b0] sm:$0xff] }
 0x1c7   : > { %2125 = vmatpush.bf16.msra.mxu0 %v1600_v41  ;;  %2139 = vmatpush.bf16.msra.mxu1 %v1632_v52  ;;  %v1488_v36 = vmul.f32 %v4450_v30, %v4310_v16  ;;  %v1492_v0 = vmul.f32 %v4450_v30, %v4312_v17  ;;  %v1744_v47 = vpack.c.bf16 %v1364_v59, %v1360_v8  ;;  %v4603_v8 = vld [vmem:[#allocation3 + $0x200] sm:$0xff] }
 0x1c8   : > { %v1844_v41 = vpack.c.bf16 %v1564_v51, %v1560_v22  ;;  %v1552_v26 = vmul.f32 %v4450_v30, %v4324_v27  ;;  %v1556_v19 = vmul.f32 %v4450_v30, %v4326_v23  ;;  %v1352_v20 = vmul.f32 %v4431_v1, %v4347_v18  ;;  %v4587_v22 = vld [vmem:[#allocation3 + $0xc8] sm:$0xff] }
 0x1c9   : > { %v1356_v16 = vmul.f32 %v4431_v1, %v4349_v39  ;;  %v1416_v17 = vmul.f32 %v4431_v1, %v4356_v14  ;;  %v1420_v27 = vmul.f32 %v4431_v1, %v4358_v4  ;;  %v1480_v23 = vmul.f32 %v4450_v30, %v4347_v18 }
 0x1ca   : > { %2153 = vmatpush.bf16.msra.mxu2 %v1664_v21  ;;  %2167 = vmatpush.bf16.msra.mxu3 %v1696_v38  ;;  %v1484_v28 = vmul.f32 %v4450_v30, %v4349_v39  ;;  %v1544_v57 = vmul.f32 %v4450_v30, %v4356_v14  ;;  %v1548_v32 = vmul.f32 %v4450_v30, %v4358_v4 }
 0x1cb   : > { %2174 = vmatpush.bf16.msrb.mxu0 %v1756_v50  ;;  %2188 = vmatpush.bf16.msrb.mxu1 %v1788_v13  ;;  %v1344_v29 = vmul.f32 %v4431_v1, %v4366_v55  ;;  %v1348_v31 = vmul.f32 %v4431_v1, %v4375_v42  ;;  %v1776_v52 = vpack.c.bf16 %v1428_v7, %v1424_v11  ;;  %v5236_v50 = vld [vmem:[#allocation36_spill] sm:$0xff]  ;;  %v5237_v13 = vld [vmem:[#allocation37_spill] sm:$0xff] }
 0x1cc   : > { %2126 = vmatmul.bf16.vlgmr.msra.gmra.mxu0 %v3804_v5  ;;  %2140 = vmatmul.bf16.vlgmr.msra.gmra.mxu1 %v3817_v43  ;;  %v1408_v18 = vmul.f32 %v4431_v1, %v5236_v50  ;;  %v1412_v39 = vmul.f32 %v4431_v1, %v5237_v13  ;;  %v1808_v21 = vpack.c.bf16 %v1492_v0, %v1488_v36 }
 0x1cd   : > { %2154 = vmatmul.bf16.vlgmr.msra.gmra.mxu2 %v3821_v6  ;;  %2168 = vmatmul.bf16.vlgmr.msra.gmra.mxu3 %v3831_v53  ;;  %v1840_v14 = vpack.c.bf16 %v1556_v19, %v1552_v26  ;;  %v1740_v4 = vpack.c.bf16 %v1356_v16, %v1352_v20  ;;  %v1772_v38 = vpack.c.bf16 %v1420_v27, %v1416_v17  ;;  %v5245_v19 = vld [vmem:[#allocation29_spill] sm:$0xff] }
 0x1ce   : > { %2202 = vmatpush.bf16.msrb.mxu2 %v1820_v45  ;;  %2216 = vmatpush.bf16.msrb.mxu3 %v1852_v24  ;;  %v1804_v45 = vpack.c.bf16 %v1484_v28, %v1480_v23  ;;  %v1836_v60 = vpack.c.bf16 %v1548_v32, %v1544_v57  ;;  %v1736_v35 = vpack.c.bf16 %v1348_v31, %v1344_v29  ;;  %v1903_v27 = vpop.f32.mrf.mxu0 }
 0x1cf   : > { %2175 = vmatpush.bf16.msrb.mxu0 %v1752_v25  ;;  %2189 = vmatpush.bf16.msrb.mxu1 %v1784_v46  ;;  %v1472_v2 = vmul.f32 %v4450_v30, %v4366_v55  ;;  %v1476_v24 = vmul.f32 %v4450_v30, %v4375_v42  ;;  %v1768_v48 = vpack.c.bf16 %v1412_v39, %v1408_v18  ;;  %v5239_v55 = vld [vmem:[#allocation38_spill] sm:$0xff]  ;;  %v5240_v42 = vld [vmem:[#allocation39_spill] sm:$0xff] }
 0x1d0   : > { %v1536_v12 = vmul.f32 %v4450_v30, %v5236_v50  ;;  %v1540_v9 = vmul.f32 %v4450_v30, %v5237_v13  ;;  %v4577_v3 = vmul.f32 %v4431_v1, %v4411_v49  ;;  %v1340_v40 = vmul.f32 %v4431_v1, %v5239_v55  ;;  %v4660_v50 = vld [vmem:[#allocation3 + $0xa0] sm:$0xff]  ;;  %v4662_v18 = vld [vmem:[#allocation3 + $0x338] sm:$0xff] }
 0x1d1   : > { %v1400_v54 = vmul.f32 %v4431_v1, %v5240_v42  ;;  %v1404_v56 = vmul.f32 %v4431_v1, %v5241_v10  ;;  %v4591_v51 = vmul.f32 %v4450_v30, %v4411_v49  ;;  %v4595_v25 = vmul.f32 %v4450_v30, %v5239_v55  ;;  %v5243_v49 = vld [vmem:[#allocation42_spill] sm:$0xff]  ;;  %v4664_v13 = vld [vmem:[#allocation3 + $0x2a0] sm:$0xff]  ;;  %v1917_v39 = vpop.f32.mrf.mxu1 }
 0x1d2   : > { %2203 = vmatpush.bf16.msrb.mxu2 %v1816_v62  ;;  %2217 = vmatpush.bf16.msrb.mxu3 %v1848_v44  ;;  %v4599_v46 = vmul.f32 %v4450_v30, %v5240_v42  ;;  %v4601_v62 = vld [vmem:[#allocation3 + $0x2c8] sm:$0xff]  ;;  %v1532_v59 = vmul.f32 %v4450_v30, %v5241_v10  ;;  %v4621_v11 = vmul.f32 %v4431_v1, %v4443_v61 }
 0x1d3   : > { %2176 = vmatpush.bf16.msrb.mxu0 %v1748_v58  ;;  %2190 = vmatpush.bf16.msrb.mxu1 %v1780_v15  ;;  %v5242_v44 = vld [vmem:[#allocation41_spill] sm:$0xff]  ;;  %v4613_v15 = vmul.f32 %v4431_v1, %v5243_v49  ;;  %v4625_v7 = vmul.f32 %v4573_v34, %v4585_v37  ;;  %v4629_v36 = vmul.f32 %v4573_v34, %v4587_v22 }
 0x1d4   : > { %v4609_v58 = vmul.f32 %v4431_v1, %v5242_v44  ;;  %v1800_v0 = vpack.c.bf16 %v1476_v24, %v1472_v2  ;;  %v4637_v26 = vmul.f32 %v4573_v34, %v4603_v8  ;;  %v1832_v20 = vpack.c.bf16 %v1540_v9, %v1536_v12  ;;  %v4682_v24 = vld [vmem:[#allocation3 + $0x208] sm:$0xff] }
 0x1d5   : > { %v4644_v16 = vmul.f32 %v4450_v30, %v5242_v44  ;;  %v4648_v17 = vmul.f32 %v4450_v30, %v5243_v49  ;;  %v1732_v23 = vpack.c.bf16 %v1340_v40, %v4577_v3  ;;  %v1764_v28 = vpack.c.bf16 %v1404_v56, %v1400_v54  ;;  %v4696_v3 = vld [vmem:[#allocation3 + $0x58] sm:$0xff] }
 0x1d6   : > { %2204 = vmatpush.bf16.msrb.mxu2 %v1812_v63  ;;  %2218 = vmatpush.bf16.msrb.mxu3 %v1844_v41  ;;  %v5244_v63 = vld [vmem:[#allocation43_spill] sm:$0xff]  ;;  %v1796_v57 = vpack.c.bf16 %v4595_v25, %v4591_v51  ;;  %v1828_v32 = vpack.c.bf16 %v1532_v59, %v4599_v46  ;;  %v1728_v29 = vpack.c.bf16 %v4613_v15, %v4609_v58 }
 0x1d7   : > { %2177 = vmatpush.bf16.msrb.mxu0 %v1744_v47  ;;  %2191 = vmatpush.bf16.msrb.mxu1 %v1776_v52  ;;  %v4617_v41 = vmul.f32 %v4431_v1, %v5244_v63  ;;  %v4633_v47 = vmul.f32 %v4573_v34, %v4601_v62  ;;  %v4640_v1 = vperm.slane %v5245_v19, 3  ;;  %v1629_v52 = vpack.c.bf16 %v4629_v36, %v4625_v7  ;;  %v1931_v49 = vpop.f32.mrf.mxu2  ;;  %v4728_v36 = vld [vmem:[#allocation3 + $0x278] sm:$0xff] }
 0x1d8   : > { %v1125_v12 = vmul.f32 %v4573_v34, %v4662_v18  ;;  %v1185_v9 = vmul.f32 %v4573_v34, %v4664_v13  ;;  %v4714_v56 = vmul.f32 %v4573_v34, %v4682_v24  ;;  %v4722_v46 = vmul.f32 %v4573_v34, %v4694_v33 }
 0x1d9   : > { %v1760_v31 = vpack.c.bf16 %v4621_v11, %v4617_v41  ;;  %v1321_v2 = vmul.f32 %v4640_v1, %v4601_v62  ;;  %v1249_v40 = vmul.f32 %v4640_v1, %v4660_v50  ;;  %v1253_v42 = vmul.f32 %v4640_v1, %v4662_v18  ;;  %v1945_v11 = vpop.f32.mrf.mxu3 }
 0x1da   : > { %2205 = vmatpush.bf16.msrb.mxu2 %v1808_v21  ;;  %2219 = vmatpush.bf16.msrb.mxu3 %v1840_v14  ;;  %v1661_v21 = vpack.c.bf16 %v4637_v26, %v4633_v47  ;;  %v1520_v14 = vmul.f32 %v4450_v30, %v5244_v63  ;;  %v4706_v54 = vmul.f32 %v4640_v1, %v4664_v13  ;;  %v1905_v47 = vpop.f32.mrf.mxu0 }
 0x1db   : > { %2178 = vmatpush.bf16.msrb.mxu0 %v1740_v4  ;;  %2192 = vmatpush.bf16.msrb.mxu1 %v1772_v38  ;;  %v1524_v4 = vmul.f32 %v4450_v30, %v4443_v61  ;;  %v1257_v38 = vmul.f32 %v4640_v1, %v4585_v37  ;;  %v1325_v61 = vmul.f32 %v4640_v1, %v4603_v8 }
 0x1dc   : > { %v1121_v30 = vmul.f32 %v4573_v34, %v4660_v50  ;;  %v4726_v59 = vmul.f32 %v4573_v34, %v4696_v3  ;;  %v1918_v63 = vadd.f32 %v1917_v39, %v1903_v27  ;;  %v1689_v7 = vpack.c.bf16 %v1253_v42, %v1249_v40  ;;  %v4755_v39 = vld [vmem:[#allocation3 + $0x40] sm:$0xff] }
 0x1dd   : > { %v1824_v25 = vpack.c.bf16 %v1524_v4, %v1520_v14  ;;  %v1725_v58 = vpack.c.bf16 %v1325_v61, %v1321_v2  ;;  %v5248_v4 = vld [vmem:[#allocation33_spill] sm:$0xff]  ;;  %v4766_v2 = vld [vmem:[#allocation3 + $0x3e0] sm:$0xff]  ;;  %v5251_v61 = vld [vmem:[#allocation34_spill] sm:$0xff]  ;;  %v4782_v42 = vmul.f32 %v4573_v34, %v4755_v39 }
 0x1de   : > { %2206 = vmatpush.bf16.msrb.mxu2 %v1804_v45  ;;  %2220 = vmatpush.bf16.msrb.mxu3 %v1836_v60  ;;  %v4674_v45 = vld [vmem:[#allocation3 + $0xd0] sm:$0xff]  ;;  %v1792_v60 = vpack.c.bf16 %v4648_v17, %v4644_v16  ;;  %v1625_v15 = vpack.c.bf16 %v1125_v12, %v1121_v30  ;;  %v4740_v17 = vld [vmem:[#allocation3 + $0x80] sm:$0xff]  ;;  %v1653_v27 = vpack.c.bf16 %v4726_v59, %v4722_v46 }
 0x1df   : > { %2179 = vmatpush.bf16.msrb.mxu0 %v1736_v35  ;;  %2193 = vmatpush.bf16.msrb.mxu1 %v1768_v48  ;;  %v1261_v35 = vmul.f32 %v4640_v1, %v4587_v22  ;;  %v4684_v48 = vld [vmem:[#allocation3 + $0x380] sm:$0xff]  ;;  %v1189_v55 = vmul.f32 %v4573_v34, %v4674_v45  ;;  %v4710_v10 = vmul.f32 %v4640_v1, %v4674_v45  ;;  %v4738_v16 = vld [vmem:[#allocation3 + $0x330] sm:$0xff] }
 0x1e0   : > { %v4718_v51 = vmul.f32 %v4573_v34, %v4684_v48  ;;  %v1932_v14 = vadd.f32 %v1931_v49, %v1918_v63  ;;  %5250 = vst [vmem:[#allocation28_spill] sm:$0xff] %v4766_v2  ;;  %v1233_v30 = vmul.f32 %v4640_v1, %v4728_v36  ;;  %v1301_v40 = vmul.f32 %v4640_v1, %v4740_v17  ;;  %v1933_v49 = vpop.f32.mrf.mxu2 }
 0x1e1   : > { %v1693_v44 = vpack.c.bf16 %v1261_v35, %v1257_v38  ;;  %v1657_v41 = vpack.c.bf16 %v1189_v55, %v1185_v9  ;;  %v1721_v26 = vpack.c.bf16 %v4710_v10, %v4706_v54  ;;  %v1169_v38 = vmul.f32 %v4573_v34, %v4738_v16  ;;  %v4764_v35 = vld [vmem:[#allocation3 + $0x220] sm:$0xff]  ;;  %v5252_v55 = vld [vmem:[#allocation35_spill] sm:$0xff] }
 0x1e2   : > { %2207 = vmatpush.bf16.msrb.mxu2 %v1800_v0  ;;  %2221 = vmatpush.bf16.msrb.mxu3 %v1832_v20  ;;  %v4730_v0 = vld [vmem:[#allocation3 + $0x88] sm:$0xff]  ;;  %v1621_v19 = vpack.c.bf16 %v4718_v51, %v4714_v56  ;;  %v1241_v20 = vmul.f32 %v4640_v1, %v4682_v24  ;;  %5249 = vst [vmem:[#allocation37_spill] sm:$0xff] %v4764_v35 }
 0x1e3   : > { %2180 = vmatpush.bf16.msrb.mxu0 %v1732_v23  ;;  %2194 = vmatpush.bf16.msrb.mxu1 %v1764_v28  ;;  %v1245_v23 = vmul.f32 %v4640_v1, %v4684_v48  ;;  %v1305_v28 = vmul.f32 %v4640_v1, %v4694_v33  ;;  %v1237_v12 = vmul.f32 %v4640_v1, %v4730_v0 }
 0x1e4   : > { %v4775_v9 = vmul.f32 %v4640_v1, %v4738_v16  ;;  %v4788_v56 = vmul.f32 %v4573_v34, %v4764_v35  ;;  %v4792_v51 = vmul.f32 %v4573_v34, %v4766_v2  ;;  %v4796_v59 = vmul.f32 %v4640_v1, %v4755_v39 }
 0x1e5   : > { %v1685_v10 = vpack.c.bf16 %v1245_v23, %v1241_v20  ;;  %v1681_v20 = vpack.c.bf16 %v1237_v12, %v1233_v30 }
 0x1e6   : > { %2208 = vmatpush.bf16.msrb.mxu2 %v1796_v57  ;;  %2222 = vmatpush.bf16.msrb.mxu3 %v1828_v32  ;;  %v5246_v57 = vld [vmem:[#allocation32_spill] sm:$0xff]  ;;  %v1919_v32 = vpop.f32.mrf.mxu1  ;;  %v1713_v23 = vpack.c.bf16 %v1301_v40, %v4775_v9  ;;  %v4832_v40 = vld [vmem:[#allocation3 + $0x1f8] sm:$0xff] }
 0x1e7   : > { %2181 = vmatpush.bf16.msrb.mxu0 %v1728_v29  ;;  %2195 = vmatpush.bf16.msrb.mxu1 %v1760_v31  ;;  %v1309_v29 = vmul.f32 %v4640_v1, %v4696_v3  ;;  %v1105_v31 = vmul.f32 %v4573_v34, %v4728_v36  ;;  %v4830_v9 = vld [vmem:[#allocation3 + $0x260] sm:$0xff]  ;;  %5260 = vst [vmem:[#allocation44_spill] sm:$0xff] %v4832_v40 }
 0x1e8   : > { %5259 = vst [vmem:[#allocation29_spill] sm:$0xff] %v4830_v9 }
 0x1e9   : > { %v1717_v46 = vpack.c.bf16 %v1309_v29, %v1305_v28  ;;  %v4810_v29 = vld [vmem:[#allocation3 + $0x128] sm:$0xff] }
 0x1ea   : > { %2209 = vmatpush.bf16.msrb.mxu2 %v1792_v60  ;;  %2223 = vmatpush.bf16.msrb.mxu3 %v1824_v25  ;;  %v1173_v60 = vmul.f32 %v4573_v34, %v4740_v17  ;;  %v1946_v25 = vadd.f32 %v1945_v11, %v1932_v14  ;;  %v1920_v11 = vadd.f32 %v1919_v32, %v1905_v47  ;;  %v1959_v14 = vpop.f32.mrf.mxu0  ;;  %v4820_v32 = vld [vmem:[#allocation3 + $0x358] sm:$0xff] }
 0x1eb   : > { %2230 = vmatpush.bf16.msra.mxu0 %v1629_v52  ;;  %2244 = vmatpush.bf16.msra.mxu1 %v1661_v21  ;;  %v1109_v52 = vmul.f32 %v4573_v34, %v4730_v0  ;;  %v4757_v21 = vld [vmem:[#allocation3 + $0x1f0] sm:$0xff]  ;;  %5256 = vst [vmem:[#allocation41_spill] sm:$0xff] %v4810_v29  ;;  %v1293_v47 = vmul.f32 %v4640_v1, %v4766_v2 }
 0x1ec   : > { %2182 = vmatmul.bf16.vlgmr.msrb.gmra.mxu0 %v5246_v57  ;;  %5247 = vst [vmem:[#allocation36_spill] sm:$0xff] %v4757_v21  ;;  %2196 = vmatmul.bf16.vlgmr.msrb.gmra.mxu1 %v5248_v4  ;;  %v1101_v54 = vmul.f32 %v4573_v34, %v4757_v21  ;;  %v1649_v63 = vpack.c.bf16 %v1173_v60, %v1169_v38 }
 0x1ed   : > { %2210 = vmatmul.bf16.vlgmr.msrb.gmra.mxu2 %v5251_v61  ;;  %2224 = vmatmul.bf16.vlgmr.msrb.gmra.mxu3 %v5252_v55  ;;  %5257 = vst [vmem:[#allocation42_spill] sm:$0xff] %v4820_v32  ;;  %v1960_v38 = vadd.f32 %v1959_v14, %v1946_v25  ;;  %v1934_v25 = vadd.f32 %v1933_v49, %v1920_v11  ;;  %v4850_v14 = vld [vmem:[#allocation3 + $0x120] sm:$0xff] }
 0x1ee   : > { %2258 = vmatpush.bf16.msra.mxu2 %v1693_v44  ;;  %2272 = vmatpush.bf16.msra.mxu3 %v1725_v58  ;;  %v4800_v44 = vmul.f32 %v4640_v1, %v4757_v21  ;;  %v4802_v58 = vld [vmem:[#allocation3 + $0x3c0] sm:$0xff]  ;;  %v1613_v28 = vpack.c.bf16 %v1101_v54, %v4782_v42  ;;  %v1973_v42 = vpop.f32.mrf.mxu1  ;;  %v1157_v54 = vmul.f32 %v4573_v34, %v4810_v29 }
 0x1ef   : > { %2231 = vmatpush.bf16.msra.mxu0 %v1625_v15  ;;  %2245 = vmatpush.bf16.msra.mxu1 %v1657_v41  ;;  %5253 = vst [vmem:[#allocation38_spill] sm:$0xff] %v4802_v58  ;;  %v1617_v15 = vpack.c.bf16 %v1109_v52, %v1105_v31  ;;  %v4804_v41 = vld [vmem:[#allocation3 + $0x110] sm:$0xff]  ;;  %v1289_v31 = vmul.f32 %v4640_v1, %v4764_v35  ;;  %v4822_v52 = vld [vmem:[#allocation3 + $0x2b8] sm:$0xff] }
 0x1f0   : > { %5254 = vst [vmem:[#allocation39_spill] sm:$0xff] %v4804_v41  ;;  %v1677_v60 = vpack.c.bf16 %v4800_v44, %v4796_v59  ;;  %v1093_v30 = vmul.f32 %v4573_v34, %v4804_v41  ;;  %v1081_v59 = vmul.f32 %v4573_v34, %v4820_v32  ;;  %v1085_v44 = vmul.f32 %v4573_v34, %v4822_v52 }
 0x1f1   : > { %5258 = vst [vmem:[#allocation43_spill] sm:$0xff] %v4822_v52  ;;  %v4854_v55 = vmul.f32 %v4573_v34, %v4830_v9  ;;  %v1149_v49 = vmul.f32 %v4573_v34, %v4832_v40  ;;  %v4864_v11 = vmul.f32 %v4640_v1, %v4822_v52  ;;  %v1974_v61 = vadd.f32 %v1973_v42, %v1960_v38 }
 0x1f2   : > { %2259 = vmatpush.bf16.msra.mxu2 %v1689_v7  ;;  %2273 = vmatpush.bf16.msra.mxu3 %v1721_v26  ;;  %v4806_v7 = vld [vmem:[#allocation3 + $0x170] sm:$0xff]  ;;  %v1947_v26 = vpop.f32.mrf.mxu3  ;;  %v1709_v4 = vpack.c.bf16 %v1293_v47, %v1289_v31  ;;  %v4872_v57 = vmul.f32 %v4640_v1, %v4832_v40  ;;  %v4880_v52 = vmul.f32 %v4573_v34, %v4850_v14 }
 0x1f3   : > { %2232 = vmatpush.bf16.msra.mxu0 %v1621_v19  ;;  %5255 = vst [vmem:[#allocation40_spill] sm:$0xff] %v4806_v7  ;;  %2246 = vmatpush.bf16.msra.mxu1 %v1653_v27  ;;  %v1645_v19 = vpack.c.bf16 %v4792_v51, %v4788_v56  ;;  %v1089_v27 = vmul.f32 %v4573_v34, %v4802_v58  ;;  %v4884_v31 = vld [vmem:[#allocation3 + $0x10] sm:$0xff] }
 0x1f4   : > { %v1153_v12 = vmul.f32 %v4573_v34, %v4806_v7  ;;  %v1221_v56 = vmul.f32 %v4640_v1, %v4804_v41  ;;  %v1281_v51 = vmul.f32 %v4640_v1, %v4806_v7  ;;  %v5261_v47 = vld [vmem:[#allocation30_spill] sm:$0xff]  ;;  %v1948_v42 = vadd.f32 %v1947_v26, %v1934_v25  ;;  %v1987_v7 = vpop.f32.mrf.mxu2 }
 0x1f5   : > { %v4887_v38 = vperm.slane %v5261_v47, 3  ;;  %v1637_v2 = vpack.c.bf16 %v1149_v49, %v4854_v55  ;;  %v1988_v47 = vadd.f32 %v1987_v7, %v1974_v61 }
 0x1f6   : > { %2260 = vmatpush.bf16.msra.mxu2 %v1685_v10  ;;  %2274 = vmatpush.bf16.msra.mxu3 %v1717_v46  ;;  %v1217_v10 = vmul.f32 %v4640_v1, %v4802_v58  ;;  %v1285_v46 = vmul.f32 %v4640_v1, %v4810_v29  ;;  %v1609_v29 = vpack.c.bf16 %v1093_v30, %v1089_v27  ;;  %v5262_v27 = vld [vmem:[#allocation31_spill] sm:$0xff] }
 0x1f7   : > { %2233 = vmatpush.bf16.msra.mxu0 %v1617_v15  ;;  %2247 = vmatpush.bf16.msra.mxu1 %v1649_v63  ;;  %v4848_v15 = vld [vmem:[#allocation3 + $0xe0] sm:$0xff]  ;;  %v4860_v63 = vmul.f32 %v4640_v1, %v4820_v32  ;;  %v1641_v40 = vpack.c.bf16 %v1157_v54, %v1153_v12  ;;  %v4890_v30 = vperm.slane %v5262_v27, 3  ;;  %v1605_v58 = vpack.c.bf16 %v1085_v44, %v1081_v59  ;;  %v1582_v12 = vld [vmem:[#allocation2 + $0x30] sm:$0xff] }
 0x1f8   : > { %v4876_v32 = vmul.f32 %v4573_v34, %v4848_v15  ;;  %v1705_v41 = vpack.c.bf16 %v1285_v46, %v1281_v51  ;;  %v1385_v54 = vmul.f32 %v4887_v38, %v4585_v37  ;;  %v1377_v46 = vmul.f32 %v4887_v38, %v4660_v50 }
 0x1f9   : > { %v1669_v35 = vpack.c.bf16 %v4864_v11, %v4860_v63  ;;  %v1577_v51 = vmul.f32 %v4890_v30, %v4601_v62  ;;  %v1581_v25 = vmul.f32 %v4890_v30, %v4603_v8  ;;  %v1505_v49 = vmul.f32 %v4890_v30, %v4660_v50 }
 0x1fa   : > { %2261 = vmatpush.bf16.msra.mxu2 %v1681_v20  ;;  %2275 = vmatpush.bf16.msra.mxu3 %v1713_v23  ;;  %v4868_v20 = vmul.f32 %v4640_v1, %v4830_v9  ;;  %v4882_v23 = vld [vmem:[#allocation3 + $0x230] sm:$0xff]  ;;  %v1961_v9 = vpop.f32.mrf.mxu0  ;;  %v2001_v21 = vpop.f32.mrf.mxu3  ;;  %v1601_v55 = vpack.c.bf16 %v4880_v52, %v4876_v32  ;;  %v1205_v32 = vmul.f32 %v4640_v1, %v4850_v14 }
 0x1fb   : > { %2234 = vmatpush.bf16.msra.mxu0 %v1613_v28  ;;  %2248 = vmatpush.bf16.msra.mxu1 %v1645_v19  ;;  %v1673_v28 = vpack.c.bf16 %v1221_v56, %v1217_v10  ;;  %v1137_v19 = vmul.f32 %v4573_v34, %v4882_v23  ;;  %v1962_v61 = vadd.f32 %v1961_v9, %v1948_v42  ;;  %v1975_v10 = vpop.f32.mrf.mxu1 }
 0x1fc   : > { %v1701_v26 = vpack.c.bf16 %v4872_v57, %v4868_v20  ;;  %v1449_v57 = vmul.f32 %v4887_v38, %v4601_v62  ;;  %v2002_v7 = vadd.f32 %v2001_v21, %v1988_v47  ;;  %v1265_v52 = vmul.f32 %v4640_v1, %v4882_v23 }
 0x1fd   : > { %v1269_v56 = vmul.f32 %v4640_v1, %v4884_v31  ;;  %v1513_v21 = vmul.f32 %v4890_v30, %v4585_v37  ;;  %v1441_v37 = vmul.f32 %v4887_v38, %v4664_v13  ;;  %v1509_v63 = vmul.f32 %v4890_v30, %v4662_v18 }
 0x1fe   : > { %2262 = vmatpush.bf16.msra.mxu2 %v1677_v60  ;;  %2276 = vmatpush.bf16.msra.mxu3 %v1709_v4  ;;  %v1141_v60 = vmul.f32 %v4573_v34, %v4884_v31  ;;  %v1389_v4 = vmul.f32 %v4887_v38, %v4587_v22  ;;  %v1453_v34 = vmul.f32 %v4887_v38, %v4603_v8  ;;  %v1989_v8 = vpop.f32.mrf.mxu2 }
 0x1ff   : > { %2235 = vmatpush.bf16.msra.mxu0 %v1609_v29  ;;  %2249 = vmatpush.bf16.msra.mxu1 %v1641_v40  ;;  %v1201_v29 = vmul.f32 %v4640_v1, %v4848_v15  ;;  %v2342_v9 = vadd.f32 %v2002_v7, %v1582_v12  ;;  %v1517_v40 = vmul.f32 %v4890_v30, %v4587_v22 }
 0x200   : > { %v1381_v1 = vmul.f32 %v4887_v38, %v4662_v18  ;;  %v1976_v22 = vadd.f32 %v1975_v10, %v1962_v61  ;;  %v1633_v62 = vpack.c.bf16 %v1141_v60, %v1137_v19  ;;  %v1757_v59 = vpack.c.bf16 %v1389_v4, %v1385_v54 }
 0x201   : > { %2350 = vst [vmem:[#allocation2 + $0x30] sm:$0xff] %v2342_v9  ;;  %v1665_v44 = vpack.c.bf16 %v1205_v32, %v1201_v29  ;;  %v1697_v42 = vpack.c.bf16 %v1269_v56, %v1265_v52  ;;  %v1853_v27 = vpack.c.bf16 %v1581_v25, %v1577_v51  ;;  %v1573_v60 = vmul.f32 %v4890_v30, %v4674_v45  ;;  %v5265_v51 = vld [vmem:[#allocation28_spill] sm:$0xff] }
 0x202   : > { %2263 = vmatpush.bf16.msra.mxu2 %v1673_v28  ;;  %2277 = vmatpush.bf16.msra.mxu3 %v1705_v41  ;;  %v1445_v41 = vmul.f32 %v4887_v38, %v4674_v45  ;;  %v1990_v11 = vadd.f32 %v1989_v8, %v1976_v22  ;;  %v2003_v20 = vpop.f32.mrf.mxu3  ;;  %v1821_v28 = vpack.c.bf16 %v1517_v40, %v1513_v21  ;;  %v5264_v40 = vld [vmem:[#allocation37_spill] sm:$0xff]  ;;  %v5267_v8 = vld [vmem:[#allocation39_spill] sm:$0xff] }
 0x203   : > { %2236 = vmatpush.bf16.msra.mxu0 %v1605_v58  ;;  %2250 = vmatpush.bf16.msra.mxu1 %v1637_v2  ;;  %v1789_v58 = vpack.c.bf16 %v1453_v34, %v1449_v57  ;;  %v1586_v2 = vld [vmem:[#allocation2 + $0x8] sm:$0xff]  ;;  %v1753_v47 = vpack.c.bf16 %v1381_v1, %v1377_v46  ;;  %v1369_v18 = vmul.f32 %v4887_v38, %v4682_v24 }
 0x204   : > { %v1785_v19 = vpack.c.bf16 %v1445_v41, %v1441_v37  ;;  %v2004_v50 = vadd.f32 %v2003_v20, %v1990_v11  ;;  %v1817_v12 = vpack.c.bf16 %v1509_v63, %v1505_v49  ;;  %v1497_v45 = vmul.f32 %v4890_v30, %v4682_v24  ;;  %v5269_v63 = vld [vmem:[#allocation41_spill] sm:$0xff] }
 0x205   : > { %v1501_v4 = vmul.f32 %v4890_v30, %v4684_v48  ;;  %v1561_v61 = vmul.f32 %v4890_v30, %v4694_v33  ;;  %v1565_v7 = vmul.f32 %v4890_v30, %v4696_v3  ;;  %v1361_v24 = vmul.f32 %v4887_v38, %v4728_v36 }
 0x206   : > { %2264 = vmatpush.bf16.msra.mxu2 %v1669_v35  ;;  %2278 = vmatpush.bf16.msra.mxu3 %v1701_v26  ;;  %v1569_v35 = vmul.f32 %v4890_v30, %v4664_v13  ;;  %v1373_v26 = vmul.f32 %v4887_v38, %v4684_v48  ;;  %v1437_v13 = vmul.f32 %v4887_v38, %v4696_v3 }
 0x207   : > { %2237 = vmatpush.bf16.msra.mxu0 %v1601_v55  ;;  %2251 = vmatpush.bf16.msra.mxu1 %v1633_v62  ;;  %v1433_v55 = vmul.f32 %v4887_v38, %v4694_v33  ;;  %v2346_v54 = vadd.f32 %v2004_v50, %v1586_v2  ;;  %v1365_v48 = vmul.f32 %v4887_v38, %v4730_v0  ;;  %v5266_v62 = vld [vmem:[#allocation38_spill] sm:$0xff]  ;;  %v5271_v50 = vld [vmem:[#allocation43_spill] sm:$0xff] }
 0x208   : > { %v1849_v57 = vpack.c.bf16 %v1573_v60, %v1569_v35  ;;  %v1749_v34 = vpack.c.bf16 %v1373_v26, %v1369_v18  ;;  %v1425_v33 = vmul.f32 %v4887_v38, %v4738_v16  ;;  %v1813_v3 = vpack.c.bf16 %v1501_v4, %v1497_v45  ;;  %v5270_v35 = vld [vmem:[#allocation42_spill] sm:$0xff] }
 0x209   : > { %2354 = vst [vmem:[#allocation2 + $0x8] sm:$0xff] %v2346_v54  ;;  %v1781_v29 = vpack.c.bf16 %v1437_v13, %v1433_v55  ;;  %v1493_v10 = vmul.f32 %v4890_v30, %v4730_v0  ;;  %v1845_v32 = vpack.c.bf16 %v1565_v7, %v1561_v61  ;;  %v1557_v52 = vmul.f32 %v4890_v30, %v4740_v17  ;;  %v5273_v13 = vld [vmem:[#allocation44_spill] sm:$0xff]  ;;  %v2015_v7 = vpop.f32.mrf.mxu0 }
 0x20a   : > { %2265 = vmatpush.bf16.msra.mxu2 %v1665_v44  ;;  %2279 = vmatpush.bf16.msra.mxu3 %v1697_v42  ;;  %v1745_v56 = vpack.c.bf16 %v1365_v48, %v1361_v24  ;;  %v1353_v21 = vmul.f32 %v4887_v38, %v4755_v39  ;;  %v1417_v0 = vmul.f32 %v4887_v38, %v5264_v40  ;;  %v5268_v44 = vld [vmem:[#allocation40_spill] sm:$0xff] }
 0x20b   : > { %2286 = vmatpush.bf16.msrb.mxu0 %v1757_v59  ;;  %2300 = vmatpush.bf16.msrb.mxu1 %v1789_v58  ;;  %v1421_v25 = vmul.f32 %v4887_v38, %v5265_v51  ;;  %v1545_v37 = vmul.f32 %v4890_v30, %v5264_v40  ;;  %v1549_v41 = vmul.f32 %v4890_v30, %v5265_v51 }
 0x20c   : > { %2238 = vmatmul.bf16.vlgmr.msra.gmra.mxu0 %v3804_v5  ;;  %v1429_v5 = vmul.f32 %v4887_v38, %v4740_v17  ;;  %2252 = vmatmul.bf16.vlgmr.msra.gmra.mxu1 %v3817_v43  ;;  %v5263_v43 = vld [vmem:[#allocation36_spill] sm:$0xff]  ;;  %v1481_v17 = vmul.f32 %v4890_v30, %v4755_v39  ;;  %v1345_v59 = vmul.f32 %v4887_v38, %v5266_v62 }
 0x20d   : > { %2266 = vmatmul.bf16.vlgmr.msra.gmra.mxu2 %v3821_v6  ;;  %2280 = vmatmul.bf16.vlgmr.msra.gmra.mxu3 %v3831_v53  ;;  %v1489_v6 = vmul.f32 %v4890_v30, %v4728_v36  ;;  %v1553_v53 = vmul.f32 %v4890_v30, %v4738_v16  ;;  %v1357_v9 = vmul.f32 %v4887_v38, %v5263_v43 }
 0x20e   : > { %2314 = vmatpush.bf16.msrb.mxu2 %v1821_v28  ;;  %2328 = vmatpush.bf16.msrb.mxu3 %v1853_v27  ;;  %v1777_v36 = vpack.c.bf16 %v1429_v5, %v1425_v33  ;;  %v1485_v46 = vmul.f32 %v4890_v30, %v5263_v43  ;;  %v1349_v58 = vmul.f32 %v4887_v38, %v5267_v8 }
 0x20f   : > { %2287 = vmatpush.bf16.msrb.mxu0 %v1753_v47  ;;  %2301 = vmatpush.bf16.msrb.mxu1 %v1785_v19  ;;  %v1809_v16 = vpack.c.bf16 %v1493_v10, %v1489_v6  ;;  %v1841_v1 = vpack.c.bf16 %v1557_v52, %v1553_v53  ;;  %v1741_v22 = vpack.c.bf16 %v1357_v9, %v1353_v21 }
 0x210   : > { %v1773_v39 = vpack.c.bf16 %v1421_v25, %v1417_v0  ;;  %v1409_v49 = vmul.f32 %v4887_v38, %v5268_v44  ;;  %v1413_v11 = vmul.f32 %v4887_v38, %v5269_v63  ;;  %v1805_v20 = vpack.c.bf16 %v1485_v46, %v1481_v17  ;;  %v2057_v51 = vpop.f32.mrf.mxu3  ;;  %v5277_v17 = vld [vmem:[#allocation35_spill] sm:$0xff] }
 0x211   : > { %v1473_v42 = vmul.f32 %v4890_v30, %v5266_v62  ;;  %v1477_v28 = vmul.f32 %v4890_v30, %v5267_v8  ;;  %v1837_v27 = vpack.c.bf16 %v1549_v41, %v1545_v37  ;;  %v1537_v2 = vmul.f32 %v4890_v30, %v5268_v44 }
 0x212   : > { %2315 = vmatpush.bf16.msrb.mxu2 %v1817_v12  ;;  %2329 = vmatpush.bf16.msrb.mxu3 %v1849_v57  ;;  %v1541_v47 = vmul.f32 %v4890_v30, %v5269_v63  ;;  %v1737_v19 = vpack.c.bf16 %v1349_v58, %v1345_v59  ;;  %v1337_v60 = vmul.f32 %v4887_v38, %v5270_v35  ;;  %v5272_v12 = vld [vmem:[#allocation29_spill] sm:$0xff] }
 0x213   : > { %2288 = vmatpush.bf16.msrb.mxu0 %v1749_v34  ;;  %2302 = vmatpush.bf16.msrb.mxu1 %v1781_v29  ;;  %v1341_v18 = vmul.f32 %v4887_v38, %v5271_v50  ;;  %v1769_v26 = vpack.c.bf16 %v1413_v11, %v1409_v49  ;;  %v1401_v55 = vmul.f32 %v4887_v38, %v5272_v12  ;;  %v1583_v11 = vld [vmem:[#allocation2] sm:$0xff] }
 0x214   : > { %v1405_v54 = vmul.f32 %v4887_v38, %v5273_v13  ;;  %v1801_v45 = vpack.c.bf16 %v1477_v28, %v1473_v42  ;;  %v1465_v4 = vmul.f32 %v4890_v30, %v5270_v35  ;;  %v1469_v57 = vmul.f32 %v4890_v30, %v5271_v50 }
 0x215   : > { %v1833_v61 = vpack.c.bf16 %v1541_v47, %v1537_v2  ;;  %v1529_v34 = vmul.f32 %v4890_v30, %v5272_v12  ;;  %v1533_v24 = vmul.f32 %v4890_v30, %v5273_v13  ;;  %v1733_v48 = vpack.c.bf16 %v1341_v18, %v1337_v60  ;;  %v1587_v60 = vld [vmem:[#allocation2 + $0x20] sm:$0xff] }
 0x216   : > { %2316 = vmatpush.bf16.msrb.mxu2 %v1813_v3  ;;  %2330 = vmatpush.bf16.msrb.mxu3 %v1845_v32  ;;  %v1329_v29 = vmul.f32 %v4887_v38, %v4848_v15  ;;  %v1333_v33 = vmul.f32 %v4887_v38, %v4850_v14  ;;  %v1765_v5 = vpack.c.bf16 %v1405_v54, %v1401_v55  ;;  %v2029_v3 = vpop.f32.mrf.mxu1 }
 0x217   : > { %2289 = vmatpush.bf16.msrb.mxu0 %v1745_v56  ;;  %2303 = vmatpush.bf16.msrb.mxu1 %v1777_v36  ;;  %v1393_v6 = vmul.f32 %v4887_v38, %v4882_v23  ;;  %v1397_v10 = vmul.f32 %v4887_v38, %v4884_v31  ;;  %v1797_v32 = vpack.c.bf16 %v1469_v57, %v1465_v4 }
 0x218   : > { %v1457_v53 = vmul.f32 %v4890_v30, %v4848_v15  ;;  %v1461_v52 = vmul.f32 %v4890_v30, %v4850_v14  ;;  %v1829_v56 = vpack.c.bf16 %v1533_v24, %v1529_v34  ;;  %v1521_v21 = vmul.f32 %v4890_v30, %v4882_v23  ;;  %v2043_v15 = vpop.f32.mrf.mxu2  ;;  %v2017_v14 = vpop.f32.mrf.mxu0  ;;  %v5274_v23 = vld [vmem:[#allocation32_spill] sm:$0xff] }
 0x219   : > { %v1525_v43 = vmul.f32 %v4890_v30, %v4884_v31  ;;  %v1729_v9 = vpack.c.bf16 %v1333_v33, %v1329_v29  ;;  %v1761_v38 = vpack.c.bf16 %v1397_v10, %v1393_v6  ;;  %v2030_v0 = vadd.f32 %v2029_v3, %v2015_v7  ;;  %v5275_v31 = vld [vmem:[#allocation33_spill] sm:$0xff] }
 0x21a   : > { %2317 = vmatpush.bf16.msrb.mxu2 %v1809_v16  ;;  %2331 = vmatpush.bf16.msrb.mxu3 %v1841_v1  ;;  %v1793_v36 = vpack.c.bf16 %v1461_v52, %v1457_v53  ;;  %v5276_v16 = vld [vmem:[#allocation34_spill] sm:$0xff] }
 0x21b   : > { %2290 = vmatpush.bf16.msrb.mxu0 %v1741_v22  ;;  %2304 = vmatpush.bf16.msrb.mxu1 %v1773_v39  ;;  %v1825_v40 = vpack.c.bf16 %v1525_v43, %v1521_v21  ;;  %v2044_v30 = vadd.f32 %v2043_v15, %v2030_v0  ;;  %v2059_v22 = vpop.f32.mrf.mxu3  ;;  %v1584_v21 = vld [vmem:[#allocation2 + $0x18] sm:$0xff] }
 0x21d   : > { %v2058_v46 = vadd.f32 %v2057_v51, %v2044_v30  ;;  %v1588_v51 = vld [vmem:[#allocation2 + $0x28] sm:$0xff] }
 0x21e   : > { %2318 = vmatpush.bf16.msrb.mxu2 %v1805_v20  ;;  %2332 = vmatpush.bf16.msrb.mxu3 %v1837_v27  ;;  %v2031_v25 = vpop.f32.mrf.mxu1 }
 0x21f   : > { %2291 = vmatpush.bf16.msrb.mxu0 %v1737_v19  ;;  %2305 = vmatpush.bf16.msrb.mxu1 %v1769_v26  ;;  %v2032_v37 = vadd.f32 %v2031_v25, %v2017_v14 }
 0x220   : > { %v2045_v1 = vpop.f32.mrf.mxu2 }
 0x221   : > { %v2046_v8 = vadd.f32 %v2045_v1, %v2032_v37 }
 0x222   : > { %2319 = vmatpush.bf16.msrb.mxu2 %v1801_v45  ;;  %2333 = vmatpush.bf16.msrb.mxu3 %v1833_v61 }
 0x223   : > { %2292 = vmatpush.bf16.msrb.mxu0 %v1733_v48  ;;  %2306 = vmatpush.bf16.msrb.mxu1 %v1765_v5  ;;  %v2060_v39 = vadd.f32 %v2059_v22, %v2046_v8 }
 0x226   : > { %2320 = vmatpush.bf16.msrb.mxu2 %v1797_v32  ;;  %2334 = vmatpush.bf16.msrb.mxu3 %v1829_v56 }
 0x227   : > { %2293 = vmatpush.bf16.msrb.mxu0 %v1729_v9  ;;  %2307 = vmatpush.bf16.msrb.mxu1 %v1761_v38 }
 0x229   : > { %v2071_v41 = vpop.f32.mrf.mxu0  ;;  %v2085_v59 = vpop.f32.mrf.mxu1 }
 0x22a   : > { %2321 = vmatpush.bf16.msrb.mxu2 %v1793_v36  ;;  %2335 = vmatpush.bf16.msrb.mxu3 %v1825_v40  ;;  %v2072_v62 = vadd.f32 %v2071_v41, %v2058_v46 }
 0x22b   : > { %2294 = vmatmul.bf16.vlgmr.msrb.gmra.mxu0 %v5274_v23  ;;  %2308 = vmatmul.bf16.vlgmr.msrb.gmra.mxu1 %v5275_v31 }
 0x22c   : > { %v2086_v58 = vadd.f32 %v2085_v59, %v2072_v62 }
 0x22d   : > { %2322 = vmatmul.bf16.vlgmr.msrb.gmra.mxu2 %v5276_v16  ;;  %2336 = vmatmul.bf16.vlgmr.msrb.gmra.mxu3 %v5277_v17 }
 0x230   : > { %v2099_v49 = vpop.f32.mrf.mxu2  ;;  %v2113_v20 = vpop.f32.mrf.mxu3 }
 0x231   : > { %v2073_v44 = vpop.f32.mrf.mxu0  ;;  %v2100_v63 = vadd.f32 %v2099_v49, %v2086_v58  ;;  %v2087_v27 = vpop.f32.mrf.mxu1 }
 0x232   : > { %v2074_v42 = vadd.f32 %v2073_v44, %v2060_v39 }
 0x233   : > { %v2114_v28 = vadd.f32 %v2113_v20, %v2100_v63 }
 0x234   : > { %v2088_v47 = vadd.f32 %v2087_v27, %v2074_v42 }
 0x235   : > { %v2343_v2 = vadd.f32 %v2114_v28, %v1583_v11 }
 0x237   : > { %2351 = vst [vmem:[#allocation2] sm:$0xff] %v2343_v2  ;;  %v1585_v2 = vld [vmem:[#allocation2 + $0x10] sm:$0xff] }
 0x238   : > { %v2101_v19 = vpop.f32.mrf.mxu2  ;;  %v2115_v50 = vpop.f32.mrf.mxu3 }
 0x239   : > { %v2102_v35 = vadd.f32 %v2101_v19, %v2088_v47 }
 0x23b   : > { %v2116_v18 = vadd.f32 %v2115_v50, %v2102_v35 }
 0x23d   : > { %v2347_v26 = vadd.f32 %v2116_v18, %v1587_v60 }
 0x23f   : > { %2355 = vst [vmem:[#allocation2 + $0x20] sm:$0xff] %v2347_v26 }
 0x249   : > { %v2127_v12 = vpop.f32.mrf.mxu0  ;;  %v2141_v55 = vpop.f32.mrf.mxu1 }
 0x24a   : > { %v2142_v54 = vadd.f32 %v2141_v55, %v2127_v12  ;;  %v1589_v12 = vld [vmem:[#allocation2 + $0x38] sm:$0xff] }
 0x250   : > { %v2155_v13 = vpop.f32.mrf.mxu2  ;;  %v2169_v45 = vpop.f32.mrf.mxu3 }
 0x251   : > { %v2129_v4 = vpop.f32.mrf.mxu0  ;;  %v2143_v57 = vpop.f32.mrf.mxu1  ;;  %v2156_v61 = vadd.f32 %v2155_v13, %v2142_v54 }
 0x252   : > { %v2144_v24 = vadd.f32 %v2143_v57, %v2129_v4 }
 0x253   : > { %v2170_v7 = vadd.f32 %v2169_v45, %v2156_v61 }
 0x258   : > { %v2157_v34 = vpop.f32.mrf.mxu2  ;;  %v2171_v48 = vpop.f32.mrf.mxu3 }
 0x259   : > { %v2158_v3 = vadd.f32 %v2157_v34, %v2144_v24 }
 0x25b   : > { %v2172_v10 = vadd.f32 %v2171_v48, %v2158_v3 }
 0x269   : > { %v2183_v29 = vpop.f32.mrf.mxu0  ;;  %v2197_v5 = vpop.f32.mrf.mxu1 }
 0x26a   : > { %v2184_v33 = vadd.f32 %v2183_v29, %v2170_v7 }
 0x26c   : > { %v2198_v6 = vadd.f32 %v2197_v5, %v2184_v33 }
 0x270   : > { %v2211_v53 = vpop.f32.mrf.mxu2  ;;  %v2225_v56 = vpop.f32.mrf.mxu3 }
 0x271   : > { %v2185_v32 = vpop.f32.mrf.mxu0  ;;  %v2212_v52 = vadd.f32 %v2211_v53, %v2198_v6  ;;  %v2199_v38 = vpop.f32.mrf.mxu1 }
 0x272   : > { %v2186_v43 = vadd.f32 %v2185_v32, %v2172_v10 }
 0x273   : > { %v2226_v9 = vadd.f32 %v2225_v56, %v2212_v52 }
 0x274   : > { %v2200_v40 = vadd.f32 %v2199_v38, %v2186_v43 }
 0x275   : > { %v2344_v36 = vadd.f32 %v2226_v9, %v1584_v21 }
 0x277   : > { %2352 = vst [vmem:[#allocation2 + $0x18] sm:$0xff] %v2344_v36 }
 0x278   : > { %v2213_v15 = vpop.f32.mrf.mxu2  ;;  %v2227_v14 = vpop.f32.mrf.mxu3 }
 0x279   : > { %v2214_v0 = vadd.f32 %v2213_v15, %v2200_v40 }
 0x27b   : > { %v2228_v23 = vadd.f32 %v2227_v14, %v2214_v0 }
 0x27d   : > { %v2348_v25 = vadd.f32 %v2228_v23, %v1588_v51 }
 0x27f   : > { %2356 = vst [vmem:[#allocation2 + $0x28] sm:$0xff] %v2348_v25 }
 0x289   : > { %v2239_v31 = vpop.f32.mrf.mxu0  ;;  %v2253_v30 = vpop.f32.mrf.mxu1 }
 0x28a   : > { %v2254_v1 = vadd.f32 %v2253_v30, %v2239_v31 }
 0x290   : > { %v2267_v16 = vpop.f32.mrf.mxu2  ;;  %v2281_v17 = vpop.f32.mrf.mxu3 }
 0x291   : > { %v2241_v46 = vpop.f32.mrf.mxu0  ;;  %v2255_v37 = vpop.f32.mrf.mxu1  ;;  %v2268_v41 = vadd.f32 %v2267_v16, %v2254_v1 }
 0x292   : > { %v2256_v8 = vadd.f32 %v2255_v37, %v2241_v46 }
 0x293   : > { %v2282_v59 = vadd.f32 %v2281_v17, %v2268_v41 }
 0x298   : > { %v2269_v22 = vpop.f32.mrf.mxu2  ;;  %v2283_v58 = vpop.f32.mrf.mxu3 }
 0x299   : > { %v2270_v49 = vadd.f32 %v2269_v22, %v2256_v8 }
 0x29b   : > { %v2284_v42 = vadd.f32 %v2283_v58, %v2270_v49 }
 0x2a8   : > { %v2295_v62 = vpop.f32.mrf.mxu0  ;;  %v2309_v44 = vpop.f32.mrf.mxu1 }
 0x2a9   : > { %v2296_v39 = vadd.f32 %v2295_v62, %v2282_v59 }
 0x2ab   : > { %v2310_v63 = vadd.f32 %v2309_v44, %v2296_v39 }
 0x2b0   : > { %v2297_v11 = vpop.f32.mrf.mxu0  ;;  %v2323_v20 = vpop.f32.mrf.mxu2 }
 0x2b1   : > { %v2324_v28 = vadd.f32 %v2323_v20, %v2310_v63  ;;  %v2337_v27 = vpop.f32.mrf.mxu3  ;;  %v2298_v47 = vadd.f32 %v2297_v11, %v2284_v42  ;;  %v2311_v60 = vpop.f32.mrf.mxu1 }
 0x2b3   : > { %v2338_v19 = vadd.f32 %v2337_v27, %v2324_v28  ;;  %v2312_v50 = vadd.f32 %v2311_v60, %v2298_v47 }
 0x2b5   : > { %v2345_v35 = vadd.f32 %v2338_v19, %v1585_v2 }
 0x2b7   : > { %2353 = vst [vmem:[#allocation2 + $0x10] sm:$0xff] %v2345_v35 }
 0x2b8   : > { %v2325_v18 = vpop.f32.mrf.mxu2 }
 0x2b9   : > { %v2326_v26 = vadd.f32 %v2325_v18, %v2312_v50  ;;  %v2339_v55 = vpop.f32.mrf.mxu3 }
 0x2bb   : > { %v2340_v13 = vadd.f32 %v2339_v55, %v2326_v26 }
 0x2bd   : > { %v2349_v54 = vadd.f32 %v2340_v13, %v1589_v12 }
 0x2bf   : > { %2357 = vst [vmem:[#allocation2 + $0x38] sm:$0xff] %v2349_v54 }
 0x2c0 PF: > { %p2556_p3 = scmp.ne.s32.totalorder %s2880_s21, 2 }
 0x2c2   : > { %2361 = sbr.rel (%p2556_p3) target bundleno = 720 (0x2d0), region = 48 }
 0x2c7   : > { %v2362_v45 = vld [vmem:[#allocation2 + $0x30] sm:$0xff]  ;;  %v2363_v4 = vld [vmem:[#allocation2] sm:$0xff]  ;;  %v2364_v57 = vld [vmem:[#allocation2 + $0x18] sm:$0xff] }
 0x2c8   : > { %2370 = vst [vmem:[%s3160_s28] sm:$0xff] %v2362_v45  ;;  %v2365_v61 = vld [vmem:[#allocation2 + $0x10] sm:$0xff]  ;;  %v2366_v7 = vld [vmem:[#allocation2 + $0x8] sm:$0xff]  ;;  %v2367_v34 = vld [vmem:[#allocation2 + $0x20] sm:$0xff] }
 0x2c9   : > { %2371 = vst [vmem:[%s3160_s28 + $0x8] sm:$0xff] %v2363_v4  ;;  %v2368_v24 = vld [vmem:[#allocation2 + $0x28] sm:$0xff]  ;;  %v2369_v48 = vld [vmem:[#allocation2 + $0x38] sm:$0xff] }
 0x2ca   : > { %2372 = vst [vmem:[%s3160_s28 + $0x10] sm:$0xff] %v2364_v57 }
 0x2cb   : > { %2373 = vst [vmem:[%s3160_s28 + $0x18] sm:$0xff] %v2365_v61 }
 0x2cc   : > { %2374 = vst [vmem:[%s3160_s28 + $0x20] sm:$0xff] %v2366_v7 }
 0x2cd   : > { %2375 = vst [vmem:[%s3160_s28 + $0x28] sm:$0xff] %v2367_v34 }
 0x2ce   : > { %2376 = vst [vmem:[%s3160_s28 + $0x30] sm:$0xff] %v2368_v24 }
 0x2cf   : > { %2377 = vst [vmem:[%s3160_s28 + $0x38] sm:$0xff] %v2369_v48 }
 0x2d0 PF: > { %s2572_s21 = sshll.u32 %s2884_s22, 5  ;;  %s2391_s11 = sshll.u32 %s3160_s28, 4  ;;  %s2392_s11 = int_to_ptr.vmem [resolvable:$true] %s2391_s11 }
 0x2d1   : > { %s2390_s24 = scalar_lea.hbm %s5112_s3, %s2572_s21  ;;  %s2379_s14 = scalar_lea.sflag [#allocation8], %s3142_s13 }
 0x2d2   : > { %s2393_s26 = sshll.u32 %s2390_s24, 4  ;;  %s2788_s22 = scalar_lea.hbm %s5112_s3, 128  ;;  %s2394_s26 = int_to_ptr.hbm [resolvable:$true] %s2393_s26 }
 0x2d3   : > { %s2782_s10 = sshra.s32 %s2394_s26, 4  ;;  %s2783_s10 = int_to_ptr.hbm [resolvable:$true] %s2782_s10 }
 0x2d4   : > { %s2784_s20 = scalar_lea.hbm %s2783_s10, 64  ;;  %p2789_p1 = scmp.lt.s32.totalorder %s2783_s10, %s5112_s3 }
 0x2d5   : > { %p2785_p10 = scmp.ne.s32.totalorder %s2783_s10, %s2784_s20  ;;  %p2790_p4 = scmp.lt.s32.totalorder %s2788_s22, %s2784_s20 }
 0x2d7   : > { %p2786_p8 = pnand %p2785_p10, %p3062_p2  ;;  %p2791_p11 = por %p2790_p4, %p2789_p1 }
 0x2d9   : > { %p2787_p6 = pneg %p2786_p8 }
 0x2db   : > { %p2792_p12 = pnand %p2791_p11, %p2787_p6 }
 0x2dd   : > { %2795 = shalt.err (!%p2792_p12)
}
 0x2de   : > { %s2903_s13 = smov 512   ;;  %s2904_s28 = smov 1024  }
 0x2df   : > { %s2905_s8 = smov 32  }
 0x2e0   : > { %2581 = dma.vmem_to_hbm [thread:$0]  (%p3062_p2), %s2392_s11, 1024, %s2394_s26, %s2379_s14, %s2903_s13, %s2904_s28, %s2905_s8  }
 0x2e1 PF: > { %s5278_s30 = sld [smem:[#allocation20_spill]]  ;;  %p2599_p5 = scmp.ge.s32.totalorder %s2896_s25, 2 }
 0x2e3   : > { %p2595_p13 = pnand %p2599_p5, %p3069_p9 }
 0x2e5   : > { %p2596_p7 = pneg %p2595_p13 }
 0x2e7   : > { %s2408_s4 = sand.u32 1, %s5278_s30  }
 0x2e8   : > { %s2409_s19 = scalar_lea.sflag [#allocation8], %s2408_s4 }
 0x2e9   : > { %2851 = dma.done.wait (%p2596_p7), %s2409_s19, 1024  }
 0x2ea   : > { %2853 = vsyncadd (%p2596_p7), %s2409_s19, 4294966272  ;;  %s30_s25 = sadd.s32 1, %s2896_s25   ;;  %s5280_s6 = sld [smem:[#allocation27_spill]] }
 0x2eb   : > { %p27_p0 = scmp.ge.s32.totalorder %s30_s25, 8   ;;  %s5281_s9 = sld [smem:[#allocation21_spill]] }
 0x2ec   : > { %s5282_s20 = sld [smem:[#allocation25_spill]]  ;;  %s5286_s16 = smov %s2860_s17 }
 0x2ed   : > { %s5283_s22 = sld [smem:[#allocation22_spill]]  ;;  %s5287_s17 = smov %s2864_s18 }
 0x2ee   : > { %s5284_s5 = sld [smem:[#allocation23_spill]]  ;;  %s5289_s19 = smov %s2872_s0 }
 0x2ef   : > { %s5285_s24 = sld [smem:[#allocation24_spill]]  ;;  %s5291_s21 = smov %s2888_s23 }
 0x2f0   : > { %s5288_s18 = smov %s5280_s6  ;;  %29 = sbr.rel (!%p27_p0) target bundleno = 17 (0x11), region = 100 }
 0x2f1   : > { %s5290_s0 = smov %s5281_s9 }
 0x2f4   : > { %s5292_s23 = smov %s5284_s5 }
 0x2f5   :  { %2415 = vsyncpa [#allocation7], 1 }
 0x2f6   :  { %2417 = vsyncpa [#allocation7 + $0x1], 1 }
 0x2f7   :  { %2418 = vsyncpa [#allocation10], 1 }
 0x2f8   :  { %2420 = vsyncpa [#allocation10 + $0x1], 1 }
 0x2f9   :  { %2421 = vsyncpa [#allocation8], 1 }
 0x2fa   :  { %2423 = vsyncpa [#allocation8 + $0x1], 1 }

</bundles_post_ra>
